<compile_context>
chip_gen: v6e
topology: v6e:2x2x1
jax: 0.10.0
libtpu: 0.0.40
codegen_flags: <defaults>
</compile_context>

<pallas_src>
import functools

import jax
import jax.numpy as jnp
from jax.experimental import pallas as pl
from jax.experimental.pallas import tpu as pltpu

NEG_INF = -1e9
COMPUTE_DTYPE = jnp.bfloat16   # MXU operand dtype (accumulation stays f32)

_WEIGHT_ORDER = ("sa_wqkv", "sa_bqkv", "sa_wo", "sa_bo",
                 "ca_wqkv", "ca_bqkv", "ca_wo", "ca_bo",
                 "w1", "b1", "w2", "b2",
                 "g1", "be1", "g2", "be2", "g3", "be3")


# ---------------------------------------------------------------------------
# One-time weight preparation (hoisted out of the per-call path)
# ---------------------------------------------------------------------------
def prepare_decoder_params(params, nhead, compute_dtype=COMPUTE_DTYPE):
    """Head-major fused-QKV layout, 1/sqrt(hd) folded into q, bf16 weights."""
    D = params["sa_wqkv"].shape[-1]
    hd = D // nhead
    scale = 1.0 / float(hd) ** 0.5
    # per-column scale for the fused (q|k|v) output dim: q columns get 1/sqrt(hd)
    col_scale = jnp.concatenate([jnp.full((hd,), scale, jnp.float32),
                                 jnp.ones((2 * hd,), jnp.float32)])

    def fuse_qkv(wqkv, bqkv):
        # wqkv: (3, D, D) -> (nhead, D, 3*hd); bqkv: (3, 1, D) -> (nhead, 1, 3*hd)
        w = (wqkv.reshape(3, D, nhead, hd)
                  .transpose(2, 1, 0, 3)            # (nhead, D, 3, hd)
                  .reshape(nhead, D, 3 * hd))
        b = (bqkv.reshape(3, nhead, hd)
                  .transpose(1, 0, 2)               # (nhead, 3, hd)
                  .reshape(nhead, 1, 3 * hd))
        return (w * col_scale).astype(compute_dtype), (b * col_scale).astype(jnp.float32)

    sa_wqkv, sa_bqkv = fuse_qkv(params["sa_wqkv"], params["sa_bqkv"])
    ca_wqkv, ca_bqkv = fuse_qkv(params["ca_wqkv"], params["ca_bqkv"])

    out = {
        "sa_wqkv": sa_wqkv, "sa_bqkv": sa_bqkv,
        "sa_wo": params["sa_wo"].reshape(nhead, hd, D).astype(compute_dtype),
        "sa_bo": params["sa_bo"].astype(jnp.float32),
        "ca_wqkv": ca_wqkv, "ca_bqkv": ca_bqkv,
        "ca_wo": params["ca_wo"].reshape(nhead, hd, D).astype(compute_dtype),
        "ca_bo": params["ca_bo"].astype(jnp.float32),
        "w1": params["w1"].astype(compute_dtype), "b1": params["b1"].astype(jnp.float32),
        "w2": params["w2"].astype(compute_dtype), "b2": params["b2"].astype(jnp.float32),
    }
    for k in ("g1", "be1", "g2", "be2", "g3", "be3"):
        out[k] = params[k].astype(jnp.float32)
    return out


# ---------------------------------------------------------------------------
# In-kernel building blocks
# ---------------------------------------------------------------------------
def _layernorm(x, gamma, beta, eps=1e-5):
    """Row-wise LayerNorm on a 2-D (rows, D) array. gamma/beta: (1, D)."""
    mu = jnp.mean(x, axis=-1, keepdims=True)
    xc = x - mu
    var = jnp.mean(xc * xc, axis=-1, keepdims=True)
    return xc * jax.lax.rsqrt(var + eps) * gamma + beta


def _mha(x_q, x_kv, wqkv, bqkv, wo, bo, bias, nhead, hd, self_attention):
    """Multi-head attention over a whole batch chunk.

    x_q:  (Bc, Tq, D) f32 queries
    x_kv: (Bc, Tk, D) f32 keys/values
    wqkv: (nhead, D, 3*hd) bf16 fused q|k|v weights (scale folded into q cols)
    bqkv: (nhead, 1, 3*hd) f32
    wo:   (nhead, hd, D)  bf16 head-major output projection
    bo:   (1, D)          f32
    bias: additive attention bias broadcastable to (Bc, Tq, Tk)
    returns (Bc*Tq, D) float32
    """
    Bc, Tq, D = x_q.shape
    Tk = x_kv.shape[1]
    cdt = wqkv.dtype                     # bf16 MXU operand dtype

    xq2 = x_q.reshape(Bc * Tq, D).astype(cdt)
    xk2 = xq2 if self_attention else x_kv.reshape(Bc * Tk, D).astype(cdt)

    # Output-projection bias folded into the accumulator init (one broadcast).
    out = jnp.broadcast_to(bo, (Bc * Tq, D))

    for h in range(nhead):               # static unroll; leading-axis head split
        if self_attention:
            # one fused (rows, D) x (D, 3*hd) MXU call gives q|k|v for this head
            qkv = jnp.dot(xq2, wqkv[h], preferred_element_type=jnp.float32) + bqkv[h]
            qh = qkv[:, :hd]
            kh = qkv[:, hd:2 * hd]
            vh = qkv[:, 2 * hd:]
        else:
            qh = (jnp.dot(xq2, wqkv[h, :, :hd],
                          preferred_element_type=jnp.float32) + bqkv[h, :, :hd])
            kv = (jnp.dot(xk2, wqkv[h, :, hd:],
                          preferred_element_type=jnp.float32) + bqkv[h, :, hd:])
            kh = kv[:, :hd]
            vh = kv[:, hd:]

        qh = qh.reshape(Bc, Tq, hd)
        kh = kh.reshape(Bc, Tk, hd)
        vh = vh.reshape(Bc, Tk, hd)

        # Batched scores; contraction over last dims absorbs the transpose into
        # the MXU operand feed (no explicit kh.T / XLU transpose).
        s = jnp.einsum("bqd,bkd->bqk", qh.astype(cdt), kh.astype(cdt),
                       preferred_element_type=jnp.float32) + bias
        s = s - jnp.max(s, axis=-1, keepdims=True)
        p = jnp.exp(s)
        p = p * pl.reciprocal(jnp.sum(p, axis=-1, keepdims=True), approx=True)

        ctx = jnp.einsum("bqk,bkd->bqd", p.astype(cdt), vh.astype(cdt),
                         preferred_element_type=jnp.float32)       # (Bc,Tq,hd)

        # Per-head contribution to the output projection (no head concat).
        out = out + jnp.dot(ctx.reshape(Bc * Tq, hd).astype(cdt), wo[h],
                            preferred_element_type=jnp.float32)
    return out


# ---------------------------------------------------------------------------
# Pallas kernel: one decoder layer for a chunk of batch elements
# ---------------------------------------------------------------------------
def decoder_layer_kernel(tgt_ref, src_ref, attn_bias_ref, tkpm_ref, skpm_ref,
                         sa_wqkv_ref, sa_bqkv_ref, sa_wo_ref, sa_bo_ref,
                         ca_wqkv_ref, ca_bqkv_ref, ca_wo_ref, ca_bo_ref,
                         w1_ref, b1_ref, w2_ref, b2_ref,
                         g1_ref, be1_ref, g2_ref, be2_ref, g3_ref, be3_ref,
                         out_ref, *, nhead):
    Bc, T, D = tgt_ref.shape
    hd = D // nhead

    tgt = tgt_ref[...]                                    # (Bc, T, D) f32
    src = src_ref[...]                                    # (Bc, S, D) f32

    # Additive masks assembled in-kernel from small bias vectors.
    self_bias = attn_bias_ref[...][None, :, :] + tkpm_ref[...]    # (Bc, T, T)
    cross_bias = skpm_ref[...]                                    # (Bc, 1, S)

    # --- self attention + residual + norm1 (dropout == identity at inference)
    sa = _mha(tgt, tgt, sa_wqkv_ref[...], sa_bqkv_ref[...],
              sa_wo_ref[...], sa_bo_ref[...], self_bias, nhead, hd,
              self_attention=True)                                # (Bc*T, D)
    x = _layernorm(tgt.reshape(Bc * T, D) + sa, g1_ref[...], be1_ref[...])

    # --- cross attention + residual + norm2
    ca = _mha(x.reshape(Bc, T, D), src, ca_wqkv_ref[...], ca_bqkv_ref[...],
              ca_wo_ref[...], ca_bo_ref[...], cross_bias, nhead, hd,
              self_attention=False)
    x = _layernorm(x + ca, g2_ref[...], be2_ref[...])

    # --- feed forward (Linear -> ReLU -> Linear) + residual + norm3
    hdn = jnp.maximum(jnp.dot(x.astype(w1_ref.dtype), w1_ref[...],
                              preferred_element_type=jnp.float32) + b1_ref[...], 0.0)
    ff = jnp.dot(hdn.astype(w2_ref.dtype), w2_ref[...],
                 preferred_element_type=jnp.float32) + b2_ref[...]
    y = _layernorm(x + ff, g3_ref[...], be3_ref[...])

    out_ref[...] = y.reshape(Bc, T, D)


# ---------------------------------------------------------------------------
# VMEM budgeting helpers
# ---------------------------------------------------------------------------
def _vmem_budget_bytes():
    """~75% of per-core VMEM (128 MiB v5e/v6e, 64 MiB/core v7x); safe fallback."""
    try:
        cap = pltpu.get_tpu_info().vmem_capacity_bytes
    except Exception:
        cap = 64 * 2 ** 20            # conservative (v7x per-core)
    return int(cap) * 3 // 4


def _per_example_bytes(T, S, D, F):
    # Rough f32 footprint of live activations/intermediates for one example.
    return 4 * (6 * T * D + 2 * S * D + T * max(T, S) + T * F)


def _pick_batch_chunk(B, T, S, D, F, act_budget_bytes):
    per_ex = max(1, _per_example_bytes(T, S, D, F))
    max_chunk = max(1, act_budget_bytes // per_ex)
    # Keep >= 8 grid steps so both v7x TensorCores see >= 4 pipelined steps each.
    chunk_for_steps = max(1, pl.cdiv(B, 8))
    return int(max(1, min(B, max_chunk, chunk_for_steps)))


# ---------------------------------------------------------------------------
# Wrapper: mask bias prep, BlockSpecs, pallas_call
# ---------------------------------------------------------------------------
def transformer_decoder_layer(src, tgt, tgt_mask_attn,
                              src_key_padding_mask, tgt_key_padding_mask,
                              prepped, nhead, batch_chunk=None):
    B, T, D = tgt.shape
    S = src.shape[1]
    F = prepped["w1"].shape[-1]

    weights = [prepped[k] for k in _WEIGHT_ORDER]
    weight_bytes = sum(int(w.size) * w.dtype.itemsize for w in weights)

    vmem_budget = _vmem_budget_bytes()
    if batch_chunk is None:
        batch_chunk = _pick_batch_chunk(
            B, T, S, D, F, max(vmem_budget - weight_bytes, 1 << 20))
    num_steps = pl.cdiv(B, batch_chunk)
    Bp = num_steps * batch_chunk

    # Boolean masks -> small additive f32 bias arrays; the per-batch (T,T)/(1,S)
    # masks are built inside the kernel, never materialized (B,T,T) in HBM.
    attn_bias = jnp.where(tgt_mask_attn, NEG_INF, 0.0).astype(jnp.float32)            # (T,T)
    tkpm_bias = jnp.where(tgt_key_padding_mask, NEG_INF, 0.0).astype(jnp.float32)[:, None, :]  # (B,1,T)
    skpm_bias = jnp.where(src_key_padding_mask, NEG_INF, 0.0).astype(jnp.float32)[:, None, :]  # (B,1,S)

    tgt_p, src_p = tgt, src
    if Bp != B:
        pad = Bp - B
        tgt_p = jnp.pad(tgt, ((0, pad), (0, 0), (0, 0)))
        src_p = jnp.pad(src, ((0, pad), (0, 0), (0, 0)))
        tkpm_bias = jnp.pad(tkpm_bias, ((0, pad), (0, 0), (0, 0)))
        skpm_bias = jnp.pad(skpm_bias, ((0, pad), (0, 0), (0, 0)))

    # Explicit VMEM limit: single-buffered weights + double-buffered activation
    # tiles + live intermediates, with headroom; capped at the per-gen budget.
    act_tile_bytes = 4 * batch_chunk * (2 * T * D + S * D + T + S)
    est = weight_bytes + 2 * act_tile_bytes + batch_chunk * _per_example_bytes(T, S, D, F)
    vmem_limit = int(max(32 * 2 ** 20, min(vmem_budget, 2 * est)))

    kernel = functools.partial(decoder_layer_kernel, nhead=nhead)
    out_shape = jax.ShapeDtypeStruct((Bp, T, D), jnp.float32)

    def batch_spec(d1, d2):
        return pl.BlockSpec((batch_chunk, d1, d2), lambda i: (i, 0, 0))

    def run(weight_mode):
        def rep_spec(shape):
            zeros = (0,) * len(shape)
            if weight_mode is None:
                return pl.BlockSpec(shape, lambda i, z=zeros: z)
            return pl.BlockSpec(shape, lambda i, z=zeros: z, pipeline_mode=weight_mode)

        in_specs = [batch_spec(T, D),        # tgt chunk
                    batch_spec(S, D),        # src chunk
                    rep_spec((T, T)),        # causal attn-mask bias (replicated)
                    batch_spec(1, T),        # tgt key-padding bias
                    batch_spec(1, S)]        # src key-padding bias
        in_specs += [rep_spec(w.shape) for w in weights]

        return pl.pallas_call(
            kernel,
            out_shape=out_shape,
            grid=(num_steps,),
            in_specs=in_specs,
            out_specs=pl.BlockSpec((batch_chunk, T, D), lambda i: (i, 0, 0)),
            compiler_params=pltpu.CompilerParams(
                dimension_semantics=("parallel",),
                vmem_limit_bytes=vmem_limit),
        )(tgt_p, src_p, attn_bias, tkpm_bias, skpm_bias, *weights)

    try:
        # Single-buffer the replicated weights (constant index_map -> no re-DMA).
        out = run(pl.Buffered(1))
    except Exception:
        # Fallback for jax versions without single-buffer pipeline_mode support.
        out = run(None)

    return out[:B]


# ---------------------------------------------------------------------------
# Pure-JAX reference (for correctness check; uses the raw f32 parameters)
# ---------------------------------------------------------------------------
def reference(src, tgt, tgt_mask_attn, src_kpm, tgt_kpm, p, nhead):
    NEG = jnp.float32(NEG_INF)
    self_mask = jnp.where(tgt_mask_attn[None] | tgt_kpm[:, None, :], NEG, 0.0)
    cross_mask = jnp.where(src_kpm[:, None, :], NEG, 0.0)

    def mha_one(q_in, kv_in, wqkv, bqkv, wo, bo, add_mask):
        D = q_in.shape[-1]
        hd = D // nhead
        q = q_in @ wqkv[0] + bqkv[0]
        k = kv_in @ wqkv[1] + bqkv[1]
        v = kv_in @ wqkv[2] + bqkv[2]
        qh = q.reshape(-1, nhead, hd).transpose(1, 0, 2)
        kh = k.reshape(-1, nhead, hd).transpose(1, 0, 2)
        vh = v.reshape(-1, nhead, hd).transpose(1, 0, 2)
        s = jnp.einsum("htd,hsd->hts", qh, kh) / (hd ** 0.5) + add_mask[None]
        a = jax.nn.softmax(s, axis=-1)
        ctx = jnp.einsum("hts,hsd->htd", a, vh).transpose(1, 0, 2).reshape(-1, D)
        return ctx @ wo + bo[0]

    def ln(x, g, b, eps=1e-5):
        mu = x.mean(-1, keepdims=True)
        var = ((x - mu) ** 2).mean(-1, keepdims=True)
        return (x - mu) / jnp.sqrt(var + eps) * g[0] + b[0]

    def one(tgt_b, src_b, sm_b, cm_b):
        sa = mha_one(tgt_b, tgt_b, p["sa_wqkv"], p["sa_bqkv"], p["sa_wo"], p["sa_bo"], sm_b)
        x = ln(tgt_b + sa, p["g1"], p["be1"])
        ca = mha_one(x, src_b, p["ca_wqkv"], p["ca_bqkv"], p["ca_wo"], p["ca_bo"], cm_b)
        x = ln(x + ca, p["g2"], p["be2"])
        ff = jnp.maximum(x @ p["w1"] + p["b1"][0], 0.0) @ p["w2"] + p["b2"][0]
        return ln(x + ff, p["g3"], p["be3"])

    return jax.vmap(one)(tgt, src, self_mask, cross_mask)


# ---------------------------------------------------------------------------
if __name__ == "__main__":
    B, S, T = 4, 12, 8
    D, F, NHEAD = 32, 64, 4

    key = jax.random.PRNGKey(0)
    ks = jax.random.split(key, 16)

    def w(k, shape, scale=0.05):
        return (scale * jax.random.normal(k, shape)).astype(jnp.float32)

    params = {
        # self-attention (q/k/v already split on a leading axis)
        "sa_wqkv": w(ks[0], (3, D, D)), "sa_bqkv": w(ks[1], (3, 1, D)),
        "sa_wo":   w(ks[2], (D, D)),    "sa_bo":   w(ks[3], (1, D)),
        # cross-attention
        "ca_wqkv": w(ks[4], (3, D, D)), "ca_bqkv": w(ks[5], (3, 1, D)),
        "ca_wo":   w(ks[6], (D, D)),    "ca_bo":   w(ks[7], (1, D)),
        # feed-forward
        "w1": w(ks[8], (D, F)), "b1": w(ks[9], (1, F)),
        "w2": w(ks[10], (F, D)), "b2": w(ks[11], (1, D)),
        # layer norms
        "g1": jnp.ones((1, D), jnp.float32), "be1": jnp.zeros((1, D), jnp.float32),
        "g2": jnp.ones((1, D), jnp.float32), "be2": jnp.zeros((1, D), jnp.float32),
        "g3": jnp.ones((1, D), jnp.float32), "be3": jnp.zeros((1, D), jnp.float32),
    }

    src = jax.random.normal(ks[12], (B, S, D), jnp.float32)
    tgt = jax.random.normal(ks[13], (B, T, D), jnp.float32)

    # causal mask: True above the diagonal (prevent attending to future tokens)
    tgt_mask_attn = jnp.triu(jnp.ones((T, T), dtype=bool), k=1)
    # key padding masks: True == padding (pad at the end of each sequence)
    src_lens = jnp.array([S, S - 3, S - 1, S - 5])
    tgt_lens = jnp.array([T, T - 2, T - 1, T - 3])
    src_key_padding_mask = jnp.arange(S)[None, :] >= src_lens[:, None]   # (B, S)
    tgt_key_padding_mask = jnp.arange(T)[None, :] >= tgt_lens[:, None]   # (B, T)

    # One-time weight preparation (head-major fused qkv, scale folded, bf16).
    prepped = prepare_decoder_params(params, NHEAD)

    y = transformer_decoder_layer(src, tgt, tgt_mask_attn,
                                  src_key_padding_mask, tgt_key_padding_mask,
                                  prepped, NHEAD)
    y = jax.block_until_ready(y)

    y_ref = reference(src, tgt, tgt_mask_attn,
                      src_key_padding_mask, tgt_key_padding_mask, params, NHEAD)
    assert y.shape == (B, T, D)
    # Tolerance accounts for bf16 MXU operands (f32 accumulation) vs f32 reference.
    assert jnp.allclose(y, y_ref, atol=2e-2, rtol=2e-2), "mismatch vs JAX reference"

    print("KERNEL_OK")
</pallas_src>

<mosaic_0001>
module attributes {stable_mosaic.version = 11 : i64} {
  func.func @decoder_layer_kernel(%arg0: i32, %arg1: memref<1x8x32xf32, #tpu.memory_space<vmem>>, %arg2: memref<1x12x32xf32, #tpu.memory_space<vmem>>, %arg3: memref<8x8xf32, #tpu.memory_space<vmem>>, %arg4: memref<1x1x8xf32, #tpu.memory_space<vmem>>, %arg5: memref<1x1x12xf32, #tpu.memory_space<vmem>>, %arg6: memref<4x32x24xbf16, #tpu.memory_space<vmem>>, %arg7: memref<4x1x24xf32, #tpu.memory_space<vmem>>, %arg8: memref<4x8x32xbf16, #tpu.memory_space<vmem>>, %arg9: memref<1x32xf32, #tpu.memory_space<vmem>>, %arg10: memref<4x32x24xbf16, #tpu.memory_space<vmem>>, %arg11: memref<4x1x24xf32, #tpu.memory_space<vmem>>, %arg12: memref<4x8x32xbf16, #tpu.memory_space<vmem>>, %arg13: memref<1x32xf32, #tpu.memory_space<vmem>>, %arg14: memref<32x64xbf16, #tpu.memory_space<vmem>>, %arg15: memref<1x64xf32, #tpu.memory_space<vmem>>, %arg16: memref<64x32xbf16, #tpu.memory_space<vmem>>, %arg17: memref<1x32xf32, #tpu.memory_space<vmem>>, %arg18: memref<1x32xf32, #tpu.memory_space<vmem>>, %arg19: memref<1x32xf32, #tpu.memory_space<vmem>>, %arg20: memref<1x32xf32, #tpu.memory_space<vmem>>, %arg21: memref<1x32xf32, #tpu.memory_space<vmem>>, %arg22: memref<1x32xf32, #tpu.memory_space<vmem>>, %arg23: memref<1x32xf32, #tpu.memory_space<vmem>>, %arg24: memref<1x8x32xf32, #tpu.memory_space<vmem>>) attributes {dimension_semantics = [#tpu.dimension_semantics<parallel>], iteration_bounds = array<i64: 4>, scalar_prefetch = 0 : i64, scratch_operands = 0 : i64, tpu.core_type = #tpu.core_type<tc>, window_params = [{transform_indices = @transform_0, window_bounds = array<i64: 1, 8, 32>}, {transform_indices = @transform_1, window_bounds = array<i64: 1, 12, 32>}, {pipeline_mode = #tpu.pipeline_mode<synchronous>, transform_indices = @transform_2, window_bounds = array<i64: 8, 8>}, {transform_indices = @transform_3, window_bounds = array<i64: 1, 1, 8>}, {transform_indices = @transform_4, window_bounds = array<i64: 1, 1, 12>}, {pipeline_mode = #tpu.pipeline_mode<synchronous>, transform_indices = @transform_5, window_bounds = array<i64: 4, 32, 24>}, {pipeline_mode = #tpu.pipeline_mode<synchronous>, transform_indices = @transform_6, window_bounds = array<i64: 4, 1, 24>}, {pipeline_mode = #tpu.pipeline_mode<synchronous>, transform_indices = @transform_7, window_bounds = array<i64: 4, 8, 32>}, {pipeline_mode = #tpu.pipeline_mode<synchronous>, transform_indices = @transform_8, window_bounds = array<i64: 1, 32>}, {pipeline_mode = #tpu.pipeline_mode<synchronous>, transform_indices = @transform_9, window_bounds = array<i64: 4, 32, 24>}, {pipeline_mode = #tpu.pipeline_mode<synchronous>, transform_indices = @transform_10, window_bounds = array<i64: 4, 1, 24>}, {pipeline_mode = #tpu.pipeline_mode<synchronous>, transform_indices = @transform_11, window_bounds = array<i64: 4, 8, 32>}, {pipeline_mode = #tpu.pipeline_mode<synchronous>, transform_indices = @transform_12, window_bounds = array<i64: 1, 32>}, {pipeline_mode = #tpu.pipeline_mode<synchronous>, transform_indices = @transform_13, window_bounds = array<i64: 32, 64>}, {pipeline_mode = #tpu.pipeline_mode<synchronous>, transform_indices = @transform_14, window_bounds = array<i64: 1, 64>}, {pipeline_mode = #tpu.pipeline_mode<synchronous>, transform_indices = @transform_15, window_bounds = array<i64: 64, 32>}, {pipeline_mode = #tpu.pipeline_mode<synchronous>, transform_indices = @transform_16, window_bounds = array<i64: 1, 32>}, {pipeline_mode = #tpu.pipeline_mode<synchronous>, transform_indices = @transform_17, window_bounds = array<i64: 1, 32>}, {pipeline_mode = #tpu.pipeline_mode<synchronous>, transform_indices = @transform_18, window_bounds = array<i64: 1, 32>}, {pipeline_mode = #tpu.pipeline_mode<synchronous>, transform_indices = @transform_19, window_bounds = array<i64: 1, 32>}, {pipeline_mode = #tpu.pipeline_mode<synchronous>, transform_indices = @transform_20, window_bounds = array<i64: 1, 32>}, {pipeline_mode = #tpu.pipeline_mode<synchronous>, transform_indices = @transform_21, window_bounds = array<i64: 1, 32>}, {pipeline_mode = #tpu.pipeline_mode<synchronous>, transform_indices = @transform_22, window_bounds = array<i64: 1, 32>}, {transform_indices = @transform_23, window_bounds = array<i64: 1, 8, 32>}]} {
    %c0 = arith.constant 0 : index
    %c0_0 = arith.constant 0 : index
    %c0_1 = arith.constant 0 : index
    %0 = vector.load %arg1[%c0, %c0_0, %c0_1] : memref<1x8x32xf32, #tpu.memory_space<vmem>>, vector<1x8x32xf32>
    %c0_2 = arith.constant 0 : index
    %c0_3 = arith.constant 0 : index
    %c0_4 = arith.constant 0 : index
    %1 = vector.load %arg2[%c0_2, %c0_3, %c0_4] : memref<1x12x32xf32, #tpu.memory_space<vmem>>, vector<1x12x32xf32>
    %c0_5 = arith.constant 0 : index
    %c0_6 = arith.constant 0 : index
    %2 = vector.load %arg3[%c0_5, %c0_6] : memref<8x8xf32, #tpu.memory_space<vmem>>, vector<8x8xf32>
    %3 = vector.shape_cast %2 : vector<8x8xf32> to vector<1x8x8xf32>
    %c0_7 = arith.constant 0 : index
    %c0_8 = arith.constant 0 : index
    %c0_9 = arith.constant 0 : index
    %4 = vector.load %arg4[%c0_7, %c0_8, %c0_9] : memref<1x1x8xf32, #tpu.memory_space<vmem>>, vector<1x1x8xf32>
    %5 = vector.broadcast %4 : vector<1x1x8xf32> to vector<1x8x8xf32>
    %6 = arith.addf %3, %5 : vector<1x8x8xf32>
    %c0_10 = arith.constant 0 : index
    %c0_11 = arith.constant 0 : index
    %c0_12 = arith.constant 0 : index
    %7 = vector.load %arg5[%c0_10, %c0_11, %c0_12] : memref<1x1x12xf32, #tpu.memory_space<vmem>>, vector<1x1x12xf32>
    %c0_13 = arith.constant 0 : index
    %c0_14 = arith.constant 0 : index
    %c0_15 = arith.constant 0 : index
    %8 = vector.load %arg6[%c0_13, %c0_14, %c0_15] : memref<4x32x24xbf16, #tpu.memory_space<vmem>>, vector<4x32x24xbf16>
    %c0_16 = arith.constant 0 : index
    %c0_17 = arith.constant 0 : index
    %c0_18 = arith.constant 0 : index
    %9 = vector.load %arg7[%c0_16, %c0_17, %c0_18] : memref<4x1x24xf32, #tpu.memory_space<vmem>>, vector<4x1x24xf32>
    %c0_19 = arith.constant 0 : index
    %c0_20 = arith.constant 0 : index
    %c0_21 = arith.constant 0 : index
    %10 = vector.load %arg8[%c0_19, %c0_20, %c0_21] : memref<4x8x32xbf16, #tpu.memory_space<vmem>>, vector<4x8x32xbf16>
    %c0_22 = arith.constant 0 : index
    %c0_23 = arith.constant 0 : index
    %11 = vector.load %arg9[%c0_22, %c0_23] : memref<1x32xf32, #tpu.memory_space<vmem>>, vector<1x32xf32>
    %12 = vector.shape_cast %0 : vector<1x8x32xf32> to vector<8x32xf32>
    %13 = arith.truncf %12 : vector<8x32xf32> to vector<8x32xbf16>
    %14 = vector.shape_cast %11 : vector<1x32xf32> to vector<1x32xf32>
    %15 = vector.broadcast %14 : vector<1x32xf32> to vector<8x32xf32>
    %16 = vector.extract_strided_slice %8 {offsets = [0, 0, 0], sizes = [1, 32, 24], strides = [1, 1, 1]} : vector<4x32x24xbf16> to vector<1x32x24xbf16>
    %17 = vector.shape_cast %16 : vector<1x32x24xbf16> to vector<32x24xbf16>
    %cst = arith.constant dense<0.000000e+00> : vector<8x24xf32>
    %18 = tpu.matmul %13, %17, %cst {dimension_numbers = #tpu.dot_dimension_numbers<[1], [0], [0], [1], [0, 0, 1, 1], [], []>} : vector<8x32xbf16>, vector<32x24xbf16>, vector<8x24xf32> -> vector<8x24xf32>
    %19 = vector.extract_strided_slice %9 {offsets = [0, 0, 0], sizes = [1, 1, 24], strides = [1, 1, 1]} : vector<4x1x24xf32> to vector<1x1x24xf32>
    %20 = vector.shape_cast %19 : vector<1x1x24xf32> to vector<1x24xf32>
    %21 = vector.broadcast %20 : vector<1x24xf32> to vector<8x24xf32>
    %22 = arith.addf %18, %21 : vector<8x24xf32>
    %23 = vector.extract_strided_slice %22 {offsets = [0, 0], sizes = [8, 8], strides = [1, 1]} : vector<8x24xf32> to vector<8x8xf32>
    %24 = vector.extract_strided_slice %22 {offsets = [0, 8], sizes = [8, 8], strides = [1, 1]} : vector<8x24xf32> to vector<8x8xf32>
    %25 = vector.extract_strided_slice %22 {offsets = [0, 16], sizes = [8, 8], strides = [1, 1]} : vector<8x24xf32> to vector<8x8xf32>
    %26 = vector.shape_cast %23 : vector<8x8xf32> to vector<1x8x8xf32>
    %27 = vector.shape_cast %24 : vector<8x8xf32> to vector<1x8x8xf32>
    %28 = vector.shape_cast %25 : vector<8x8xf32> to vector<1x8x8xf32>
    %29 = arith.truncf %26 : vector<1x8x8xf32> to vector<1x8x8xbf16>
    %30 = arith.truncf %27 : vector<1x8x8xf32> to vector<1x8x8xbf16>
    "tpu.trace_start"() <{level = 10 : i32, message = "bqd,bkd->bqk"}> : () -> ()
    %cst_24 = arith.constant dense<0.000000e+00> : vector<1x8x8xf32>
    %31 = tpu.matmul %29, %30, %cst_24 {dimension_numbers = #tpu.dot_dimension_numbers<[2], [2], [1], [1], [0, 0, 0, 1, 1, 1], [0], [0]>} : vector<1x8x8xbf16>, vector<1x8x8xbf16>, vector<1x8x8xf32> -> vector<1x8x8xf32>
    "tpu.trace_stop"() : () -> ()
    %32 = arith.addf %31, %6 : vector<1x8x8xf32>
    %cst_25 = arith.constant dense<0xFF800000> : vector<1x8xf32>
    %33 = vector.multi_reduction <maximumf>, %32, %cst_25 [2] : vector<1x8x8xf32> to vector<1x8xf32>
    %34 = vector.shape_cast %33 : vector<1x8xf32> to vector<1x8x1xf32>
    %35 = vector.broadcast %34 : vector<1x8x1xf32> to vector<1x8x8xf32>
    %36 = arith.subf %32, %35 : vector<1x8x8xf32>
    %37 = math.exp %36 : vector<1x8x8xf32>
    %cst_26 = arith.constant dense<0.000000e+00> : vector<1x8xf32>
    %38 = vector.multi_reduction <add>, %37, %cst_26 [2] : vector<1x8x8xf32> to vector<1x8xf32>
    %39 = vector.shape_cast %38 : vector<1x8xf32> to vector<1x8x1xf32>
    %40 = tpu.reciprocal %39 {approx = true} : vector<1x8x1xf32> -> vector<1x8x1xf32>
    %41 = vector.broadcast %40 : vector<1x8x1xf32> to vector<1x8x8xf32>
    %42 = arith.mulf %37, %41 : vector<1x8x8xf32>
    %43 = arith.truncf %42 : vector<1x8x8xf32> to vector<1x8x8xbf16>
    %44 = arith.truncf %28 : vector<1x8x8xf32> to vector<1x8x8xbf16>
    "tpu.trace_start"() <{level = 10 : i32, message = "bqk,bkd->bqd"}> : () -> ()
    %cst_27 = arith.constant dense<0.000000e+00> : vector<1x8x8xf32>
    %45 = tpu.matmul %43, %44, %cst_27 {dimension_numbers = #tpu.dot_dimension_numbers<[2], [1], [1], [2], [0, 0, 0, 1, 1, 2], [0], [0]>} : vector<1x8x8xbf16>, vector<1x8x8xbf16>, vector<1x8x8xf32> -> vector<1x8x8xf32>
    "tpu.trace_stop"() : () -> ()
    %46 = vector.shape_cast %45 : vector<1x8x8xf32> to vector<8x8xf32>
    %47 = arith.truncf %46 : vector<8x8xf32> to vector<8x8xbf16>
    %48 = vector.extract_strided_slice %10 {offsets = [0, 0, 0], sizes = [1, 8, 32], strides = [1, 1, 1]} : vector<4x8x32xbf16> to vector<1x8x32xbf16>
    %49 = vector.shape_cast %48 : vector<1x8x32xbf16> to vector<8x32xbf16>
    %cst_28 = arith.constant dense<0.000000e+00> : vector<8x32xf32>
    %50 = tpu.matmul %47, %49, %cst_28 {dimension_numbers = #tpu.dot_dimension_numbers<[1], [0], [0], [1], [0, 0, 1, 1], [], []>} : vector<8x8xbf16>, vector<8x32xbf16>, vector<8x32xf32> -> vector<8x32xf32>
    %51 = arith.addf %15, %50 : vector<8x32xf32>
    %52 = vector.extract_strided_slice %8 {offsets = [1, 0, 0], sizes = [1, 32, 24], strides = [1, 1, 1]} : vector<4x32x24xbf16> to vector<1x32x24xbf16>
    %53 = vector.shape_cast %52 : vector<1x32x24xbf16> to vector<32x24xbf16>
    %cst_29 = arith.constant dense<0.000000e+00> : vector<8x24xf32>
    %54 = tpu.matmul %13, %53, %cst_29 {dimension_numbers = #tpu.dot_dimension_numbers<[1], [0], [0], [1], [0, 0, 1, 1], [], []>} : vector<8x32xbf16>, vector<32x24xbf16>, vector<8x24xf32> -> vector<8x24xf32>
    %55 = vector.extract_strided_slice %9 {offsets = [1, 0, 0], sizes = [1, 1, 24], strides = [1, 1, 1]} : vector<4x1x24xf32> to vector<1x1x24xf32>
    %56 = vector.shape_cast %55 : vector<1x1x24xf32> to vector<1x24xf32>
    %57 = vector.broadcast %56 : vector<1x24xf32> to vector<8x24xf32>
    %58 = arith.addf %54, %57 : vector<8x24xf32>
    %59 = vector.extract_strided_slice %58 {offsets = [0, 0], sizes = [8, 8], strides = [1, 1]} : vector<8x24xf32> to vector<8x8xf32>
    %60 = vector.extract_strided_slice %58 {offsets = [0, 8], sizes = [8, 8], strides = [1, 1]} : vector<8x24xf32> to vector<8x8xf32>
    %61 = vector.extract_strided_slice %58 {offsets = [0, 16], sizes = [8, 8], strides = [1, 1]} : vector<8x24xf32> to vector<8x8xf32>
    %62 = vector.shape_cast %59 : vector<8x8xf32> to vector<1x8x8xf32>
    %63 = vector.shape_cast %60 : vector<8x8xf32> to vector<1x8x8xf32>
    %64 = vector.shape_cast %61 : vector<8x8xf32> to vector<1x8x8xf32>
    %65 = arith.truncf %62 : vector<1x8x8xf32> to vector<1x8x8xbf16>
    %66 = arith.truncf %63 : vector<1x8x8xf32> to vector<1x8x8xbf16>
    "tpu.trace_start"() <{level = 10 : i32, message = "bqd,bkd->bqk"}> : () -> ()
    %cst_30 = arith.constant dense<0.000000e+00> : vector<1x8x8xf32>
    %67 = tpu.matmul %65, %66, %cst_30 {dimension_numbers = #tpu.dot_dimension_numbers<[2], [2], [1], [1], [0, 0, 0, 1, 1, 1], [0], [0]>} : vector<1x8x8xbf16>, vector<1x8x8xbf16>, vector<1x8x8xf32> -> vector<1x8x8xf32>
    "tpu.trace_stop"() : () -> ()
    %68 = arith.addf %67, %6 : vector<1x8x8xf32>
    %cst_31 = arith.constant dense<0xFF800000> : vector<1x8xf32>
    %69 = vector.multi_reduction <maximumf>, %68, %cst_31 [2] : vector<1x8x8xf32> to vector<1x8xf32>
    %70 = vector.shape_cast %69 : vector<1x8xf32> to vector<1x8x1xf32>
    %71 = vector.broadcast %70 : vector<1x8x1xf32> to vector<1x8x8xf32>
    %72 = arith.subf %68, %71 : vector<1x8x8xf32>
    %73 = math.exp %72 : vector<1x8x8xf32>
    %cst_32 = arith.constant dense<0.000000e+00> : vector<1x8xf32>
    %74 = vector.multi_reduction <add>, %73, %cst_32 [2] : vector<1x8x8xf32> to vector<1x8xf32>
    %75 = vector.shape_cast %74 : vector<1x8xf32> to vector<1x8x1xf32>
    %76 = tpu.reciprocal %75 {approx = true} : vector<1x8x1xf32> -> vector<1x8x1xf32>
    %77 = vector.broadcast %76 : vector<1x8x1xf32> to vector<1x8x8xf32>
    %78 = arith.mulf %73, %77 : vector<1x8x8xf32>
    %79 = arith.truncf %78 : vector<1x8x8xf32> to vector<1x8x8xbf16>
    %80 = arith.truncf %64 : vector<1x8x8xf32> to vector<1x8x8xbf16>
    "tpu.trace_start"() <{level = 10 : i32, message = "bqk,bkd->bqd"}> : () -> ()
    %cst_33 = arith.constant dense<0.000000e+00> : vector<1x8x8xf32>
    %81 = tpu.matmul %79, %80, %cst_33 {dimension_numbers = #tpu.dot_dimension_numbers<[2], [1], [1], [2], [0, 0, 0, 1, 1, 2], [0], [0]>} : vector<1x8x8xbf16>, vector<1x8x8xbf16>, vector<1x8x8xf32> -> vector<1x8x8xf32>
    "tpu.trace_stop"() : () -> ()
    %82 = vector.shape_cast %81 : vector<1x8x8xf32> to vector<8x8xf32>
    %83 = arith.truncf %82 : vector<8x8xf32> to vector<8x8xbf16>
    %84 = vector.extract_strided_slice %10 {offsets = [1, 0, 0], sizes = [1, 8, 32], strides = [1, 1, 1]} : vector<4x8x32xbf16> to vector<1x8x32xbf16>
    %85 = vector.shape_cast %84 : vector<1x8x32xbf16> to vector<8x32xbf16>
    %cst_34 = arith.constant dense<0.000000e+00> : vector<8x32xf32>
    %86 = tpu.matmul %83, %85, %cst_34 {dimension_numbers = #tpu.dot_dimension_numbers<[1], [0], [0], [1], [0, 0, 1, 1], [], []>} : vector<8x8xbf16>, vector<8x32xbf16>, vector<8x32xf32> -> vector<8x32xf32>
    %87 = arith.addf %51, %86 : vector<8x32xf32>
    %88 = vector.extract_strided_slice %8 {offsets = [2, 0, 0], sizes = [1, 32, 24], strides = [1, 1, 1]} : vector<4x32x24xbf16> to vector<1x32x24xbf16>
    %89 = vector.shape_cast %88 : vector<1x32x24xbf16> to vector<32x24xbf16>
    %cst_35 = arith.constant dense<0.000000e+00> : vector<8x24xf32>
    %90 = tpu.matmul %13, %89, %cst_35 {dimension_numbers = #tpu.dot_dimension_numbers<[1], [0], [0], [1], [0, 0, 1, 1], [], []>} : vector<8x32xbf16>, vector<32x24xbf16>, vector<8x24xf32> -> vector<8x24xf32>
    %91 = vector.extract_strided_slice %9 {offsets = [2, 0, 0], sizes = [1, 1, 24], strides = [1, 1, 1]} : vector<4x1x24xf32> to vector<1x1x24xf32>
    %92 = vector.shape_cast %91 : vector<1x1x24xf32> to vector<1x24xf32>
    %93 = vector.broadcast %92 : vector<1x24xf32> to vector<8x24xf32>
    %94 = arith.addf %90, %93 : vector<8x24xf32>
    %95 = vector.extract_strided_slice %94 {offsets = [0, 0], sizes = [8, 8], strides = [1, 1]} : vector<8x24xf32> to vector<8x8xf32>
    %96 = vector.extract_strided_slice %94 {offsets = [0, 8], sizes = [8, 8], strides = [1, 1]} : vector<8x24xf32> to vector<8x8xf32>
    %97 = vector.extract_strided_slice %94 {offsets = [0, 16], sizes = [8, 8], strides = [1, 1]} : vector<8x24xf32> to vector<8x8xf32>
    %98 = vector.shape_cast %95 : vector<8x8xf32> to vector<1x8x8xf32>
    %99 = vector.shape_cast %96 : vector<8x8xf32> to vector<1x8x8xf32>
    %100 = vector.shape_cast %97 : vector<8x8xf32> to vector<1x8x8xf32>
    %101 = arith.truncf %98 : vector<1x8x8xf32> to vector<1x8x8xbf16>
    %102 = arith.truncf %99 : vector<1x8x8xf32> to vector<1x8x8xbf16>
    "tpu.trace_start"() <{level = 10 : i32, message = "bqd,bkd->bqk"}> : () -> ()
    %cst_36 = arith.constant dense<0.000000e+00> : vector<1x8x8xf32>
    %103 = tpu.matmul %101, %102, %cst_36 {dimension_numbers = #tpu.dot_dimension_numbers<[2], [2], [1], [1], [0, 0, 0, 1, 1, 1], [0], [0]>} : vector<1x8x8xbf16>, vector<1x8x8xbf16>, vector<1x8x8xf32> -> vector<1x8x8xf32>
    "tpu.trace_stop"() : () -> ()
    %104 = arith.addf %103, %6 : vector<1x8x8xf32>
    %cst_37 = arith.constant dense<0xFF800000> : vector<1x8xf32>
    %105 = vector.multi_reduction <maximumf>, %104, %cst_37 [2] : vector<1x8x8xf32> to vector<1x8xf32>
    %106 = vector.shape_cast %105 : vector<1x8xf32> to vector<1x8x1xf32>
    %107 = vector.broadcast %106 : vector<1x8x1xf32> to vector<1x8x8xf32>
    %108 = arith.subf %104, %107 : vector<1x8x8xf32>
    %109 = math.exp %108 : vector<1x8x8xf32>
    %cst_38 = arith.constant dense<0.000000e+00> : vector<1x8xf32>
    %110 = vector.multi_reduction <add>, %109, %cst_38 [2] : vector<1x8x8xf32> to vector<1x8xf32>
    %111 = vector.shape_cast %110 : vector<1x8xf32> to vector<1x8x1xf32>
    %112 = tpu.reciprocal %111 {approx = true} : vector<1x8x1xf32> -> vector<1x8x1xf32>
    %113 = vector.broadcast %112 : vector<1x8x1xf32> to vector<1x8x8xf32>
    %114 = arith.mulf %109, %113 : vector<1x8x8xf32>
    %115 = arith.truncf %114 : vector<1x8x8xf32> to vector<1x8x8xbf16>
    %116 = arith.truncf %100 : vector<1x8x8xf32> to vector<1x8x8xbf16>
    "tpu.trace_start"() <{level = 10 : i32, message = "bqk,bkd->bqd"}> : () -> ()
    %cst_39 = arith.constant dense<0.000000e+00> : vector<1x8x8xf32>
    %117 = tpu.matmul %115, %116, %cst_39 {dimension_numbers = #tpu.dot_dimension_numbers<[2], [1], [1], [2], [0, 0, 0, 1, 1, 2], [0], [0]>} : vector<1x8x8xbf16>, vector<1x8x8xbf16>, vector<1x8x8xf32> -> vector<1x8x8xf32>
    "tpu.trace_stop"() : () -> ()
    %118 = vector.shape_cast %117 : vector<1x8x8xf32> to vector<8x8xf32>
    %119 = arith.truncf %118 : vector<8x8xf32> to vector<8x8xbf16>
    %120 = vector.extract_strided_slice %10 {offsets = [2, 0, 0], sizes = [1, 8, 32], strides = [1, 1, 1]} : vector<4x8x32xbf16> to vector<1x8x32xbf16>
    %121 = vector.shape_cast %120 : vector<1x8x32xbf16> to vector<8x32xbf16>
    %cst_40 = arith.constant dense<0.000000e+00> : vector<8x32xf32>
    %122 = tpu.matmul %119, %121, %cst_40 {dimension_numbers = #tpu.dot_dimension_numbers<[1], [0], [0], [1], [0, 0, 1, 1], [], []>} : vector<8x8xbf16>, vector<8x32xbf16>, vector<8x32xf32> -> vector<8x32xf32>
    %123 = arith.addf %87, %122 : vector<8x32xf32>
    %124 = vector.extract_strided_slice %8 {offsets = [3, 0, 0], sizes = [1, 32, 24], strides = [1, 1, 1]} : vector<4x32x24xbf16> to vector<1x32x24xbf16>
    %125 = vector.shape_cast %124 : vector<1x32x24xbf16> to vector<32x24xbf16>
    %cst_41 = arith.constant dense<0.000000e+00> : vector<8x24xf32>
    %126 = tpu.matmul %13, %125, %cst_41 {dimension_numbers = #tpu.dot_dimension_numbers<[1], [0], [0], [1], [0, 0, 1, 1], [], []>} : vector<8x32xbf16>, vector<32x24xbf16>, vector<8x24xf32> -> vector<8x24xf32>
    %127 = vector.extract_strided_slice %9 {offsets = [3, 0, 0], sizes = [1, 1, 24], strides = [1, 1, 1]} : vector<4x1x24xf32> to vector<1x1x24xf32>
    %128 = vector.shape_cast %127 : vector<1x1x24xf32> to vector<1x24xf32>
    %129 = vector.broadcast %128 : vector<1x24xf32> to vector<8x24xf32>
    %130 = arith.addf %126, %129 : vector<8x24xf32>
    %131 = vector.extract_strided_slice %130 {offsets = [0, 0], sizes = [8, 8], strides = [1, 1]} : vector<8x24xf32> to vector<8x8xf32>
    %132 = vector.extract_strided_slice %130 {offsets = [0, 8], sizes = [8, 8], strides = [1, 1]} : vector<8x24xf32> to vector<8x8xf32>
    %133 = vector.extract_strided_slice %130 {offsets = [0, 16], sizes = [8, 8], strides = [1, 1]} : vector<8x24xf32> to vector<8x8xf32>
    %134 = vector.shape_cast %131 : vector<8x8xf32> to vector<1x8x8xf32>
    %135 = vector.shape_cast %132 : vector<8x8xf32> to vector<1x8x8xf32>
    %136 = vector.shape_cast %133 : vector<8x8xf32> to vector<1x8x8xf32>
    %137 = arith.truncf %134 : vector<1x8x8xf32> to vector<1x8x8xbf16>
    %138 = arith.truncf %135 : vector<1x8x8xf32> to vector<1x8x8xbf16>
    "tpu.trace_start"() <{level = 10 : i32, message = "bqd,bkd->bqk"}> : () -> ()
    %cst_42 = arith.constant dense<0.000000e+00> : vector<1x8x8xf32>
    %139 = tpu.matmul %137, %138, %cst_42 {dimension_numbers = #tpu.dot_dimension_numbers<[2], [2], [1], [1], [0, 0, 0, 1, 1, 1], [0], [0]>} : vector<1x8x8xbf16>, vector<1x8x8xbf16>, vector<1x8x8xf32> -> vector<1x8x8xf32>
    "tpu.trace_stop"() : () -> ()
    %140 = arith.addf %139, %6 : vector<1x8x8xf32>
    %cst_43 = arith.constant dense<0xFF800000> : vector<1x8xf32>
    %141 = vector.multi_reduction <maximumf>, %140, %cst_43 [2] : vector<1x8x8xf32> to vector<1x8xf32>
    %142 = vector.shape_cast %141 : vector<1x8xf32> to vector<1x8x1xf32>
    %143 = vector.broadcast %142 : vector<1x8x1xf32> to vector<1x8x8xf32>
    %144 = arith.subf %140, %143 : vector<1x8x8xf32>
    %145 = math.exp %144 : vector<1x8x8xf32>
    %cst_44 = arith.constant dense<0.000000e+00> : vector<1x8xf32>
    %146 = vector.multi_reduction <add>, %145, %cst_44 [2] : vector<1x8x8xf32> to vector<1x8xf32>
    %147 = vector.shape_cast %146 : vector<1x8xf32> to vector<1x8x1xf32>
    %148 = tpu.reciprocal %147 {approx = true} : vector<1x8x1xf32> -> vector<1x8x1xf32>
    %149 = vector.broadcast %148 : vector<1x8x1xf32> to vector<1x8x8xf32>
    %150 = arith.mulf %145, %149 : vector<1x8x8xf32>
    %151 = arith.truncf %150 : vector<1x8x8xf32> to vector<1x8x8xbf16>
    %152 = arith.truncf %136 : vector<1x8x8xf32> to vector<1x8x8xbf16>
    "tpu.trace_start"() <{level = 10 : i32, message = "bqk,bkd->bqd"}> : () -> ()
    %cst_45 = arith.constant dense<0.000000e+00> : vector<1x8x8xf32>
    %153 = tpu.matmul %151, %152, %cst_45 {dimension_numbers = #tpu.dot_dimension_numbers<[2], [1], [1], [2], [0, 0, 0, 1, 1, 2], [0], [0]>} : vector<1x8x8xbf16>, vector<1x8x8xbf16>, vector<1x8x8xf32> -> vector<1x8x8xf32>
    "tpu.trace_stop"() : () -> ()
    %154 = vector.shape_cast %153 : vector<1x8x8xf32> to vector<8x8xf32>
    %155 = arith.truncf %154 : vector<8x8xf32> to vector<8x8xbf16>
    %156 = vector.extract_strided_slice %10 {offsets = [3, 0, 0], sizes = [1, 8, 32], strides = [1, 1, 1]} : vector<4x8x32xbf16> to vector<1x8x32xbf16>
    %157 = vector.shape_cast %156 : vector<1x8x32xbf16> to vector<8x32xbf16>
    %cst_46 = arith.constant dense<0.000000e+00> : vector<8x32xf32>
    %158 = tpu.matmul %155, %157, %cst_46 {dimension_numbers = #tpu.dot_dimension_numbers<[1], [0], [0], [1], [0, 0, 1, 1], [], []>} : vector<8x8xbf16>, vector<8x32xbf16>, vector<8x32xf32> -> vector<8x32xf32>
    %159 = arith.addf %123, %158 : vector<8x32xf32>
    %160 = vector.shape_cast %0 : vector<1x8x32xf32> to vector<8x32xf32>
    %161 = arith.addf %160, %159 : vector<8x32xf32>
    %c0_47 = arith.constant 0 : index
    %c0_48 = arith.constant 0 : index
    %162 = vector.load %arg18[%c0_47, %c0_48] : memref<1x32xf32, #tpu.memory_space<vmem>>, vector<1x32xf32>
    %c0_49 = arith.constant 0 : index
    %c0_50 = arith.constant 0 : index
    %163 = vector.load %arg19[%c0_49, %c0_50] : memref<1x32xf32, #tpu.memory_space<vmem>>, vector<1x32xf32>
    %cst_51 = arith.constant dense<0.000000e+00> : vector<8xf32>
    %164 = vector.multi_reduction <add>, %161, %cst_51 [1] : vector<8x32xf32> to vector<8xf32>
    %165 = vector.shape_cast %164 : vector<8xf32> to vector<8x1xf32>
    %cst_52 = arith.constant 3.200000e+01 : f32
    %166 = vector.broadcast %cst_52 : f32 to vector<8x1xf32>
    %167 = arith.divf %165, %166 : vector<8x1xf32>
    %168 = vector.broadcast %167 : vector<8x1xf32> to vector<8x32xf32>
    %169 = arith.subf %161, %168 : vector<8x32xf32>
    %170 = arith.mulf %169, %169 : vector<8x32xf32>
    %cst_53 = arith.constant dense<0.000000e+00> : vector<8xf32>
    %171 = vector.multi_reduction <add>, %170, %cst_53 [1] : vector<8x32xf32> to vector<8xf32>
    %172 = vector.shape_cast %171 : vector<8xf32> to vector<8x1xf32>
    %cst_54 = arith.constant 3.200000e+01 : f32
    %173 = vector.broadcast %cst_54 : f32 to vector<8x1xf32>
    %174 = arith.divf %172, %173 : vector<8x1xf32>
    %cst_55 = arith.constant 9.99999974E-6 : f32
    %175 = vector.broadcast %cst_55 : f32 to vector<8x1xf32>
    %176 = arith.addf %174, %175 : vector<8x1xf32>
    %177 = math.rsqrt %176 : vector<8x1xf32>
    %178 = vector.broadcast %177 : vector<8x1xf32> to vector<8x32xf32>
    %179 = arith.mulf %169, %178 : vector<8x32xf32>
    %180 = vector.broadcast %162 : vector<1x32xf32> to vector<8x32xf32>
    %181 = arith.mulf %179, %180 : vector<8x32xf32>
    %182 = vector.broadcast %163 : vector<1x32xf32> to vector<8x32xf32>
    %183 = arith.addf %181, %182 : vector<8x32xf32>
    %184 = vector.shape_cast %183 : vector<8x32xf32> to vector<1x8x32xf32>
    %c0_56 = arith.constant 0 : index
    %c0_57 = arith.constant 0 : index
    %c0_58 = arith.constant 0 : index
    %185 = vector.load %arg10[%c0_56, %c0_57, %c0_58] : memref<4x32x24xbf16, #tpu.memory_space<vmem>>, vector<4x32x24xbf16>
    %c0_59 = arith.constant 0 : index
    %c0_60 = arith.constant 0 : index
    %c0_61 = arith.constant 0 : index
    %186 = vector.load %arg11[%c0_59, %c0_60, %c0_61] : memref<4x1x24xf32, #tpu.memory_space<vmem>>, vector<4x1x24xf32>
    %c0_62 = arith.constant 0 : index
    %c0_63 = arith.constant 0 : index
    %c0_64 = arith.constant 0 : index
    %187 = vector.load %arg12[%c0_62, %c0_63, %c0_64] : memref<4x8x32xbf16, #tpu.memory_space<vmem>>, vector<4x8x32xbf16>
    %c0_65 = arith.constant 0 : index
    %c0_66 = arith.constant 0 : index
    %188 = vector.load %arg13[%c0_65, %c0_66] : memref<1x32xf32, #tpu.memory_space<vmem>>, vector<1x32xf32>
    %189 = vector.shape_cast %184 : vector<1x8x32xf32> to vector<8x32xf32>
    %190 = arith.truncf %189 : vector<8x32xf32> to vector<8x32xbf16>
    %191 = vector.shape_cast %1 : vector<1x12x32xf32> to vector<12x32xf32>
    %192 = arith.truncf %191 : vector<12x32xf32> to vector<12x32xbf16>
    %193 = vector.shape_cast %188 : vector<1x32xf32> to vector<1x32xf32>
    %194 = vector.broadcast %193 : vector<1x32xf32> to vector<8x32xf32>
    %195 = vector.extract_strided_slice %185 {offsets = [0, 0, 0], sizes = [1, 32, 8], strides = [1, 1, 1]} : vector<4x32x24xbf16> to vector<1x32x8xbf16>
    %196 = vector.shape_cast %195 : vector<1x32x8xbf16> to vector<32x8xbf16>
    %cst_67 = arith.constant dense<0.000000e+00> : vector<8x8xf32>
    %197 = tpu.matmul %190, %196, %cst_67 {dimension_numbers = #tpu.dot_dimension_numbers<[1], [0], [0], [1], [0, 0, 1, 1], [], []>} : vector<8x32xbf16>, vector<32x8xbf16>, vector<8x8xf32> -> vector<8x8xf32>
    %198 = vector.extract_strided_slice %186 {offsets = [0, 0, 0], sizes = [1, 1, 8], strides = [1, 1, 1]} : vector<4x1x24xf32> to vector<1x1x8xf32>
    %199 = vector.shape_cast %198 : vector<1x1x8xf32> to vector<1x8xf32>
    %200 = vector.broadcast %199 : vector<1x8xf32> to vector<8x8xf32>
    %201 = arith.addf %197, %200 : vector<8x8xf32>
    %202 = vector.extract_strided_slice %185 {offsets = [0, 0, 8], sizes = [1, 32, 16], strides = [1, 1, 1]} : vector<4x32x24xbf16> to vector<1x32x16xbf16>
    %203 = vector.shape_cast %202 : vector<1x32x16xbf16> to vector<32x16xbf16>
    %cst_68 = arith.constant dense<0.000000e+00> : vector<12x16xf32>
    %204 = tpu.matmul %192, %203, %cst_68 {dimension_numbers = #tpu.dot_dimension_numbers<[1], [0], [0], [1], [0, 0, 1, 1], [], []>} : vector<12x32xbf16>, vector<32x16xbf16>, vector<12x16xf32> -> vector<12x16xf32>
    %205 = vector.extract_strided_slice %186 {offsets = [0, 0, 8], sizes = [1, 1, 16], strides = [1, 1, 1]} : vector<4x1x24xf32> to vector<1x1x16xf32>
    %206 = vector.shape_cast %205 : vector<1x1x16xf32> to vector<1x16xf32>
    %207 = vector.broadcast %206 : vector<1x16xf32> to vector<12x16xf32>
    %208 = arith.addf %204, %207 : vector<12x16xf32>
    %209 = vector.extract_strided_slice %208 {offsets = [0, 0], sizes = [12, 8], strides = [1, 1]} : vector<12x16xf32> to vector<12x8xf32>
    %210 = vector.extract_strided_slice %208 {offsets = [0, 8], sizes = [12, 8], strides = [1, 1]} : vector<12x16xf32> to vector<12x8xf32>
    %211 = vector.shape_cast %201 : vector<8x8xf32> to vector<1x8x8xf32>
    %212 = vector.shape_cast %209 : vector<12x8xf32> to vector<1x12x8xf32>
    %213 = vector.shape_cast %210 : vector<12x8xf32> to vector<1x12x8xf32>
    %214 = arith.truncf %211 : vector<1x8x8xf32> to vector<1x8x8xbf16>
    %215 = arith.truncf %212 : vector<1x12x8xf32> to vector<1x12x8xbf16>
    "tpu.trace_start"() <{level = 10 : i32, message = "bqd,bkd->bqk"}> : () -> ()
    %cst_69 = arith.constant dense<0.000000e+00> : vector<1x8x12xf32>
    %216 = tpu.matmul %214, %215, %cst_69 {dimension_numbers = #tpu.dot_dimension_numbers<[2], [2], [1], [1], [0, 0, 0, 1, 1, 1], [0], [0]>} : vector<1x8x8xbf16>, vector<1x12x8xbf16>, vector<1x8x12xf32> -> vector<1x8x12xf32>
    "tpu.trace_stop"() : () -> ()
    %217 = vector.broadcast %7 : vector<1x1x12xf32> to vector<1x8x12xf32>
    %218 = arith.addf %216, %217 : vector<1x8x12xf32>
    %cst_70 = arith.constant dense<0xFF800000> : vector<1x8xf32>
    %219 = vector.multi_reduction <maximumf>, %218, %cst_70 [2] : vector<1x8x12xf32> to vector<1x8xf32>
    %220 = vector.shape_cast %219 : vector<1x8xf32> to vector<1x8x1xf32>
    %221 = vector.broadcast %220 : vector<1x8x1xf32> to vector<1x8x12xf32>
    %222 = arith.subf %218, %221 : vector<1x8x12xf32>
    %223 = math.exp %222 : vector<1x8x12xf32>
    %cst_71 = arith.constant dense<0.000000e+00> : vector<1x8xf32>
    %224 = vector.multi_reduction <add>, %223, %cst_71 [2] : vector<1x8x12xf32> to vector<1x8xf32>
    %225 = vector.shape_cast %224 : vector<1x8xf32> to vector<1x8x1xf32>
    %226 = tpu.reciprocal %225 {approx = true} : vector<1x8x1xf32> -> vector<1x8x1xf32>
    %227 = vector.broadcast %226 : vector<1x8x1xf32> to vector<1x8x12xf32>
    %228 = arith.mulf %223, %227 : vector<1x8x12xf32>
    %229 = arith.truncf %228 : vector<1x8x12xf32> to vector<1x8x12xbf16>
    %230 = arith.truncf %213 : vector<1x12x8xf32> to vector<1x12x8xbf16>
    "tpu.trace_start"() <{level = 10 : i32, message = "bqk,bkd->bqd"}> : () -> ()
    %cst_72 = arith.constant dense<0.000000e+00> : vector<1x8x8xf32>
    %231 = tpu.matmul %229, %230, %cst_72 {dimension_numbers = #tpu.dot_dimension_numbers<[2], [1], [1], [2], [0, 0, 0, 1, 1, 2], [0], [0]>} : vector<1x8x12xbf16>, vector<1x12x8xbf16>, vector<1x8x8xf32> -> vector<1x8x8xf32>
    "tpu.trace_stop"() : () -> ()
    %232 = vector.shape_cast %231 : vector<1x8x8xf32> to vector<8x8xf32>
    %233 = arith.truncf %232 : vector<8x8xf32> to vector<8x8xbf16>
    %234 = vector.extract_strided_slice %187 {offsets = [0, 0, 0], sizes = [1, 8, 32], strides = [1, 1, 1]} : vector<4x8x32xbf16> to vector<1x8x32xbf16>
    %235 = vector.shape_cast %234 : vector<1x8x32xbf16> to vector<8x32xbf16>
    %cst_73 = arith.constant dense<0.000000e+00> : vector<8x32xf32>
    %236 = tpu.matmul %233, %235, %cst_73 {dimension_numbers = #tpu.dot_dimension_numbers<[1], [0], [0], [1], [0, 0, 1, 1], [], []>} : vector<8x8xbf16>, vector<8x32xbf16>, vector<8x32xf32> -> vector<8x32xf32>
    %237 = arith.addf %194, %236 : vector<8x32xf32>
    %238 = vector.extract_strided_slice %185 {offsets = [1, 0, 0], sizes = [1, 32, 8], strides = [1, 1, 1]} : vector<4x32x24xbf16> to vector<1x32x8xbf16>
    %239 = vector.shape_cast %238 : vector<1x32x8xbf16> to vector<32x8xbf16>
    %cst_74 = arith.constant dense<0.000000e+00> : vector<8x8xf32>
    %240 = tpu.matmul %190, %239, %cst_74 {dimension_numbers = #tpu.dot_dimension_numbers<[1], [0], [0], [1], [0, 0, 1, 1], [], []>} : vector<8x32xbf16>, vector<32x8xbf16>, vector<8x8xf32> -> vector<8x8xf32>
    %241 = vector.extract_strided_slice %186 {offsets = [1, 0, 0], sizes = [1, 1, 8], strides = [1, 1, 1]} : vector<4x1x24xf32> to vector<1x1x8xf32>
    %242 = vector.shape_cast %241 : vector<1x1x8xf32> to vector<1x8xf32>
    %243 = vector.broadcast %242 : vector<1x8xf32> to vector<8x8xf32>
    %244 = arith.addf %240, %243 : vector<8x8xf32>
    %245 = vector.extract_strided_slice %185 {offsets = [1, 0, 8], sizes = [1, 32, 16], strides = [1, 1, 1]} : vector<4x32x24xbf16> to vector<1x32x16xbf16>
    %246 = vector.shape_cast %245 : vector<1x32x16xbf16> to vector<32x16xbf16>
    %cst_75 = arith.constant dense<0.000000e+00> : vector<12x16xf32>
    %247 = tpu.matmul %192, %246, %cst_75 {dimension_numbers = #tpu.dot_dimension_numbers<[1], [0], [0], [1], [0, 0, 1, 1], [], []>} : vector<12x32xbf16>, vector<32x16xbf16>, vector<12x16xf32> -> vector<12x16xf32>
    %248 = vector.extract_strided_slice %186 {offsets = [1, 0, 8], sizes = [1, 1, 16], strides = [1, 1, 1]} : vector<4x1x24xf32> to vector<1x1x16xf32>
    %249 = vector.shape_cast %248 : vector<1x1x16xf32> to vector<1x16xf32>
    %250 = vector.broadcast %249 : vector<1x16xf32> to vector<12x16xf32>
    %251 = arith.addf %247, %250 : vector<12x16xf32>
    %252 = vector.extract_strided_slice %251 {offsets = [0, 0], sizes = [12, 8], strides = [1, 1]} : vector<12x16xf32> to vector<12x8xf32>
    %253 = vector.extract_strided_slice %251 {offsets = [0, 8], sizes = [12, 8], strides = [1, 1]} : vector<12x16xf32> to vector<12x8xf32>
    %254 = vector.shape_cast %244 : vector<8x8xf32> to vector<1x8x8xf32>
    %255 = vector.shape_cast %252 : vector<12x8xf32> to vector<1x12x8xf32>
    %256 = vector.shape_cast %253 : vector<12x8xf32> to vector<1x12x8xf32>
    %257 = arith.truncf %254 : vector<1x8x8xf32> to vector<1x8x8xbf16>
    %258 = arith.truncf %255 : vector<1x12x8xf32> to vector<1x12x8xbf16>
    "tpu.trace_start"() <{level = 10 : i32, message = "bqd,bkd->bqk"}> : () -> ()
    %cst_76 = arith.constant dense<0.000000e+00> : vector<1x8x12xf32>
    %259 = tpu.matmul %257, %258, %cst_76 {dimension_numbers = #tpu.dot_dimension_numbers<[2], [2], [1], [1], [0, 0, 0, 1, 1, 1], [0], [0]>} : vector<1x8x8xbf16>, vector<1x12x8xbf16>, vector<1x8x12xf32> -> vector<1x8x12xf32>
    "tpu.trace_stop"() : () -> ()
    %260 = vector.broadcast %7 : vector<1x1x12xf32> to vector<1x8x12xf32>
    %261 = arith.addf %259, %260 : vector<1x8x12xf32>
    %cst_77 = arith.constant dense<0xFF800000> : vector<1x8xf32>
    %262 = vector.multi_reduction <maximumf>, %261, %cst_77 [2] : vector<1x8x12xf32> to vector<1x8xf32>
    %263 = vector.shape_cast %262 : vector<1x8xf32> to vector<1x8x1xf32>
    %264 = vector.broadcast %263 : vector<1x8x1xf32> to vector<1x8x12xf32>
    %265 = arith.subf %261, %264 : vector<1x8x12xf32>
    %266 = math.exp %265 : vector<1x8x12xf32>
    %cst_78 = arith.constant dense<0.000000e+00> : vector<1x8xf32>
    %267 = vector.multi_reduction <add>, %266, %cst_78 [2] : vector<1x8x12xf32> to vector<1x8xf32>
    %268 = vector.shape_cast %267 : vector<1x8xf32> to vector<1x8x1xf32>
    %269 = tpu.reciprocal %268 {approx = true} : vector<1x8x1xf32> -> vector<1x8x1xf32>
    %270 = vector.broadcast %269 : vector<1x8x1xf32> to vector<1x8x12xf32>
    %271 = arith.mulf %266, %270 : vector<1x8x12xf32>
    %272 = arith.truncf %271 : vector<1x8x12xf32> to vector<1x8x12xbf16>
    %273 = arith.truncf %256 : vector<1x12x8xf32> to vector<1x12x8xbf16>
    "tpu.trace_start"() <{level = 10 : i32, message = "bqk,bkd->bqd"}> : () -> ()
    %cst_79 = arith.constant dense<0.000000e+00> : vector<1x8x8xf32>
    %274 = tpu.matmul %272, %273, %cst_79 {dimension_numbers = #tpu.dot_dimension_numbers<[2], [1], [1], [2], [0, 0, 0, 1, 1, 2], [0], [0]>} : vector<1x8x12xbf16>, vector<1x12x8xbf16>, vector<1x8x8xf32> -> vector<1x8x8xf32>
    "tpu.trace_stop"() : () -> ()
    %275 = vector.shape_cast %274 : vector<1x8x8xf32> to vector<8x8xf32>
    %276 = arith.truncf %275 : vector<8x8xf32> to vector<8x8xbf16>
    %277 = vector.extract_strided_slice %187 {offsets = [1, 0, 0], sizes = [1, 8, 32], strides = [1, 1, 1]} : vector<4x8x32xbf16> to vector<1x8x32xbf16>
    %278 = vector.shape_cast %277 : vector<1x8x32xbf16> to vector<8x32xbf16>
    %cst_80 = arith.constant dense<0.000000e+00> : vector<8x32xf32>
    %279 = tpu.matmul %276, %278, %cst_80 {dimension_numbers = #tpu.dot_dimension_numbers<[1], [0], [0], [1], [0, 0, 1, 1], [], []>} : vector<8x8xbf16>, vector<8x32xbf16>, vector<8x32xf32> -> vector<8x32xf32>
    %280 = arith.addf %237, %279 : vector<8x32xf32>
    %281 = vector.extract_strided_slice %185 {offsets = [2, 0, 0], sizes = [1, 32, 8], strides = [1, 1, 1]} : vector<4x32x24xbf16> to vector<1x32x8xbf16>
    %282 = vector.shape_cast %281 : vector<1x32x8xbf16> to vector<32x8xbf16>
    %cst_81 = arith.constant dense<0.000000e+00> : vector<8x8xf32>
    %283 = tpu.matmul %190, %282, %cst_81 {dimension_numbers = #tpu.dot_dimension_numbers<[1], [0], [0], [1], [0, 0, 1, 1], [], []>} : vector<8x32xbf16>, vector<32x8xbf16>, vector<8x8xf32> -> vector<8x8xf32>
    %284 = vector.extract_strided_slice %186 {offsets = [2, 0, 0], sizes = [1, 1, 8], strides = [1, 1, 1]} : vector<4x1x24xf32> to vector<1x1x8xf32>
    %285 = vector.shape_cast %284 : vector<1x1x8xf32> to vector<1x8xf32>
    %286 = vector.broadcast %285 : vector<1x8xf32> to vector<8x8xf32>
    %287 = arith.addf %283, %286 : vector<8x8xf32>
    %288 = vector.extract_strided_slice %185 {offsets = [2, 0, 8], sizes = [1, 32, 16], strides = [1, 1, 1]} : vector<4x32x24xbf16> to vector<1x32x16xbf16>
    %289 = vector.shape_cast %288 : vector<1x32x16xbf16> to vector<32x16xbf16>
    %cst_82 = arith.constant dense<0.000000e+00> : vector<12x16xf32>
    %290 = tpu.matmul %192, %289, %cst_82 {dimension_numbers = #tpu.dot_dimension_numbers<[1], [0], [0], [1], [0, 0, 1, 1], [], []>} : vector<12x32xbf16>, vector<32x16xbf16>, vector<12x16xf32> -> vector<12x16xf32>
    %291 = vector.extract_strided_slice %186 {offsets = [2, 0, 8], sizes = [1, 1, 16], strides = [1, 1, 1]} : vector<4x1x24xf32> to vector<1x1x16xf32>
    %292 = vector.shape_cast %291 : vector<1x1x16xf32> to vector<1x16xf32>
    %293 = vector.broadcast %292 : vector<1x16xf32> to vector<12x16xf32>
    %294 = arith.addf %290, %293 : vector<12x16xf32>
    %295 = vector.extract_strided_slice %294 {offsets = [0, 0], sizes = [12, 8], strides = [1, 1]} : vector<12x16xf32> to vector<12x8xf32>
    %296 = vector.extract_strided_slice %294 {offsets = [0, 8], sizes = [12, 8], strides = [1, 1]} : vector<12x16xf32> to vector<12x8xf32>
    %297 = vector.shape_cast %287 : vector<8x8xf32> to vector<1x8x8xf32>
    %298 = vector.shape_cast %295 : vector<12x8xf32> to vector<1x12x8xf32>
    %299 = vector.shape_cast %296 : vector<12x8xf32> to vector<1x12x8xf32>
    %300 = arith.truncf %297 : vector<1x8x8xf32> to vector<1x8x8xbf16>
    %301 = arith.truncf %298 : vector<1x12x8xf32> to vector<1x12x8xbf16>
    "tpu.trace_start"() <{level = 10 : i32, message = "bqd,bkd->bqk"}> : () -> ()
    %cst_83 = arith.constant dense<0.000000e+00> : vector<1x8x12xf32>
    %302 = tpu.matmul %300, %301, %cst_83 {dimension_numbers = #tpu.dot_dimension_numbers<[2], [2], [1], [1], [0, 0, 0, 1, 1, 1], [0], [0]>} : vector<1x8x8xbf16>, vector<1x12x8xbf16>, vector<1x8x12xf32> -> vector<1x8x12xf32>
    "tpu.trace_stop"() : () -> ()
    %303 = vector.broadcast %7 : vector<1x1x12xf32> to vector<1x8x12xf32>
    %304 = arith.addf %302, %303 : vector<1x8x12xf32>
    %cst_84 = arith.constant dense<0xFF800000> : vector<1x8xf32>
    %305 = vector.multi_reduction <maximumf>, %304, %cst_84 [2] : vector<1x8x12xf32> to vector<1x8xf32>
    %306 = vector.shape_cast %305 : vector<1x8xf32> to vector<1x8x1xf32>
    %307 = vector.broadcast %306 : vector<1x8x1xf32> to vector<1x8x12xf32>
    %308 = arith.subf %304, %307 : vector<1x8x12xf32>
    %309 = math.exp %308 : vector<1x8x12xf32>
    %cst_85 = arith.constant dense<0.000000e+00> : vector<1x8xf32>
    %310 = vector.multi_reduction <add>, %309, %cst_85 [2] : vector<1x8x12xf32> to vector<1x8xf32>
    %311 = vector.shape_cast %310 : vector<1x8xf32> to vector<1x8x1xf32>
    %312 = tpu.reciprocal %311 {approx = true} : vector<1x8x1xf32> -> vector<1x8x1xf32>
    %313 = vector.broadcast %312 : vector<1x8x1xf32> to vector<1x8x12xf32>
    %314 = arith.mulf %309, %313 : vector<1x8x12xf32>
    %315 = arith.truncf %314 : vector<1x8x12xf32> to vector<1x8x12xbf16>
    %316 = arith.truncf %299 : vector<1x12x8xf32> to vector<1x12x8xbf16>
    "tpu.trace_start"() <{level = 10 : i32, message = "bqk,bkd->bqd"}> : () -> ()
    %cst_86 = arith.constant dense<0.000000e+00> : vector<1x8x8xf32>
    %317 = tpu.matmul %315, %316, %cst_86 {dimension_numbers = #tpu.dot_dimension_numbers<[2], [1], [1], [2], [0, 0, 0, 1, 1, 2], [0], [0]>} : vector<1x8x12xbf16>, vector<1x12x8xbf16>, vector<1x8x8xf32> -> vector<1x8x8xf32>
    "tpu.trace_stop"() : () -> ()
    %318 = vector.shape_cast %317 : vector<1x8x8xf32> to vector<8x8xf32>
    %319 = arith.truncf %318 : vector<8x8xf32> to vector<8x8xbf16>
    %320 = vector.extract_strided_slice %187 {offsets = [2, 0, 0], sizes = [1, 8, 32], strides = [1, 1, 1]} : vector<4x8x32xbf16> to vector<1x8x32xbf16>
    %321 = vector.shape_cast %320 : vector<1x8x32xbf16> to vector<8x32xbf16>
    %cst_87 = arith.constant dense<0.000000e+00> : vector<8x32xf32>
    %322 = tpu.matmul %319, %321, %cst_87 {dimension_numbers = #tpu.dot_dimension_numbers<[1], [0], [0], [1], [0, 0, 1, 1], [], []>} : vector<8x8xbf16>, vector<8x32xbf16>, vector<8x32xf32> -> vector<8x32xf32>
    %323 = arith.addf %280, %322 : vector<8x32xf32>
    %324 = vector.extract_strided_slice %185 {offsets = [3, 0, 0], sizes = [1, 32, 8], strides = [1, 1, 1]} : vector<4x32x24xbf16> to vector<1x32x8xbf16>
    %325 = vector.shape_cast %324 : vector<1x32x8xbf16> to vector<32x8xbf16>
    %cst_88 = arith.constant dense<0.000000e+00> : vector<8x8xf32>
    %326 = tpu.matmul %190, %325, %cst_88 {dimension_numbers = #tpu.dot_dimension_numbers<[1], [0], [0], [1], [0, 0, 1, 1], [], []>} : vector<8x32xbf16>, vector<32x8xbf16>, vector<8x8xf32> -> vector<8x8xf32>
    %327 = vector.extract_strided_slice %186 {offsets = [3, 0, 0], sizes = [1, 1, 8], strides = [1, 1, 1]} : vector<4x1x24xf32> to vector<1x1x8xf32>
    %328 = vector.shape_cast %327 : vector<1x1x8xf32> to vector<1x8xf32>
    %329 = vector.broadcast %328 : vector<1x8xf32> to vector<8x8xf32>
    %330 = arith.addf %326, %329 : vector<8x8xf32>
    %331 = vector.extract_strided_slice %185 {offsets = [3, 0, 8], sizes = [1, 32, 16], strides = [1, 1, 1]} : vector<4x32x24xbf16> to vector<1x32x16xbf16>
    %332 = vector.shape_cast %331 : vector<1x32x16xbf16> to vector<32x16xbf16>
    %cst_89 = arith.constant dense<0.000000e+00> : vector<12x16xf32>
    %333 = tpu.matmul %192, %332, %cst_89 {dimension_numbers = #tpu.dot_dimension_numbers<[1], [0], [0], [1], [0, 0, 1, 1], [], []>} : vector<12x32xbf16>, vector<32x16xbf16>, vector<12x16xf32> -> vector<12x16xf32>
    %334 = vector.extract_strided_slice %186 {offsets = [3, 0, 8], sizes = [1, 1, 16], strides = [1, 1, 1]} : vector<4x1x24xf32> to vector<1x1x16xf32>
    %335 = vector.shape_cast %334 : vector<1x1x16xf32> to vector<1x16xf32>
    %336 = vector.broadcast %335 : vector<1x16xf32> to vector<12x16xf32>
    %337 = arith.addf %333, %336 : vector<12x16xf32>
    %338 = vector.extract_strided_slice %337 {offsets = [0, 0], sizes = [12, 8], strides = [1, 1]} : vector<12x16xf32> to vector<12x8xf32>
    %339 = vector.extract_strided_slice %337 {offsets = [0, 8], sizes = [12, 8], strides = [1, 1]} : vector<12x16xf32> to vector<12x8xf32>
    %340 = vector.shape_cast %330 : vector<8x8xf32> to vector<1x8x8xf32>
    %341 = vector.shape_cast %338 : vector<12x8xf32> to vector<1x12x8xf32>
    %342 = vector.shape_cast %339 : vector<12x8xf32> to vector<1x12x8xf32>
    %343 = arith.truncf %340 : vector<1x8x8xf32> to vector<1x8x8xbf16>
    %344 = arith.truncf %341 : vector<1x12x8xf32> to vector<1x12x8xbf16>
    "tpu.trace_start"() <{level = 10 : i32, message = "bqd,bkd->bqk"}> : () -> ()
    %cst_90 = arith.constant dense<0.000000e+00> : vector<1x8x12xf32>
    %345 = tpu.matmul %343, %344, %cst_90 {dimension_numbers = #tpu.dot_dimension_numbers<[2], [2], [1], [1], [0, 0, 0, 1, 1, 1], [0], [0]>} : vector<1x8x8xbf16>, vector<1x12x8xbf16>, vector<1x8x12xf32> -> vector<1x8x12xf32>
    "tpu.trace_stop"() : () -> ()
    %346 = vector.broadcast %7 : vector<1x1x12xf32> to vector<1x8x12xf32>
    %347 = arith.addf %345, %346 : vector<1x8x12xf32>
    %cst_91 = arith.constant dense<0xFF800000> : vector<1x8xf32>
    %348 = vector.multi_reduction <maximumf>, %347, %cst_91 [2] : vector<1x8x12xf32> to vector<1x8xf32>
    %349 = vector.shape_cast %348 : vector<1x8xf32> to vector<1x8x1xf32>
    %350 = vector.broadcast %349 : vector<1x8x1xf32> to vector<1x8x12xf32>
    %351 = arith.subf %347, %350 : vector<1x8x12xf32>
    %352 = math.exp %351 : vector<1x8x12xf32>
    %cst_92 = arith.constant dense<0.000000e+00> : vector<1x8xf32>
    %353 = vector.multi_reduction <add>, %352, %cst_92 [2] : vector<1x8x12xf32> to vector<1x8xf32>
    %354 = vector.shape_cast %353 : vector<1x8xf32> to vector<1x8x1xf32>
    %355 = tpu.reciprocal %354 {approx = true} : vector<1x8x1xf32> -> vector<1x8x1xf32>
    %356 = vector.broadcast %355 : vector<1x8x1xf32> to vector<1x8x12xf32>
    %357 = arith.mulf %352, %356 : vector<1x8x12xf32>
    %358 = arith.truncf %357 : vector<1x8x12xf32> to vector<1x8x12xbf16>
    %359 = arith.truncf %342 : vector<1x12x8xf32> to vector<1x12x8xbf16>
    "tpu.trace_start"() <{level = 10 : i32, message = "bqk,bkd->bqd"}> : () -> ()
    %cst_93 = arith.constant dense<0.000000e+00> : vector<1x8x8xf32>
    %360 = tpu.matmul %358, %359, %cst_93 {dimension_numbers = #tpu.dot_dimension_numbers<[2], [1], [1], [2], [0, 0, 0, 1, 1, 2], [0], [0]>} : vector<1x8x12xbf16>, vector<1x12x8xbf16>, vector<1x8x8xf32> -> vector<1x8x8xf32>
    "tpu.trace_stop"() : () -> ()
    %361 = vector.shape_cast %360 : vector<1x8x8xf32> to vector<8x8xf32>
    %362 = arith.truncf %361 : vector<8x8xf32> to vector<8x8xbf16>
    %363 = vector.extract_strided_slice %187 {offsets = [3, 0, 0], sizes = [1, 8, 32], strides = [1, 1, 1]} : vector<4x8x32xbf16> to vector<1x8x32xbf16>
    %364 = vector.shape_cast %363 : vector<1x8x32xbf16> to vector<8x32xbf16>
    %cst_94 = arith.constant dense<0.000000e+00> : vector<8x32xf32>
    %365 = tpu.matmul %362, %364, %cst_94 {dimension_numbers = #tpu.dot_dimension_numbers<[1], [0], [0], [1], [0, 0, 1, 1], [], []>} : vector<8x8xbf16>, vector<8x32xbf16>, vector<8x32xf32> -> vector<8x32xf32>
    %366 = arith.addf %323, %365 : vector<8x32xf32>
    %367 = arith.addf %183, %366 : vector<8x32xf32>
    %c0_95 = arith.constant 0 : index
    %c0_96 = arith.constant 0 : index
    %368 = vector.load %arg20[%c0_95, %c0_96] : memref<1x32xf32, #tpu.memory_space<vmem>>, vector<1x32xf32>
    %c0_97 = arith.constant 0 : index
    %c0_98 = arith.constant 0 : index
    %369 = vector.load %arg21[%c0_97, %c0_98] : memref<1x32xf32, #tpu.memory_space<vmem>>, vector<1x32xf32>
    %cst_99 = arith.constant dense<0.000000e+00> : vector<8xf32>
    %370 = vector.multi_reduction <add>, %367, %cst_99 [1] : vector<8x32xf32> to vector<8xf32>
    %371 = vector.shape_cast %370 : vector<8xf32> to vector<8x1xf32>
    %cst_100 = arith.constant 3.200000e+01 : f32
    %372 = vector.broadcast %cst_100 : f32 to vector<8x1xf32>
    %373 = arith.divf %371, %372 : vector<8x1xf32>
    %374 = vector.broadcast %373 : vector<8x1xf32> to vector<8x32xf32>
    %375 = arith.subf %367, %374 : vector<8x32xf32>
    %376 = arith.mulf %375, %375 : vector<8x32xf32>
    %cst_101 = arith.constant dense<0.000000e+00> : vector<8xf32>
    %377 = vector.multi_reduction <add>, %376, %cst_101 [1] : vector<8x32xf32> to vector<8xf32>
    %378 = vector.shape_cast %377 : vector<8xf32> to vector<8x1xf32>
    %cst_102 = arith.constant 3.200000e+01 : f32
    %379 = vector.broadcast %cst_102 : f32 to vector<8x1xf32>
    %380 = arith.divf %378, %379 : vector<8x1xf32>
    %cst_103 = arith.constant 9.99999974E-6 : f32
    %381 = vector.broadcast %cst_103 : f32 to vector<8x1xf32>
    %382 = arith.addf %380, %381 : vector<8x1xf32>
    %383 = math.rsqrt %382 : vector<8x1xf32>
    %384 = vector.broadcast %383 : vector<8x1xf32> to vector<8x32xf32>
    %385 = arith.mulf %375, %384 : vector<8x32xf32>
    %386 = vector.broadcast %368 : vector<1x32xf32> to vector<8x32xf32>
    %387 = arith.mulf %385, %386 : vector<8x32xf32>
    %388 = vector.broadcast %369 : vector<1x32xf32> to vector<8x32xf32>
    %389 = arith.addf %387, %388 : vector<8x32xf32>
    %390 = arith.truncf %389 : vector<8x32xf32> to vector<8x32xbf16>
    %c0_104 = arith.constant 0 : index
    %c0_105 = arith.constant 0 : index
    %391 = vector.load %arg14[%c0_104, %c0_105] : memref<32x64xbf16, #tpu.memory_space<vmem>>, vector<32x64xbf16>
    %cst_106 = arith.constant dense<0.000000e+00> : vector<8x64xf32>
    %392 = tpu.matmul %390, %391, %cst_106 {dimension_numbers = #tpu.dot_dimension_numbers<[1], [0], [0], [1], [0, 0, 1, 1], [], []>} : vector<8x32xbf16>, vector<32x64xbf16>, vector<8x64xf32> -> vector<8x64xf32>
    %c0_107 = arith.constant 0 : index
    %c0_108 = arith.constant 0 : index
    %393 = vector.load %arg15[%c0_107, %c0_108] : memref<1x64xf32, #tpu.memory_space<vmem>>, vector<1x64xf32>
    %394 = vector.broadcast %393 : vector<1x64xf32> to vector<8x64xf32>
    %395 = arith.addf %392, %394 : vector<8x64xf32>
    %cst_109 = arith.constant 0.000000e+00 : f32
    %396 = vector.broadcast %cst_109 : f32 to vector<8x64xf32>
    %397 = arith.maximumf %395, %396 : vector<8x64xf32>
    %398 = arith.truncf %397 : vector<8x64xf32> to vector<8x64xbf16>
    %c0_110 = arith.constant 0 : index
    %c0_111 = arith.constant 0 : index
    %399 = vector.load %arg16[%c0_110, %c0_111] : memref<64x32xbf16, #tpu.memory_space<vmem>>, vector<64x32xbf16>
    %cst_112 = arith.constant dense<0.000000e+00> : vector<8x32xf32>
    %400 = tpu.matmul %398, %399, %cst_112 {dimension_numbers = #tpu.dot_dimension_numbers<[1], [0], [0], [1], [0, 0, 1, 1], [], []>} : vector<8x64xbf16>, vector<64x32xbf16>, vector<8x32xf32> -> vector<8x32xf32>
    %c0_113 = arith.constant 0 : index
    %c0_114 = arith.constant 0 : index
    %401 = vector.load %arg17[%c0_113, %c0_114] : memref<1x32xf32, #tpu.memory_space<vmem>>, vector<1x32xf32>
    %402 = vector.broadcast %401 : vector<1x32xf32> to vector<8x32xf32>
    %403 = arith.addf %400, %402 : vector<8x32xf32>
    %404 = arith.addf %389, %403 : vector<8x32xf32>
    %c0_115 = arith.constant 0 : index
    %c0_116 = arith.constant 0 : index
    %405 = vector.load %arg22[%c0_115, %c0_116] : memref<1x32xf32, #tpu.memory_space<vmem>>, vector<1x32xf32>
    %c0_117 = arith.constant 0 : index
    %c0_118 = arith.constant 0 : index
    %406 = vector.load %arg23[%c0_117, %c0_118] : memref<1x32xf32, #tpu.memory_space<vmem>>, vector<1x32xf32>
    %cst_119 = arith.constant dense<0.000000e+00> : vector<8xf32>
    %407 = vector.multi_reduction <add>, %404, %cst_119 [1] : vector<8x32xf32> to vector<8xf32>
    %408 = vector.shape_cast %407 : vector<8xf32> to vector<8x1xf32>
    %cst_120 = arith.constant 3.200000e+01 : f32
    %409 = vector.broadcast %cst_120 : f32 to vector<8x1xf32>
    %410 = arith.divf %408, %409 : vector<8x1xf32>
    %411 = vector.broadcast %410 : vector<8x1xf32> to vector<8x32xf32>
    %412 = arith.subf %404, %411 : vector<8x32xf32>
    %413 = arith.mulf %412, %412 : vector<8x32xf32>
    %cst_121 = arith.constant dense<0.000000e+00> : vector<8xf32>
    %414 = vector.multi_reduction <add>, %413, %cst_121 [1] : vector<8x32xf32> to vector<8xf32>
    %415 = vector.shape_cast %414 : vector<8xf32> to vector<8x1xf32>
    %cst_122 = arith.constant 3.200000e+01 : f32
    %416 = vector.broadcast %cst_122 : f32 to vector<8x1xf32>
    %417 = arith.divf %415, %416 : vector<8x1xf32>
    %cst_123 = arith.constant 9.99999974E-6 : f32
    %418 = vector.broadcast %cst_123 : f32 to vector<8x1xf32>
    %419 = arith.addf %417, %418 : vector<8x1xf32>
    %420 = math.rsqrt %419 : vector<8x1xf32>
    %421 = vector.broadcast %420 : vector<8x1xf32> to vector<8x32xf32>
    %422 = arith.mulf %412, %421 : vector<8x32xf32>
    %423 = vector.broadcast %405 : vector<1x32xf32> to vector<8x32xf32>
    %424 = arith.mulf %422, %423 : vector<8x32xf32>
    %425 = vector.broadcast %406 : vector<1x32xf32> to vector<8x32xf32>
    %426 = arith.addf %424, %425 : vector<8x32xf32>
    %427 = vector.shape_cast %426 : vector<8x32xf32> to vector<1x8x32xf32>
    %c0_124 = arith.constant 0 : index
    %c0_125 = arith.constant 0 : index
    %c0_126 = arith.constant 0 : index
    %428 = vector.load %arg24[%c0_124, %c0_125, %c0_126] : memref<1x8x32xf32, #tpu.memory_space<vmem>>, vector<1x8x32xf32>
    tpu.vector_store %arg24[%c0_124, %c0_125, %c0_126], %427 {strides = array<i32>} : memref<1x8x32xf32, #tpu.memory_space<vmem>>, vector<1x8x32xf32>,
    return
  }
  func.func @transform_0(%arg0: i32) -> (i32, i32, i32) {
    %c0_i32 = arith.constant 0 : i32
    %c0_i32_0 = arith.constant 0 : i32
    %c0_i32_1 = arith.constant 0 : i32
    return %arg0, %c0_i32, %c0_i32_0 : i32, i32, i32
  }
  func.func @transform_1(%arg0: i32) -> (i32, i32, i32) {
    %c0_i32 = arith.constant 0 : i32
    %c0_i32_0 = arith.constant 0 : i32
    %c0_i32_1 = arith.constant 0 : i32
    return %arg0, %c0_i32, %c0_i32_0 : i32, i32, i32
  }
  func.func @transform_2(%arg0: i32) -> (i32, i32) {
    %c0_i32 = arith.constant 0 : i32
    %c0_i32_0 = arith.constant 0 : i32
    %c0_i32_1 = arith.constant 0 : i32
    return %c0_i32, %c0_i32_0 : i32, i32
  }
  func.func @transform_3(%arg0: i32) -> (i32, i32, i32) {
    %c0_i32 = arith.constant 0 : i32
    %c0_i32_0 = arith.constant 0 : i32
    %c0_i32_1 = arith.constant 0 : i32
    return %arg0, %c0_i32, %c0_i32_0 : i32, i32, i32
  }
  func.func @transform_4(%arg0: i32) -> (i32, i32, i32) {
    %c0_i32 = arith.constant 0 : i32
    %c0_i32_0 = arith.constant 0 : i32
    %c0_i32_1 = arith.constant 0 : i32
    return %arg0, %c0_i32, %c0_i32_0 : i32, i32, i32
  }
  func.func @transform_5(%arg0: i32) -> (i32, i32, i32) {
    %c0_i32 = arith.constant 0 : i32
    %c0_i32_0 = arith.constant 0 : i32
    %c0_i32_1 = arith.constant 0 : i32
    %c0_i32_2 = arith.constant 0 : i32
    return %c0_i32, %c0_i32_0, %c0_i32_1 : i32, i32, i32
  }
  func.func @transform_6(%arg0: i32) -> (i32, i32, i32) {
    %c0_i32 = arith.constant 0 : i32
    %c0_i32_0 = arith.constant 0 : i32
    %c0_i32_1 = arith.constant 0 : i32
    %c0_i32_2 = arith.constant 0 : i32
    return %c0_i32, %c0_i32_0, %c0_i32_1 : i32, i32, i32
  }
  func.func @transform_7(%arg0: i32) -> (i32, i32, i32) {
    %c0_i32 = arith.constant 0 : i32
    %c0_i32_0 = arith.constant 0 : i32
    %c0_i32_1 = arith.constant 0 : i32
    %c0_i32_2 = arith.constant 0 : i32
    return %c0_i32, %c0_i32_0, %c0_i32_1 : i32, i32, i32
  }
  func.func @transform_8(%arg0: i32) -> (i32, i32) {
    %c0_i32 = arith.constant 0 : i32
    %c0_i32_0 = arith.constant 0 : i32
    %c0_i32_1 = arith.constant 0 : i32
    return %c0_i32, %c0_i32_0 : i32, i32
  }
  func.func @transform_9(%arg0: i32) -> (i32, i32, i32) {
    %c0_i32 = arith.constant 0 : i32
    %c0_i32_0 = arith.constant 0 : i32
    %c0_i32_1 = arith.constant 0 : i32
    %c0_i32_2 = arith.constant 0 : i32
    return %c0_i32, %c0_i32_0, %c0_i32_1 : i32, i32, i32
  }
  func.func @transform_10(%arg0: i32) -> (i32, i32, i32) {
    %c0_i32 = arith.constant 0 : i32
    %c0_i32_0 = arith.constant 0 : i32
    %c0_i32_1 = arith.constant 0 : i32
    %c0_i32_2 = arith.constant 0 : i32
    return %c0_i32, %c0_i32_0, %c0_i32_1 : i32, i32, i32
  }
  func.func @transform_11(%arg0: i32) -> (i32, i32, i32) {
    %c0_i32 = arith.constant 0 : i32
    %c0_i32_0 = arith.constant 0 : i32
    %c0_i32_1 = arith.constant 0 : i32
    %c0_i32_2 = arith.constant 0 : i32
    return %c0_i32, %c0_i32_0, %c0_i32_1 : i32, i32, i32
  }
  func.func @transform_12(%arg0: i32) -> (i32, i32) {
    %c0_i32 = arith.constant 0 : i32
    %c0_i32_0 = arith.constant 0 : i32
    %c0_i32_1 = arith.constant 0 : i32
    return %c0_i32, %c0_i32_0 : i32, i32
  }
  func.func @transform_13(%arg0: i32) -> (i32, i32) {
    %c0_i32 = arith.constant 0 : i32
    %c0_i32_0 = arith.constant 0 : i32
    %c0_i32_1 = arith.constant 0 : i32
    return %c0_i32, %c0_i32_0 : i32, i32
  }
  func.func @transform_14(%arg0: i32) -> (i32, i32) {
    %c0_i32 = arith.constant 0 : i32
    %c0_i32_0 = arith.constant 0 : i32
    %c0_i32_1 = arith.constant 0 : i32
    return %c0_i32, %c0_i32_0 : i32, i32
  }
  func.func @transform_15(%arg0: i32) -> (i32, i32) {
    %c0_i32 = arith.constant 0 : i32
    %c0_i32_0 = arith.constant 0 : i32
    %c0_i32_1 = arith.constant 0 : i32
    return %c0_i32, %c0_i32_0 : i32, i32
  }
  func.func @transform_16(%arg0: i32) -> (i32, i32) {
    %c0_i32 = arith.constant 0 : i32
    %c0_i32_0 = arith.constant 0 : i32
    %c0_i32_1 = arith.constant 0 : i32
    return %c0_i32, %c0_i32_0 : i32, i32
  }
  func.func @transform_17(%arg0: i32) -> (i32, i32) {
    %c0_i32 = arith.constant 0 : i32
    %c0_i32_0 = arith.constant 0 : i32
    %c0_i32_1 = arith.constant 0 : i32
    return %c0_i32, %c0_i32_0 : i32, i32
  }
  func.func @transform_18(%arg0: i32) -> (i32, i32) {
    %c0_i32 = arith.constant 0 : i32
    %c0_i32_0 = arith.constant 0 : i32
    %c0_i32_1 = arith.constant 0 : i32
    return %c0_i32, %c0_i32_0 : i32, i32
  }
  func.func @transform_19(%arg0: i32) -> (i32, i32) {
    %c0_i32 = arith.constant 0 : i32
    %c0_i32_0 = arith.constant 0 : i32
    %c0_i32_1 = arith.constant 0 : i32
    return %c0_i32, %c0_i32_0 : i32, i32
  }
  func.func @transform_20(%arg0: i32) -> (i32, i32) {
    %c0_i32 = arith.constant 0 : i32
    %c0_i32_0 = arith.constant 0 : i32
    %c0_i32_1 = arith.constant 0 : i32
    return %c0_i32, %c0_i32_0 : i32, i32
  }
  func.func @transform_21(%arg0: i32) -> (i32, i32) {
    %c0_i32 = arith.constant 0 : i32
    %c0_i32_0 = arith.constant 0 : i32
    %c0_i32_1 = arith.constant 0 : i32
    return %c0_i32, %c0_i32_0 : i32, i32
  }
  func.func @transform_22(%arg0: i32) -> (i32, i32) {
    %c0_i32 = arith.constant 0 : i32
    %c0_i32_0 = arith.constant 0 : i32
    %c0_i32_1 = arith.constant 0 : i32
    return %c0_i32, %c0_i32_0 : i32, i32
  }
  func.func @transform_23(%arg0: i32) -> (i32, i32, i32) {
    %c0_i32 = arith.constant 0 : i32
    %c0_i32_0 = arith.constant 0 : i32
    %c0_i32_1 = arith.constant 0 : i32
    return %arg0, %c0_i32, %c0_i32_0 : i32, i32, i32
  }
}

module attributes {stable_mosaic.version = 11 : i64} {
  func.func @decoder_layer_kernel(%arg0: i32, %arg1: memref<1x8x32xf32, #tpu.memory_space<vmem>>, %arg2: memref<1x12x32xf32, #tpu.memory_space<vmem>>, %arg3: memref<8x8xf32, #tpu.memory_space<vmem>>, %arg4: memref<1x1x8xf32, #tpu.memory_space<vmem>>, %arg5: memref<1x1x12xf32, #tpu.memory_space<vmem>>, %arg6: memref<4x32x24xbf16, #tpu.memory_space<vmem>>, %arg7: memref<4x1x24xf32, #tpu.memory_space<vmem>>, %arg8: memref<4x8x32xbf16, #tpu.memory_space<vmem>>, %arg9: memref<1x32xf32, #tpu.memory_space<vmem>>, %arg10: memref<4x32x24xbf16, #tpu.memory_space<vmem>>, %arg11: memref<4x1x24xf32, #tpu.memory_space<vmem>>, %arg12: memref<4x8x32xbf16, #tpu.memory_space<vmem>>, %arg13: memref<1x32xf32, #tpu.memory_space<vmem>>, %arg14: memref<32x64xbf16, #tpu.memory_space<vmem>>, %arg15: memref<1x64xf32, #tpu.memory_space<vmem>>, %arg16: memref<64x32xbf16, #tpu.memory_space<vmem>>, %arg17: memref<1x32xf32, #tpu.memory_space<vmem>>, %arg18: memref<1x32xf32, #tpu.memory_space<vmem>>, %arg19: memref<1x32xf32, #tpu.memory_space<vmem>>, %arg20: memref<1x32xf32, #tpu.memory_space<vmem>>, %arg21: memref<1x32xf32, #tpu.memory_space<vmem>>, %arg22: memref<1x32xf32, #tpu.memory_space<vmem>>, %arg23: memref<1x32xf32, #tpu.memory_space<vmem>>, %arg24: memref<1x8x32xf32, #tpu.memory_space<vmem>>) attributes {dimension_semantics = [#tpu.dimension_semantics<parallel>], iteration_bounds = array<i64: 4>, scalar_prefetch = 0 : i64, scratch_operands = 0 : i64, tpu.core_type = #tpu.core_type<tc>, window_params = [{transform_indices = @transform_0, window_bounds = array<i64: 1, 8, 32>}, {transform_indices = @transform_1, window_bounds = array<i64: 1, 12, 32>}, {pipeline_mode = #tpu.pipeline_mode<synchronous>, transform_indices = @transform_2, window_bounds = array<i64: 8, 8>}, {transform_indices = @transform_3, window_bounds = array<i64: 1, 1, 8>}, {transform_indices = @transform_4, window_bounds = array<i64: 1, 1, 12>}, {pipeline_mode = #tpu.pipeline_mode<synchronous>, transform_indices = @transform_5, window_bounds = array<i64: 4, 32, 24>}, {pipeline_mode = #tpu.pipeline_mode<synchronous>, transform_indices = @transform_6, window_bounds = array<i64: 4, 1, 24>}, {pipeline_mode = #tpu.pipeline_mode<synchronous>, transform_indices = @transform_7, window_bounds = array<i64: 4, 8, 32>}, {pipeline_mode = #tpu.pipeline_mode<synchronous>, transform_indices = @transform_8, window_bounds = array<i64: 1, 32>}, {pipeline_mode = #tpu.pipeline_mode<synchronous>, transform_indices = @transform_9, window_bounds = array<i64: 4, 32, 24>}, {pipeline_mode = #tpu.pipeline_mode<synchronous>, transform_indices = @transform_10, window_bounds = array<i64: 4, 1, 24>}, {pipeline_mode = #tpu.pipeline_mode<synchronous>, transform_indices = @transform_11, window_bounds = array<i64: 4, 8, 32>}, {pipeline_mode = #tpu.pipeline_mode<synchronous>, transform_indices = @transform_12, window_bounds = array<i64: 1, 32>}, {pipeline_mode = #tpu.pipeline_mode<synchronous>, transform_indices = @transform_13, window_bounds = array<i64: 32, 64>}, {pipeline_mode = #tpu.pipeline_mode<synchronous>, transform_indices = @transform_14, window_bounds = array<i64: 1, 64>}, {pipeline_mode = #tpu.pipeline_mode<synchronous>, transform_indices = @transform_15, window_bounds = array<i64: 64, 32>}, {pipeline_mode = #tpu.pipeline_mode<synchronous>, transform_indices = @transform_16, window_bounds = array<i64: 1, 32>}, {pipeline_mode = #tpu.pipeline_mode<synchronous>, transform_indices = @transform_17, window_bounds = array<i64: 1, 32>}, {pipeline_mode = #tpu.pipeline_mode<synchronous>, transform_indices = @transform_18, window_bounds = array<i64: 1, 32>}, {pipeline_mode = #tpu.pipeline_mode<synchronous>, transform_indices = @transform_19, window_bounds = array<i64: 1, 32>}, {pipeline_mode = #tpu.pipeline_mode<synchronous>, transform_indices = @transform_20, window_bounds = array<i64: 1, 32>}, {pipeline_mode = #tpu.pipeline_mode<synchronous>, transform_indices = @transform_21, window_bounds = array<i64: 1, 32>}, {pipeline_mode = #tpu.pipeline_mode<synchronous>, transform_indices = @transform_22, window_bounds = array<i64: 1, 32>}, {transform_indices = @transform_23, window_bounds = array<i64: 1, 8, 32>}]} {
    %c0 = arith.constant 0 : index
    %c0_0 = arith.constant 0 : index
    %c0_1 = arith.constant 0 : index
    %0 = vector.load %arg1[%c0, %c0_0, %c0_1] : memref<1x8x32xf32, #tpu.memory_space<vmem>>, vector<1x8x32xf32>
    %c0_2 = arith.constant 0 : index
    %c0_3 = arith.constant 0 : index
    %c0_4 = arith.constant 0 : index
    %1 = vector.load %arg2[%c0_2, %c0_3, %c0_4] : memref<1x12x32xf32, #tpu.memory_space<vmem>>, vector<1x12x32xf32>
    %c0_5 = arith.constant 0 : index
    %c0_6 = arith.constant 0 : index
    %2 = vector.load %arg3[%c0_5, %c0_6] : memref<8x8xf32, #tpu.memory_space<vmem>>, vector<8x8xf32>
    %3 = vector.shape_cast %2 : vector<8x8xf32> to vector<1x8x8xf32>
    %c0_7 = arith.constant 0 : index
    %c0_8 = arith.constant 0 : index
    %c0_9 = arith.constant 0 : index
    %4 = vector.load %arg4[%c0_7, %c0_8, %c0_9] : memref<1x1x8xf32, #tpu.memory_space<vmem>>, vector<1x1x8xf32>
    %5 = vector.broadcast %4 : vector<1x1x8xf32> to vector<1x8x8xf32>
    %6 = arith.addf %3, %5 : vector<1x8x8xf32>
    %c0_10 = arith.constant 0 : index
    %c0_11 = arith.constant 0 : index
    %c0_12 = arith.constant 0 : index
    %7 = vector.load %arg5[%c0_10, %c0_11, %c0_12] : memref<1x1x12xf32, #tpu.memory_space<vmem>>, vector<1x1x12xf32>
    %c0_13 = arith.constant 0 : index
    %c0_14 = arith.constant 0 : index
    %c0_15 = arith.constant 0 : index
    %8 = vector.load %arg6[%c0_13, %c0_14, %c0_15] : memref<4x32x24xbf16, #tpu.memory_space<vmem>>, vector<4x32x24xbf16>
    %c0_16 = arith.constant 0 : index
    %c0_17 = arith.constant 0 : index
    %c0_18 = arith.constant 0 : index
    %9 = vector.load %arg7[%c0_16, %c0_17, %c0_18] : memref<4x1x24xf32, #tpu.memory_space<vmem>>, vector<4x1x24xf32>
    %c0_19 = arith.constant 0 : index
    %c0_20 = arith.constant 0 : index
    %c0_21 = arith.constant 0 : index
    %10 = vector.load %arg8[%c0_19, %c0_20, %c0_21] : memref<4x8x32xbf16, #tpu.memory_space<vmem>>, vector<4x8x32xbf16>
    %c0_22 = arith.constant 0 : index
    %c0_23 = arith.constant 0 : index
    %11 = vector.load %arg9[%c0_22, %c0_23] : memref<1x32xf32, #tpu.memory_space<vmem>>, vector<1x32xf32>
    %12 = vector.shape_cast %0 : vector<1x8x32xf32> to vector<8x32xf32>
    %13 = arith.truncf %12 : vector<8x32xf32> to vector<8x32xbf16>
    %14 = vector.shape_cast %11 : vector<1x32xf32> to vector<1x32xf32>
    %15 = vector.broadcast %14 : vector<1x32xf32> to vector<8x32xf32>
    %16 = vector.extract_strided_slice %8 {offsets = [0, 0, 0], sizes = [1, 32, 24], strides = [1, 1, 1]} : vector<4x32x24xbf16> to vector<1x32x24xbf16>
    %17 = vector.shape_cast %16 : vector<1x32x24xbf16> to vector<32x24xbf16>
    %cst = arith.constant dense<0.000000e+00> : vector<8x24xf32>
    %18 = tpu.matmul %13, %17, %cst {dimension_numbers = #tpu.dot_dimension_numbers<[1], [0], [0], [1], [0, 0, 1, 1], [], []>} : vector<8x32xbf16>, vector<32x24xbf16>, vector<8x24xf32> -> vector<8x24xf32>
    %19 = vector.extract_strided_slice %9 {offsets = [0, 0, 0], sizes = [1, 1, 24], strides = [1, 1, 1]} : vector<4x1x24xf32> to vector<1x1x24xf32>
    %20 = vector.shape_cast %19 : vector<1x1x24xf32> to vector<1x24xf32>
    %21 = vector.broadcast %20 : vector<1x24xf32> to vector<8x24xf32>
    %22 = arith.addf %18, %21 : vector<8x24xf32>
    %23 = vector.extract_strided_slice %22 {offsets = [0, 0], sizes = [8, 8], strides = [1, 1]} : vector<8x24xf32> to vector<8x8xf32>
    %24 = vector.extract_strided_slice %22 {offsets = [0, 8], sizes = [8, 8], strides = [1, 1]} : vector<8x24xf32> to vector<8x8xf32>
    %25 = vector.extract_strided_slice %22 {offsets = [0, 16], sizes = [8, 8], strides = [1, 1]} : vector<8x24xf32> to vector<8x8xf32>
    %26 = vector.shape_cast %23 : vector<8x8xf32> to vector<1x8x8xf32>
    %27 = vector.shape_cast %24 : vector<8x8xf32> to vector<1x8x8xf32>
    %28 = vector.shape_cast %25 : vector<8x8xf32> to vector<1x8x8xf32>
    %29 = arith.truncf %26 : vector<1x8x8xf32> to vector<1x8x8xbf16>
    %30 = arith.truncf %27 : vector<1x8x8xf32> to vector<1x8x8xbf16>
    "tpu.trace_start"() <{level = 10 : i32, message = "bqd,bkd->bqk"}> : () -> ()
    %cst_24 = arith.constant dense<0.000000e+00> : vector<1x8x8xf32>
    %31 = tpu.matmul %29, %30, %cst_24 {dimension_numbers = #tpu.dot_dimension_numbers<[2], [2], [1], [1], [0, 0, 0, 1, 1, 1], [0], [0]>} : vector<1x8x8xbf16>, vector<1x8x8xbf16>, vector<1x8x8xf32> -> vector<1x8x8xf32>
    "tpu.trace_stop"() : () -> ()
    %32 = arith.addf %31, %6 : vector<1x8x8xf32>
    %cst_25 = arith.constant dense<0xFF800000> : vector<1x8xf32>
    %33 = vector.multi_reduction <maximumf>, %32, %cst_25 [2] : vector<1x8x8xf32> to vector<1x8xf32>
    %34 = vector.shape_cast %33 : vector<1x8xf32> to vector<1x8x1xf32>
    %35 = vector.broadcast %34 : vector<1x8x1xf32> to vector<1x8x8xf32>
    %36 = arith.subf %32, %35 : vector<1x8x8xf32>
    %37 = math.exp %36 : vector<1x8x8xf32>
    %cst_26 = arith.constant dense<0.000000e+00> : vector<1x8xf32>
    %38 = vector.multi_reduction <add>, %37, %cst_26 [2] : vector<1x8x8xf32> to vector<1x8xf32>
    %39 = vector.shape_cast %38 : vector<1x8xf32> to vector<1x8x1xf32>
    %40 = tpu.reciprocal %39 {approx = true} : vector<1x8x1xf32> -> vector<1x8x1xf32>
    %41 = vector.broadcast %40 : vector<1x8x1xf32> to vector<1x8x8xf32>
    %42 = arith.mulf %37, %41 : vector<1x8x8xf32>
    %43 = arith.truncf %42 : vector<1x8x8xf32> to vector<1x8x8xbf16>
    %44 = arith.truncf %28 : vector<1x8x8xf32> to vector<1x8x8xbf16>
    "tpu.trace_start"() <{level = 10 : i32, message = "bqk,bkd->bqd"}> : () -> ()
    %cst_27 = arith.constant dense<0.000000e+00> : vector<1x8x8xf32>
    %45 = tpu.matmul %43, %44, %cst_27 {dimension_numbers = #tpu.dot_dimension_numbers<[2], [1], [1], [2], [0, 0, 0, 1, 1, 2], [0], [0]>} : vector<1x8x8xbf16>, vector<1x8x8xbf16>, vector<1x8x8xf32> -> vector<1x8x8xf32>
    "tpu.trace_stop"() : () -> ()
    %46 = vector.shape_cast %45 : vector<1x8x8xf32> to vector<8x8xf32>
    %47 = arith.truncf %46 : vector<8x8xf32> to vector<8x8xbf16>
    %48 = vector.extract_strided_slice %10 {offsets = [0, 0, 0], sizes = [1, 8, 32], strides = [1, 1, 1]} : vector<4x8x32xbf16> to vector<1x8x32xbf16>
    %49 = vector.shape_cast %48 : vector<1x8x32xbf16> to vector<8x32xbf16>
    %cst_28 = arith.constant dense<0.000000e+00> : vector<8x32xf32>
    %50 = tpu.matmul %47, %49, %cst_28 {dimension_numbers = #tpu.dot_dimension_numbers<[1], [0], [0], [1], [0, 0, 1, 1], [], []>} : vector<8x8xbf16>, vector<8x32xbf16>, vector<8x32xf32> -> vector<8x32xf32>
    %51 = arith.addf %15, %50 : vector<8x32xf32>
    %52 = vector.extract_strided_slice %8 {offsets = [1, 0, 0], sizes = [1, 32, 24], strides = [1, 1, 1]} : vector<4x32x24xbf16> to vector<1x32x24xbf16>
    %53 = vector.shape_cast %52 : vector<1x32x24xbf16> to vector<32x24xbf16>
    %cst_29 = arith.constant dense<0.000000e+00> : vector<8x24xf32>
    %54 = tpu.matmul %13, %53, %cst_29 {dimension_numbers = #tpu.dot_dimension_numbers<[1], [0], [0], [1], [0, 0, 1, 1], [], []>} : vector<8x32xbf16>, vector<32x24xbf16>, vector<8x24xf32> -> vector<8x24xf32>
    %55 = vector.extract_strided_slice %9 {offsets = [1, 0, 0], sizes = [1, 1, 24], strides = [1, 1, 1]} : vector<4x1x24xf32> to vector<1x1x24xf32>
    %56 = vector.shape_cast %55 : vector<1x1x24xf32> to vector<1x24xf32>
    %57 = vector.broadcast %56 : vector<1x24xf32> to vector<8x24xf32>
    %58 = arith.addf %54, %57 : vector<8x24xf32>
    %59 = vector.extract_strided_slice %58 {offsets = [0, 0], sizes = [8, 8], strides = [1, 1]} : vector<8x24xf32> to vector<8x8xf32>
    %60 = vector.extract_strided_slice %58 {offsets = [0, 8], sizes = [8, 8], strides = [1, 1]} : vector<8x24xf32> to vector<8x8xf32>
    %61 = vector.extract_strided_slice %58 {offsets = [0, 16], sizes = [8, 8], strides = [1, 1]} : vector<8x24xf32> to vector<8x8xf32>
    %62 = vector.shape_cast %59 : vector<8x8xf32> to vector<1x8x8xf32>
    %63 = vector.shape_cast %60 : vector<8x8xf32> to vector<1x8x8xf32>
    %64 = vector.shape_cast %61 : vector<8x8xf32> to vector<1x8x8xf32>
    %65 = arith.truncf %62 : vector<1x8x8xf32> to vector<1x8x8xbf16>
    %66 = arith.truncf %63 : vector<1x8x8xf32> to vector<1x8x8xbf16>
    "tpu.trace_start"() <{level = 10 : i32, message = "bqd,bkd->bqk"}> : () -> ()
    %cst_30 = arith.constant dense<0.000000e+00> : vector<1x8x8xf32>
    %67 = tpu.matmul %65, %66, %cst_30 {dimension_numbers = #tpu.dot_dimension_numbers<[2], [2], [1], [1], [0, 0, 0, 1, 1, 1], [0], [0]>} : vector<1x8x8xbf16>, vector<1x8x8xbf16>, vector<1x8x8xf32> -> vector<1x8x8xf32>
    "tpu.trace_stop"() : () -> ()
    %68 = arith.addf %67, %6 : vector<1x8x8xf32>
    %cst_31 = arith.constant dense<0xFF800000> : vector<1x8xf32>
    %69 = vector.multi_reduction <maximumf>, %68, %cst_31 [2] : vector<1x8x8xf32> to vector<1x8xf32>
    %70 = vector.shape_cast %69 : vector<1x8xf32> to vector<1x8x1xf32>
    %71 = vector.broadcast %70 : vector<1x8x1xf32> to vector<1x8x8xf32>
    %72 = arith.subf %68, %71 : vector<1x8x8xf32>
    %73 = math.exp %72 : vector<1x8x8xf32>
    %cst_32 = arith.constant dense<0.000000e+00> : vector<1x8xf32>
    %74 = vector.multi_reduction <add>, %73, %cst_32 [2] : vector<1x8x8xf32> to vector<1x8xf32>
    %75 = vector.shape_cast %74 : vector<1x8xf32> to vector<1x8x1xf32>
    %76 = tpu.reciprocal %75 {approx = true} : vector<1x8x1xf32> -> vector<1x8x1xf32>
    %77 = vector.broadcast %76 : vector<1x8x1xf32> to vector<1x8x8xf32>
    %78 = arith.mulf %73, %77 : vector<1x8x8xf32>
    %79 = arith.truncf %78 : vector<1x8x8xf32> to vector<1x8x8xbf16>
    %80 = arith.truncf %64 : vector<1x8x8xf32> to vector<1x8x8xbf16>
    "tpu.trace_start"() <{level = 10 : i32, message = "bqk,bkd->bqd"}> : () -> ()
    %cst_33 = arith.constant dense<0.000000e+00> : vector<1x8x8xf32>
    %81 = tpu.matmul %79, %80, %cst_33 {dimension_numbers = #tpu.dot_dimension_numbers<[2], [1], [1], [2], [0, 0, 0, 1, 1, 2], [0], [0]>} : vector<1x8x8xbf16>, vector<1x8x8xbf16>, vector<1x8x8xf32> -> vector<1x8x8xf32>
    "tpu.trace_stop"() : () -> ()
    %82 = vector.shape_cast %81 : vector<1x8x8xf32> to vector<8x8xf32>
    %83 = arith.truncf %82 : vector<8x8xf32> to vector<8x8xbf16>
    %84 = vector.extract_strided_slice %10 {offsets = [1, 0, 0], sizes = [1, 8, 32], strides = [1, 1, 1]} : vector<4x8x32xbf16> to vector<1x8x32xbf16>
    %85 = vector.shape_cast %84 : vector<1x8x32xbf16> to vector<8x32xbf16>
    %cst_34 = arith.constant dense<0.000000e+00> : vector<8x32xf32>
    %86 = tpu.matmul %83, %85, %cst_34 {dimension_numbers = #tpu.dot_dimension_numbers<[1], [0], [0], [1], [0, 0, 1, 1], [], []>} : vector<8x8xbf16>, vector<8x32xbf16>, vector<8x32xf32> -> vector<8x32xf32>
    %87 = arith.addf %51, %86 : vector<8x32xf32>
    %88 = vector.extract_strided_slice %8 {offsets = [2, 0, 0], sizes = [1, 32, 24], strides = [1, 1, 1]} : vector<4x32x24xbf16> to vector<1x32x24xbf16>
    %89 = vector.shape_cast %88 : vector<1x32x24xbf16> to vector<32x24xbf16>
    %cst_35 = arith.constant dense<0.000000e+00> : vector<8x24xf32>
    %90 = tpu.matmul %13, %89, %cst_35 {dimension_numbers = #tpu.dot_dimension_numbers<[1], [0], [0], [1], [0, 0, 1, 1], [], []>} : vector<8x32xbf16>, vector<32x24xbf16>, vector<8x24xf32> -> vector<8x24xf32>
    %91 = vector.extract_strided_slice %9 {offsets = [2, 0, 0], sizes = [1, 1, 24], strides = [1, 1, 1]} : vector<4x1x24xf32> to vector<1x1x24xf32>
    %92 = vector.shape_cast %91 : vector<1x1x24xf32> to vector<1x24xf32>
    %93 = vector.broadcast %92 : vector<1x24xf32> to vector<8x24xf32>
    %94 = arith.addf %90, %93 : vector<8x24xf32>
    %95 = vector.extract_strided_slice %94 {offsets = [0, 0], sizes = [8, 8], strides = [1, 1]} : vector<8x24xf32> to vector<8x8xf32>
    %96 = vector.extract_strided_slice %94 {offsets = [0, 8], sizes = [8, 8], strides = [1, 1]} : vector<8x24xf32> to vector<8x8xf32>
    %97 = vector.extract_strided_slice %94 {offsets = [0, 16], sizes = [8, 8], strides = [1, 1]} : vector<8x24xf32> to vector<8x8xf32>
    %98 = vector.shape_cast %95 : vector<8x8xf32> to vector<1x8x8xf32>
    %99 = vector.shape_cast %96 : vector<8x8xf32> to vector<1x8x8xf32>
    %100 = vector.shape_cast %97 : vector<8x8xf32> to vector<1x8x8xf32>
    %101 = arith.truncf %98 : vector<1x8x8xf32> to vector<1x8x8xbf16>
    %102 = arith.truncf %99 : vector<1x8x8xf32> to vector<1x8x8xbf16>
    "tpu.trace_start"() <{level = 10 : i32, message = "bqd,bkd->bqk"}> : () -> ()
    %cst_36 = arith.constant dense<0.000000e+00> : vector<1x8x8xf32>
    %103 = tpu.matmul %101, %102, %cst_36 {dimension_numbers = #tpu.dot_dimension_numbers<[2], [2], [1], [1], [0, 0, 0, 1, 1, 1], [0], [0]>} : vector<1x8x8xbf16>, vector<1x8x8xbf16>, vector<1x8x8xf32> -> vector<1x8x8xf32>
    "tpu.trace_stop"() : () -> ()
    %104 = arith.addf %103, %6 : vector<1x8x8xf32>
    %cst_37 = arith.constant dense<0xFF800000> : vector<1x8xf32>
    %105 = vector.multi_reduction <maximumf>, %104, %cst_37 [2] : vector<1x8x8xf32> to vector<1x8xf32>
    %106 = vector.shape_cast %105 : vector<1x8xf32> to vector<1x8x1xf32>
    %107 = vector.broadcast %106 : vector<1x8x1xf32> to vector<1x8x8xf32>
    %108 = arith.subf %104, %107 : vector<1x8x8xf32>
    %109 = math.exp %108 : vector<1x8x8xf32>
    %cst_38 = arith.constant dense<0.000000e+00> : vector<1x8xf32>
    %110 = vector.multi_reduction <add>, %109, %cst_38 [2] : vector<1x8x8xf32> to vector<1x8xf32>
    %111 = vector.shape_cast %110 : vector<1x8xf32> to vector<1x8x1xf32>
    %112 = tpu.reciprocal %111 {approx = true} : vector<1x8x1xf32> -> vector<1x8x1xf32>
    %113 = vector.broadcast %112 : vector<1x8x1xf32> to vector<1x8x8xf32>
    %114 = arith.mulf %109, %113 : vector<1x8x8xf32>
    %115 = arith.truncf %114 : vector<1x8x8xf32> to vector<1x8x8xbf16>
    %116 = arith.truncf %100 : vector<1x8x8xf32> to vector<1x8x8xbf16>
    "tpu.trace_start"() <{level = 10 : i32, message = "bqk,bkd->bqd"}> : () -> ()
    %cst_39 = arith.constant dense<0.000000e+00> : vector<1x8x8xf32>
    %117 = tpu.matmul %115, %116, %cst_39 {dimension_numbers = #tpu.dot_dimension_numbers<[2], [1], [1], [2], [0, 0, 0, 1, 1, 2], [0], [0]>} : vector<1x8x8xbf16>, vector<1x8x8xbf16>, vector<1x8x8xf32> -> vector<1x8x8xf32>
    "tpu.trace_stop"() : () -> ()
    %118 = vector.shape_cast %117 : vector<1x8x8xf32> to vector<8x8xf32>
    %119 = arith.truncf %118 : vector<8x8xf32> to vector<8x8xbf16>
    %120 = vector.extract_strided_slice %10 {offsets = [2, 0, 0], sizes = [1, 8, 32], strides = [1, 1, 1]} : vector<4x8x32xbf16> to vector<1x8x32xbf16>
    %121 = vector.shape_cast %120 : vector<1x8x32xbf16> to vector<8x32xbf16>
    %cst_40 = arith.constant dense<0.000000e+00> : vector<8x32xf32>
    %122 = tpu.matmul %119, %121, %cst_40 {dimension_numbers = #tpu.dot_dimension_numbers<[1], [0], [0], [1], [0, 0, 1, 1], [], []>} : vector<8x8xbf16>, vector<8x32xbf16>, vector<8x32xf32> -> vector<8x32xf32>
    %123 = arith.addf %87, %122 : vector<8x32xf32>
    %124 = vector.extract_strided_slice %8 {offsets = [3, 0, 0], sizes = [1, 32, 24], strides = [1, 1, 1]} : vector<4x32x24xbf16> to vector<1x32x24xbf16>
    %125 = vector.shape_cast %124 : vector<1x32x24xbf16> to vector<32x24xbf16>
    %cst_41 = arith.constant dense<0.000000e+00> : vector<8x24xf32>
    %126 = tpu.matmul %13, %125, %cst_41 {dimension_numbers = #tpu.dot_dimension_numbers<[1], [0], [0], [1], [0, 0, 1, 1], [], []>} : vector<8x32xbf16>, vector<32x24xbf16>, vector<8x24xf32> -> vector<8x24xf32>
    %127 = vector.extract_strided_slice %9 {offsets = [3, 0, 0], sizes = [1, 1, 24], strides = [1, 1, 1]} : vector<4x1x24xf32> to vector<1x1x24xf32>
    %128 = vector.shape_cast %127 : vector<1x1x24xf32> to vector<1x24xf32>
    %129 = vector.broadcast %128 : vector<1x24xf32> to vector<8x24xf32>
    %130 = arith.addf %126, %129 : vector<8x24xf32>
    %131 = vector.extract_strided_slice %130 {offsets = [0, 0], sizes = [8, 8], strides = [1, 1]} : vector<8x24xf32> to vector<8x8xf32>
    %132 = vector.extract_strided_slice %130 {offsets = [0, 8], sizes = [8, 8], strides = [1, 1]} : vector<8x24xf32> to vector<8x8xf32>
    %133 = vector.extract_strided_slice %130 {offsets = [0, 16], sizes = [8, 8], strides = [1, 1]} : vector<8x24xf32> to vector<8x8xf32>
    %134 = vector.shape_cast %131 : vector<8x8xf32> to vector<1x8x8xf32>
    %135 = vector.shape_cast %132 : vector<8x8xf32> to vector<1x8x8xf32>
    %136 = vector.shape_cast %133 : vector<8x8xf32> to vector<1x8x8xf32>
    %137 = arith.truncf %134 : vector<1x8x8xf32> to vector<1x8x8xbf16>
    %138 = arith.truncf %135 : vector<1x8x8xf32> to vector<1x8x8xbf16>
    "tpu.trace_start"() <{level = 10 : i32, message = "bqd,bkd->bqk"}> : () -> ()
    %cst_42 = arith.constant dense<0.000000e+00> : vector<1x8x8xf32>
    %139 = tpu.matmul %137, %138, %cst_42 {dimension_numbers = #tpu.dot_dimension_numbers<[2], [2], [1], [1], [0, 0, 0, 1, 1, 1], [0], [0]>} : vector<1x8x8xbf16>, vector<1x8x8xbf16>, vector<1x8x8xf32> -> vector<1x8x8xf32>
    "tpu.trace_stop"() : () -> ()
    %140 = arith.addf %139, %6 : vector<1x8x8xf32>
    %cst_43 = arith.constant dense<0xFF800000> : vector<1x8xf32>
    %141 = vector.multi_reduction <maximumf>, %140, %cst_43 [2] : vector<1x8x8xf32> to vector<1x8xf32>
    %142 = vector.shape_cast %141 : vector<1x8xf32> to vector<1x8x1xf32>
    %143 = vector.broadcast %142 : vector<1x8x1xf32> to vector<1x8x8xf32>
    %144 = arith.subf %140, %143 : vector<1x8x8xf32>
    %145 = math.exp %144 : vector<1x8x8xf32>
    %cst_44 = arith.constant dense<0.000000e+00> : vector<1x8xf32>
    %146 = vector.multi_reduction <add>, %145, %cst_44 [2] : vector<1x8x8xf32> to vector<1x8xf32>
    %147 = vector.shape_cast %146 : vector<1x8xf32> to vector<1x8x1xf32>
    %148 = tpu.reciprocal %147 {approx = true} : vector<1x8x1xf32> -> vector<1x8x1xf32>
    %149 = vector.broadcast %148 : vector<1x8x1xf32> to vector<1x8x8xf32>
    %150 = arith.mulf %145, %149 : vector<1x8x8xf32>
    %151 = arith.truncf %150 : vector<1x8x8xf32> to vector<1x8x8xbf16>
    %152 = arith.truncf %136 : vector<1x8x8xf32> to vector<1x8x8xbf16>
    "tpu.trace_start"() <{level = 10 : i32, message = "bqk,bkd->bqd"}> : () -> ()
    %cst_45 = arith.constant dense<0.000000e+00> : vector<1x8x8xf32>
    %153 = tpu.matmul %151, %152, %cst_45 {dimension_numbers = #tpu.dot_dimension_numbers<[2], [1], [1], [2], [0, 0, 0, 1, 1, 2], [0], [0]>} : vector<1x8x8xbf16>, vector<1x8x8xbf16>, vector<1x8x8xf32> -> vector<1x8x8xf32>
    "tpu.trace_stop"() : () -> ()
    %154 = vector.shape_cast %153 : vector<1x8x8xf32> to vector<8x8xf32>
    %155 = arith.truncf %154 : vector<8x8xf32> to vector<8x8xbf16>
    %156 = vector.extract_strided_slice %10 {offsets = [3, 0, 0], sizes = [1, 8, 32], strides = [1, 1, 1]} : vector<4x8x32xbf16> to vector<1x8x32xbf16>
    %157 = vector.shape_cast %156 : vector<1x8x32xbf16> to vector<8x32xbf16>
    %cst_46 = arith.constant dense<0.000000e+00> : vector<8x32xf32>
    %158 = tpu.matmul %155, %157, %cst_46 {dimension_numbers = #tpu.dot_dimension_numbers<[1], [0], [0], [1], [0, 0, 1, 1], [], []>} : vector<8x8xbf16>, vector<8x32xbf16>, vector<8x32xf32> -> vector<8x32xf32>
    %159 = arith.addf %123, %158 : vector<8x32xf32>
    %160 = vector.shape_cast %0 : vector<1x8x32xf32> to vector<8x32xf32>
    %161 = arith.addf %160, %159 : vector<8x32xf32>
    %c0_47 = arith.constant 0 : index
    %c0_48 = arith.constant 0 : index
    %162 = vector.load %arg18[%c0_47, %c0_48] : memref<1x32xf32, #tpu.memory_space<vmem>>, vector<1x32xf32>
    %c0_49 = arith.constant 0 : index
    %c0_50 = arith.constant 0 : index
    %163 = vector.load %arg19[%c0_49, %c0_50] : memref<1x32xf32, #tpu.memory_space<vmem>>, vector<1x32xf32>
    %cst_51 = arith.constant dense<0.000000e+00> : vector<8xf32>
    %164 = vector.multi_reduction <add>, %161, %cst_51 [1] : vector<8x32xf32> to vector<8xf32>
    %165 = vector.shape_cast %164 : vector<8xf32> to vector<8x1xf32>
    %cst_52 = arith.constant 3.200000e+01 : f32
    %166 = vector.broadcast %cst_52 : f32 to vector<8x1xf32>
    %167 = arith.divf %165, %166 : vector<8x1xf32>
    %168 = vector.broadcast %167 : vector<8x1xf32> to vector<8x32xf32>
    %169 = arith.subf %161, %168 : vector<8x32xf32>
    %170 = arith.mulf %169, %169 : vector<8x32xf32>
    %cst_53 = arith.constant dense<0.000000e+00> : vector<8xf32>
    %171 = vector.multi_reduction <add>, %170, %cst_53 [1] : vector<8x32xf32> to vector<8xf32>
    %172 = vector.shape_cast %171 : vector<8xf32> to vector<8x1xf32>
    %cst_54 = arith.constant 3.200000e+01 : f32
    %173 = vector.broadcast %cst_54 : f32 to vector<8x1xf32>
    %174 = arith.divf %172, %173 : vector<8x1xf32>
    %cst_55 = arith.constant 9.99999974E-6 : f32
    %175 = vector.broadcast %cst_55 : f32 to vector<8x1xf32>
    %176 = arith.addf %174, %175 : vector<8x1xf32>
    %177 = math.rsqrt %176 : vector<8x1xf32>
    %178 = vector.broadcast %177 : vector<8x1xf32> to vector<8x32xf32>
    %179 = arith.mulf %169, %178 : vector<8x32xf32>
    %180 = vector.broadcast %162 : vector<1x32xf32> to vector<8x32xf32>
    %181 = arith.mulf %179, %180 : vector<8x32xf32>
    %182 = vector.broadcast %163 : vector<1x32xf32> to vector<8x32xf32>
    %183 = arith.addf %181, %182 : vector<8x32xf32>
    %184 = vector.shape_cast %183 : vector<8x32xf32> to vector<1x8x32xf32>
    %c0_56 = arith.constant 0 : index
    %c0_57 = arith.constant 0 : index
    %c0_58 = arith.constant 0 : index
    %185 = vector.load %arg10[%c0_56, %c0_57, %c0_58] : memref<4x32x24xbf16, #tpu.memory_space<vmem>>, vector<4x32x24xbf16>
    %c0_59 = arith.constant 0 : index
    %c0_60 = arith.constant 0 : index
    %c0_61 = arith.constant 0 : index
    %186 = vector.load %arg11[%c0_59, %c0_60, %c0_61] : memref<4x1x24xf32, #tpu.memory_space<vmem>>, vector<4x1x24xf32>
    %c0_62 = arith.constant 0 : index
    %c0_63 = arith.constant 0 : index
    %c0_64 = arith.constant 0 : index
    %187 = vector.load %arg12[%c0_62, %c0_63, %c0_64] : memref<4x8x32xbf16, #tpu.memory_space<vmem>>, vector<4x8x32xbf16>
    %c0_65 = arith.constant 0 : index
    %c0_66 = arith.constant 0 : index
    %188 = vector.load %arg13[%c0_65, %c0_66] : memref<1x32xf32, #tpu.memory_space<vmem>>, vector<1x32xf32>
    %189 = vector.shape_cast %184 : vector<1x8x32xf32> to vector<8x32xf32>
    %190 = arith.truncf %189 : vector<8x32xf32> to vector<8x32xbf16>
    %191 = vector.shape_cast %1 : vector<1x12x32xf32> to vector<12x32xf32>
    %192 = arith.truncf %191 : vector<12x32xf32> to vector<12x32xbf16>
    %193 = vector.shape_cast %188 : vector<1x32xf32> to vector<1x32xf32>
    %194 = vector.broadcast %193 : vector<1x32xf32> to vector<8x32xf32>
    %195 = vector.extract_strided_slice %185 {offsets = [0, 0, 0], sizes = [1, 32, 8], strides = [1, 1, 1]} : vector<4x32x24xbf16> to vector<1x32x8xbf16>
    %196 = vector.shape_cast %195 : vector<1x32x8xbf16> to vector<32x8xbf16>
    %cst_67 = arith.constant dense<0.000000e+00> : vector<8x8xf32>
    %197 = tpu.matmul %190, %196, %cst_67 {dimension_numbers = #tpu.dot_dimension_numbers<[1], [0], [0], [1], [0, 0, 1, 1], [], []>} : vector<8x32xbf16>, vector<32x8xbf16>, vector<8x8xf32> -> vector<8x8xf32>
    %198 = vector.extract_strided_slice %186 {offsets = [0, 0, 0], sizes = [1, 1, 8], strides = [1, 1, 1]} : vector<4x1x24xf32> to vector<1x1x8xf32>
    %199 = vector.shape_cast %198 : vector<1x1x8xf32> to vector<1x8xf32>
    %200 = vector.broadcast %199 : vector<1x8xf32> to vector<8x8xf32>
    %201 = arith.addf %197, %200 : vector<8x8xf32>
    %202 = vector.extract_strided_slice %185 {offsets = [0, 0, 8], sizes = [1, 32, 16], strides = [1, 1, 1]} : vector<4x32x24xbf16> to vector<1x32x16xbf16>
    %203 = vector.shape_cast %202 : vector<1x32x16xbf16> to vector<32x16xbf16>
    %cst_68 = arith.constant dense<0.000000e+00> : vector<12x16xf32>
    %204 = tpu.matmul %192, %203, %cst_68 {dimension_numbers = #tpu.dot_dimension_numbers<[1], [0], [0], [1], [0, 0, 1, 1], [], []>} : vector<12x32xbf16>, vector<32x16xbf16>, vector<12x16xf32> -> vector<12x16xf32>
    %205 = vector.extract_strided_slice %186 {offsets = [0, 0, 8], sizes = [1, 1, 16], strides = [1, 1, 1]} : vector<4x1x24xf32> to vector<1x1x16xf32>
    %206 = vector.shape_cast %205 : vector<1x1x16xf32> to vector<1x16xf32>
    %207 = vector.broadcast %206 : vector<1x16xf32> to vector<12x16xf32>
    %208 = arith.addf %204, %207 : vector<12x16xf32>
    %209 = vector.extract_strided_slice %208 {offsets = [0, 0], sizes = [12, 8], strides = [1, 1]} : vector<12x16xf32> to vector<12x8xf32>
    %210 = vector.extract_strided_slice %208 {offsets = [0, 8], sizes = [12, 8], strides = [1, 1]} : vector<12x16xf32> to vector<12x8xf32>
    %211 = vector.shape_cast %201 : vector<8x8xf32> to vector<1x8x8xf32>
    %212 = vector.shape_cast %209 : vector<12x8xf32> to vector<1x12x8xf32>
    %213 = vector.shape_cast %210 : vector<12x8xf32> to vector<1x12x8xf32>
    %214 = arith.truncf %211 : vector<1x8x8xf32> to vector<1x8x8xbf16>
    %215 = arith.truncf %212 : vector<1x12x8xf32> to vector<1x12x8xbf16>
    "tpu.trace_start"() <{level = 10 : i32, message = "bqd,bkd->bqk"}> : () -> ()
    %cst_69 = arith.constant dense<0.000000e+00> : vector<1x8x12xf32>
    %216 = tpu.matmul %214, %215, %cst_69 {dimension_numbers = #tpu.dot_dimension_numbers<[2], [2], [1], [1], [0, 0, 0, 1, 1, 1], [0], [0]>} : vector<1x8x8xbf16>, vector<1x12x8xbf16>, vector<1x8x12xf32> -> vector<1x8x12xf32>
    "tpu.trace_stop"() : () -> ()
    %217 = vector.broadcast %7 : vector<1x1x12xf32> to vector<1x8x12xf32>
    %218 = arith.addf %216, %217 : vector<1x8x12xf32>
    %cst_70 = arith.constant dense<0xFF800000> : vector<1x8xf32>
    %219 = vector.multi_reduction <maximumf>, %218, %cst_70 [2] : vector<1x8x12xf32> to vector<1x8xf32>
    %220 = vector.shape_cast %219 : vector<1x8xf32> to vector<1x8x1xf32>
    %221 = vector.broadcast %220 : vector<1x8x1xf32> to vector<1x8x12xf32>
    %222 = arith.subf %218, %221 : vector<1x8x12xf32>
    %223 = math.exp %222 : vector<1x8x12xf32>
    %cst_71 = arith.constant dense<0.000000e+00> : vector<1x8xf32>
    %224 = vector.multi_reduction <add>, %223, %cst_71 [2] : vector<1x8x12xf32> to vector<1x8xf32>
    %225 = vector.shape_cast %224 : vector<1x8xf32> to vector<1x8x1xf32>
    %226 = tpu.reciprocal %225 {approx = true} : vector<1x8x1xf32> -> vector<1x8x1xf32>
    %227 = vector.broadcast %226 : vector<1x8x1xf32> to vector<1x8x12xf32>
    %228 = arith.mulf %223, %227 : vector<1x8x12xf32>
    %229 = arith.truncf %228 : vector<1x8x12xf32> to vector<1x8x12xbf16>
    %230 = arith.truncf %213 : vector<1x12x8xf32> to vector<1x12x8xbf16>
    "tpu.trace_start"() <{level = 10 : i32, message = "bqk,bkd->bqd"}> : () -> ()
    %cst_72 = arith.constant dense<0.000000e+00> : vector<1x8x8xf32>
    %231 = tpu.matmul %229, %230, %cst_72 {dimension_numbers = #tpu.dot_dimension_numbers<[2], [1], [1], [2], [0, 0, 0, 1, 1, 2], [0], [0]>} : vector<1x8x12xbf16>, vector<1x12x8xbf16>, vector<1x8x8xf32> -> vector<1x8x8xf32>
    "tpu.trace_stop"() : () -> ()
    %232 = vector.shape_cast %231 : vector<1x8x8xf32> to vector<8x8xf32>
    %233 = arith.truncf %232 : vector<8x8xf32> to vector<8x8xbf16>
    %234 = vector.extract_strided_slice %187 {offsets = [0, 0, 0], sizes = [1, 8, 32], strides = [1, 1, 1]} : vector<4x8x32xbf16> to vector<1x8x32xbf16>
    %235 = vector.shape_cast %234 : vector<1x8x32xbf16> to vector<8x32xbf16>
    %cst_73 = arith.constant dense<0.000000e+00> : vector<8x32xf32>
    %236 = tpu.matmul %233, %235, %cst_73 {dimension_numbers = #tpu.dot_dimension_numbers<[1], [0], [0], [1], [0, 0, 1, 1], [], []>} : vector<8x8xbf16>, vector<8x32xbf16>, vector<8x32xf32> -> vector<8x32xf32>
    %237 = arith.addf %194, %236 : vector<8x32xf32>
    %238 = vector.extract_strided_slice %185 {offsets = [1, 0, 0], sizes = [1, 32, 8], strides = [1, 1, 1]} : vector<4x32x24xbf16> to vector<1x32x8xbf16>
    %239 = vector.shape_cast %238 : vector<1x32x8xbf16> to vector<32x8xbf16>
    %cst_74 = arith.constant dense<0.000000e+00> : vector<8x8xf32>
    %240 = tpu.matmul %190, %239, %cst_74 {dimension_numbers = #tpu.dot_dimension_numbers<[1], [0], [0], [1], [0, 0, 1, 1], [], []>} : vector<8x32xbf16>, vector<32x8xbf16>, vector<8x8xf32> -> vector<8x8xf32>
    %241 = vector.extract_strided_slice %186 {offsets = [1, 0, 0], sizes = [1, 1, 8], strides = [1, 1, 1]} : vector<4x1x24xf32> to vector<1x1x8xf32>
    %242 = vector.shape_cast %241 : vector<1x1x8xf32> to vector<1x8xf32>
    %243 = vector.broadcast %242 : vector<1x8xf32> to vector<8x8xf32>
    %244 = arith.addf %240, %243 : vector<8x8xf32>
    %245 = vector.extract_strided_slice %185 {offsets = [1, 0, 8], sizes = [1, 32, 16], strides = [1, 1, 1]} : vector<4x32x24xbf16> to vector<1x32x16xbf16>
    %246 = vector.shape_cast %245 : vector<1x32x16xbf16> to vector<32x16xbf16>
    %cst_75 = arith.constant dense<0.000000e+00> : vector<12x16xf32>
    %247 = tpu.matmul %192, %246, %cst_75 {dimension_numbers = #tpu.dot_dimension_numbers<[1], [0], [0], [1], [0, 0, 1, 1], [], []>} : vector<12x32xbf16>, vector<32x16xbf16>, vector<12x16xf32> -> vector<12x16xf32>
    %248 = vector.extract_strided_slice %186 {offsets = [1, 0, 8], sizes = [1, 1, 16], strides = [1, 1, 1]} : vector<4x1x24xf32> to vector<1x1x16xf32>
    %249 = vector.shape_cast %248 : vector<1x1x16xf32> to vector<1x16xf32>
    %250 = vector.broadcast %249 : vector<1x16xf32> to vector<12x16xf32>
    %251 = arith.addf %247, %250 : vector<12x16xf32>
    %252 = vector.extract_strided_slice %251 {offsets = [0, 0], sizes = [12, 8], strides = [1, 1]} : vector<12x16xf32> to vector<12x8xf32>
    %253 = vector.extract_strided_slice %251 {offsets = [0, 8], sizes = [12, 8], strides = [1, 1]} : vector<12x16xf32> to vector<12x8xf32>
    %254 = vector.shape_cast %244 : vector<8x8xf32> to vector<1x8x8xf32>
    %255 = vector.shape_cast %252 : vector<12x8xf32> to vector<1x12x8xf32>
    %256 = vector.shape_cast %253 : vector<12x8xf32> to vector<1x12x8xf32>
    %257 = arith.truncf %254 : vector<1x8x8xf32> to vector<1x8x8xbf16>
    %258 = arith.truncf %255 : vector<1x12x8xf32> to vector<1x12x8xbf16>
    "tpu.trace_start"() <{level = 10 : i32, message = "bqd,bkd->bqk"}> : () -> ()
    %cst_76 = arith.constant dense<0.000000e+00> : vector<1x8x12xf32>
    %259 = tpu.matmul %257, %258, %cst_76 {dimension_numbers = #tpu.dot_dimension_numbers<[2], [2], [1], [1], [0, 0, 0, 1, 1, 1], [0], [0]>} : vector<1x8x8xbf16>, vector<1x12x8xbf16>, vector<1x8x12xf32> -> vector<1x8x12xf32>
    "tpu.trace_stop"() : () -> ()
    %260 = vector.broadcast %7 : vector<1x1x12xf32> to vector<1x8x12xf32>
    %261 = arith.addf %259, %260 : vector<1x8x12xf32>
    %cst_77 = arith.constant dense<0xFF800000> : vector<1x8xf32>
    %262 = vector.multi_reduction <maximumf>, %261, %cst_77 [2] : vector<1x8x12xf32> to vector<1x8xf32>
    %263 = vector.shape_cast %262 : vector<1x8xf32> to vector<1x8x1xf32>
    %264 = vector.broadcast %263 : vector<1x8x1xf32> to vector<1x8x12xf32>
    %265 = arith.subf %261, %264 : vector<1x8x12xf32>
    %266 = math.exp %265 : vector<1x8x12xf32>
    %cst_78 = arith.constant dense<0.000000e+00> : vector<1x8xf32>
    %267 = vector.multi_reduction <add>, %266, %cst_78 [2] : vector<1x8x12xf32> to vector<1x8xf32>
    %268 = vector.shape_cast %267 : vector<1x8xf32> to vector<1x8x1xf32>
    %269 = tpu.reciprocal %268 {approx = true} : vector<1x8x1xf32> -> vector<1x8x1xf32>
    %270 = vector.broadcast %269 : vector<1x8x1xf32> to vector<1x8x12xf32>
    %271 = arith.mulf %266, %270 : vector<1x8x12xf32>
    %272 = arith.truncf %271 : vector<1x8x12xf32> to vector<1x8x12xbf16>
    %273 = arith.truncf %256 : vector<1x12x8xf32> to vector<1x12x8xbf16>
    "tpu.trace_start"() <{level = 10 : i32, message = "bqk,bkd->bqd"}> : () -> ()
    %cst_79 = arith.constant dense<0.000000e+00> : vector<1x8x8xf32>
    %274 = tpu.matmul %272, %273, %cst_79 {dimension_numbers = #tpu.dot_dimension_numbers<[2], [1], [1], [2], [0, 0, 0, 1, 1, 2], [0], [0]>} : vector<1x8x12xbf16>, vector<1x12x8xbf16>, vector<1x8x8xf32> -> vector<1x8x8xf32>
    "tpu.trace_stop"() : () -> ()
    %275 = vector.shape_cast %274 : vector<1x8x8xf32> to vector<8x8xf32>
    %276 = arith.truncf %275 : vector<8x8xf32> to vector<8x8xbf16>
    %277 = vector.extract_strided_slice %187 {offsets = [1, 0, 0], sizes = [1, 8, 32], strides = [1, 1, 1]} : vector<4x8x32xbf16> to vector<1x8x32xbf16>
    %278 = vector.shape_cast %277 : vector<1x8x32xbf16> to vector<8x32xbf16>
    %cst_80 = arith.constant dense<0.000000e+00> : vector<8x32xf32>
    %279 = tpu.matmul %276, %278, %cst_80 {dimension_numbers = #tpu.dot_dimension_numbers<[1], [0], [0], [1], [0, 0, 1, 1], [], []>} : vector<8x8xbf16>, vector<8x32xbf16>, vector<8x32xf32> -> vector<8x32xf32>
    %280 = arith.addf %237, %279 : vector<8x32xf32>
    %281 = vector.extract_strided_slice %185 {offsets = [2, 0, 0], sizes = [1, 32, 8], strides = [1, 1, 1]} : vector<4x32x24xbf16> to vector<1x32x8xbf16>
    %282 = vector.shape_cast %281 : vector<1x32x8xbf16> to vector<32x8xbf16>
    %cst_81 = arith.constant dense<0.000000e+00> : vector<8x8xf32>
    %283 = tpu.matmul %190, %282, %cst_81 {dimension_numbers = #tpu.dot_dimension_numbers<[1], [0], [0], [1], [0, 0, 1, 1], [], []>} : vector<8x32xbf16>, vector<32x8xbf16>, vector<8x8xf32> -> vector<8x8xf32>
    %284 = vector.extract_strided_slice %186 {offsets = [2, 0, 0], sizes = [1, 1, 8], strides = [1, 1, 1]} : vector<4x1x24xf32> to vector<1x1x8xf32>
    %285 = vector.shape_cast %284 : vector<1x1x8xf32> to vector<1x8xf32>
    %286 = vector.broadcast %285 : vector<1x8xf32> to vector<8x8xf32>
    %287 = arith.addf %283, %286 : vector<8x8xf32>
    %288 = vector.extract_strided_slice %185 {offsets = [2, 0, 8], sizes = [1, 32, 16], strides = [1, 1, 1]} : vector<4x32x24xbf16> to vector<1x32x16xbf16>
    %289 = vector.shape_cast %288 : vector<1x32x16xbf16> to vector<32x16xbf16>
    %cst_82 = arith.constant dense<0.000000e+00> : vector<12x16xf32>
    %290 = tpu.matmul %192, %289, %cst_82 {dimension_numbers = #tpu.dot_dimension_numbers<[1], [0], [0], [1], [0, 0, 1, 1], [], []>} : vector<12x32xbf16>, vector<32x16xbf16>, vector<12x16xf32> -> vector<12x16xf32>
    %291 = vector.extract_strided_slice %186 {offsets = [2, 0, 8], sizes = [1, 1, 16], strides = [1, 1, 1]} : vector<4x1x24xf32> to vector<1x1x16xf32>
    %292 = vector.shape_cast %291 : vector<1x1x16xf32> to vector<1x16xf32>
    %293 = vector.broadcast %292 : vector<1x16xf32> to vector<12x16xf32>
    %294 = arith.addf %290, %293 : vector<12x16xf32>
    %295 = vector.extract_strided_slice %294 {offsets = [0, 0], sizes = [12, 8], strides = [1, 1]} : vector<12x16xf32> to vector<12x8xf32>
    %296 = vector.extract_strided_slice %294 {offsets = [0, 8], sizes = [12, 8], strides = [1, 1]} : vector<12x16xf32> to vector<12x8xf32>
    %297 = vector.shape_cast %287 : vector<8x8xf32> to vector<1x8x8xf32>
    %298 = vector.shape_cast %295 : vector<12x8xf32> to vector<1x12x8xf32>
    %299 = vector.shape_cast %296 : vector<12x8xf32> to vector<1x12x8xf32>
    %300 = arith.truncf %297 : vector<1x8x8xf32> to vector<1x8x8xbf16>
    %301 = arith.truncf %298 : vector<1x12x8xf32> to vector<1x12x8xbf16>
    "tpu.trace_start"() <{level = 10 : i32, message = "bqd,bkd->bqk"}> : () -> ()
    %cst_83 = arith.constant dense<0.000000e+00> : vector<1x8x12xf32>
    %302 = tpu.matmul %300, %301, %cst_83 {dimension_numbers = #tpu.dot_dimension_numbers<[2], [2], [1], [1], [0, 0, 0, 1, 1, 1], [0], [0]>} : vector<1x8x8xbf16>, vector<1x12x8xbf16>, vector<1x8x12xf32> -> vector<1x8x12xf32>
    "tpu.trace_stop"() : () -> ()
    %303 = vector.broadcast %7 : vector<1x1x12xf32> to vector<1x8x12xf32>
    %304 = arith.addf %302, %303 : vector<1x8x12xf32>
    %cst_84 = arith.constant dense<0xFF800000> : vector<1x8xf32>
    %305 = vector.multi_reduction <maximumf>, %304, %cst_84 [2] : vector<1x8x12xf32> to vector<1x8xf32>
    %306 = vector.shape_cast %305 : vector<1x8xf32> to vector<1x8x1xf32>
    %307 = vector.broadcast %306 : vector<1x8x1xf32> to vector<1x8x12xf32>
    %308 = arith.subf %304, %307 : vector<1x8x12xf32>
    %309 = math.exp %308 : vector<1x8x12xf32>
    %cst_85 = arith.constant dense<0.000000e+00> : vector<1x8xf32>
    %310 = vector.multi_reduction <add>, %309, %cst_85 [2] : vector<1x8x12xf32> to vector<1x8xf32>
    %311 = vector.shape_cast %310 : vector<1x8xf32> to vector<1x8x1xf32>
    %312 = tpu.reciprocal %311 {approx = true} : vector<1x8x1xf32> -> vector<1x8x1xf32>
    %313 = vector.broadcast %312 : vector<1x8x1xf32> to vector<1x8x12xf32>
    %314 = arith.mulf %309, %313 : vector<1x8x12xf32>
    %315 = arith.truncf %314 : vector<1x8x12xf32> to vector<1x8x12xbf16>
    %316 = arith.truncf %299 : vector<1x12x8xf32> to vector<1x12x8xbf16>
    "tpu.trace_start"() <{level = 10 : i32, message = "bqk,bkd->bqd"}> : () -> ()
    %cst_86 = arith.constant dense<0.000000e+00> : vector<1x8x8xf32>
    %317 = tpu.matmul %315, %316, %cst_86 {dimension_numbers = #tpu.dot_dimension_numbers<[2], [1], [1], [2], [0, 0, 0, 1, 1, 2], [0], [0]>} : vector<1x8x12xbf16>, vector<1x12x8xbf16>, vector<1x8x8xf32> -> vector<1x8x8xf32>
    "tpu.trace_stop"() : () -> ()
    %318 = vector.shape_cast %317 : vector<1x8x8xf32> to vector<8x8xf32>
    %319 = arith.truncf %318 : vector<8x8xf32> to vector<8x8xbf16>
    %320 = vector.extract_strided_slice %187 {offsets = [2, 0, 0], sizes = [1, 8, 32], strides = [1, 1, 1]} : vector<4x8x32xbf16> to vector<1x8x32xbf16>
    %321 = vector.shape_cast %320 : vector<1x8x32xbf16> to vector<8x32xbf16>
    %cst_87 = arith.constant dense<0.000000e+00> : vector<8x32xf32>
    %322 = tpu.matmul %319, %321, %cst_87 {dimension_numbers = #tpu.dot_dimension_numbers<[1], [0], [0], [1], [0, 0, 1, 1], [], []>} : vector<8x8xbf16>, vector<8x32xbf16>, vector<8x32xf32> -> vector<8x32xf32>
    %323 = arith.addf %280, %322 : vector<8x32xf32>
    %324 = vector.extract_strided_slice %185 {offsets = [3, 0, 0], sizes = [1, 32, 8], strides = [1, 1, 1]} : vector<4x32x24xbf16> to vector<1x32x8xbf16>
    %325 = vector.shape_cast %324 : vector<1x32x8xbf16> to vector<32x8xbf16>
    %cst_88 = arith.constant dense<0.000000e+00> : vector<8x8xf32>
    %326 = tpu.matmul %190, %325, %cst_88 {dimension_numbers = #tpu.dot_dimension_numbers<[1], [0], [0], [1], [0, 0, 1, 1], [], []>} : vector<8x32xbf16>, vector<32x8xbf16>, vector<8x8xf32> -> vector<8x8xf32>
    %327 = vector.extract_strided_slice %186 {offsets = [3, 0, 0], sizes = [1, 1, 8], strides = [1, 1, 1]} : vector<4x1x24xf32> to vector<1x1x8xf32>
    %328 = vector.shape_cast %327 : vector<1x1x8xf32> to vector<1x8xf32>
    %329 = vector.broadcast %328 : vector<1x8xf32> to vector<8x8xf32>
    %330 = arith.addf %326, %329 : vector<8x8xf32>
    %331 = vector.extract_strided_slice %185 {offsets = [3, 0, 8], sizes = [1, 32, 16], strides = [1, 1, 1]} : vector<4x32x24xbf16> to vector<1x32x16xbf16>
    %332 = vector.shape_cast %331 : vector<1x32x16xbf16> to vector<32x16xbf16>
    %cst_89 = arith.constant dense<0.000000e+00> : vector<12x16xf32>
    %333 = tpu.matmul %192, %332, %cst_89 {dimension_numbers = #tpu.dot_dimension_numbers<[1], [0], [0], [1], [0, 0, 1, 1], [], []>} : vector<12x32xbf16>, vector<32x16xbf16>, vector<12x16xf32> -> vector<12x16xf32>
    %334 = vector.extract_strided_slice %186 {offsets = [3, 0, 8], sizes = [1, 1, 16], strides = [1, 1, 1]} : vector<4x1x24xf32> to vector<1x1x16xf32>
    %335 = vector.shape_cast %334 : vector<1x1x16xf32> to vector<1x16xf32>
    %336 = vector.broadcast %335 : vector<1x16xf32> to vector<12x16xf32>
    %337 = arith.addf %333, %336 : vector<12x16xf32>
    %338 = vector.extract_strided_slice %337 {offsets = [0, 0], sizes = [12, 8], strides = [1, 1]} : vector<12x16xf32> to vector<12x8xf32>
    %339 = vector.extract_strided_slice %337 {offsets = [0, 8], sizes = [12, 8], strides = [1, 1]} : vector<12x16xf32> to vector<12x8xf32>
    %340 = vector.shape_cast %330 : vector<8x8xf32> to vector<1x8x8xf32>
    %341 = vector.shape_cast %338 : vector<12x8xf32> to vector<1x12x8xf32>
    %342 = vector.shape_cast %339 : vector<12x8xf32> to vector<1x12x8xf32>
    %343 = arith.truncf %340 : vector<1x8x8xf32> to vector<1x8x8xbf16>
    %344 = arith.truncf %341 : vector<1x12x8xf32> to vector<1x12x8xbf16>
    "tpu.trace_start"() <{level = 10 : i32, message = "bqd,bkd->bqk"}> : () -> ()
    %cst_90 = arith.constant dense<0.000000e+00> : vector<1x8x12xf32>
    %345 = tpu.matmul %343, %344, %cst_90 {dimension_numbers = #tpu.dot_dimension_numbers<[2], [2], [1], [1], [0, 0, 0, 1, 1, 1], [0], [0]>} : vector<1x8x8xbf16>, vector<1x12x8xbf16>, vector<1x8x12xf32> -> vector<1x8x12xf32>
    "tpu.trace_stop"() : () -> ()
    %346 = vector.broadcast %7 : vector<1x1x12xf32> to vector<1x8x12xf32>
    %347 = arith.addf %345, %346 : vector<1x8x12xf32>
    %cst_91 = arith.constant dense<0xFF800000> : vector<1x8xf32>
    %348 = vector.multi_reduction <maximumf>, %347, %cst_91 [2] : vector<1x8x12xf32> to vector<1x8xf32>
    %349 = vector.shape_cast %348 : vector<1x8xf32> to vector<1x8x1xf32>
    %350 = vector.broadcast %349 : vector<1x8x1xf32> to vector<1x8x12xf32>
    %351 = arith.subf %347, %350 : vector<1x8x12xf32>
    %352 = math.exp %351 : vector<1x8x12xf32>
    %cst_92 = arith.constant dense<0.000000e+00> : vector<1x8xf32>
    %353 = vector.multi_reduction <add>, %352, %cst_92 [2] : vector<1x8x12xf32> to vector<1x8xf32>
    %354 = vector.shape_cast %353 : vector<1x8xf32> to vector<1x8x1xf32>
    %355 = tpu.reciprocal %354 {approx = true} : vector<1x8x1xf32> -> vector<1x8x1xf32>
    %356 = vector.broadcast %355 : vector<1x8x1xf32> to vector<1x8x12xf32>
    %357 = arith.mulf %352, %356 : vector<1x8x12xf32>
    %358 = arith.truncf %357 : vector<1x8x12xf32> to vector<1x8x12xbf16>
    %359 = arith.truncf %342 : vector<1x12x8xf32> to vector<1x12x8xbf16>
    "tpu.trace_start"() <{level = 10 : i32, message = "bqk,bkd->bqd"}> : () -> ()
    %cst_93 = arith.constant dense<0.000000e+00> : vector<1x8x8xf32>
    %360 = tpu.matmul %358, %359, %cst_93 {dimension_numbers = #tpu.dot_dimension_numbers<[2], [1], [1], [2], [0, 0, 0, 1, 1, 2], [0], [0]>} : vector<1x8x12xbf16>, vector<1x12x8xbf16>, vector<1x8x8xf32> -> vector<1x8x8xf32>
    "tpu.trace_stop"() : () -> ()
    %361 = vector.shape_cast %360 : vector<1x8x8xf32> to vector<8x8xf32>
    %362 = arith.truncf %361 : vector<8x8xf32> to vector<8x8xbf16>
    %363 = vector.extract_strided_slice %187 {offsets = [3, 0, 0], sizes = [1, 8, 32], strides = [1, 1, 1]} : vector<4x8x32xbf16> to vector<1x8x32xbf16>
    %364 = vector.shape_cast %363 : vector<1x8x32xbf16> to vector<8x32xbf16>
    %cst_94 = arith.constant dense<0.000000e+00> : vector<8x32xf32>
    %365 = tpu.matmul %362, %364, %cst_94 {dimension_numbers = #tpu.dot_dimension_numbers<[1], [0], [0], [1], [0, 0, 1, 1], [], []>} : vector<8x8xbf16>, vector<8x32xbf16>, vector<8x32xf32> -> vector<8x32xf32>
    %366 = arith.addf %323, %365 : vector<8x32xf32>
    %367 = arith.addf %183, %366 : vector<8x32xf32>
    %c0_95 = arith.constant 0 : index
    %c0_96 = arith.constant 0 : index
    %368 = vector.load %arg20[%c0_95, %c0_96] : memref<1x32xf32, #tpu.memory_space<vmem>>, vector<1x32xf32>
    %c0_97 = arith.constant 0 : index
    %c0_98 = arith.constant 0 : index
    %369 = vector.load %arg21[%c0_97, %c0_98] : memref<1x32xf32, #tpu.memory_space<vmem>>, vector<1x32xf32>
    %cst_99 = arith.constant dense<0.000000e+00> : vector<8xf32>
    %370 = vector.multi_reduction <add>, %367, %cst_99 [1] : vector<8x32xf32> to vector<8xf32>
    %371 = vector.shape_cast %370 : vector<8xf32> to vector<8x1xf32>
    %cst_100 = arith.constant 3.200000e+01 : f32
    %372 = vector.broadcast %cst_100 : f32 to vector<8x1xf32>
    %373 = arith.divf %371, %372 : vector<8x1xf32>
    %374 = vector.broadcast %373 : vector<8x1xf32> to vector<8x32xf32>
    %375 = arith.subf %367, %374 : vector<8x32xf32>
    %376 = arith.mulf %375, %375 : vector<8x32xf32>
    %cst_101 = arith.constant dense<0.000000e+00> : vector<8xf32>
    %377 = vector.multi_reduction <add>, %376, %cst_101 [1] : vector<8x32xf32> to vector<8xf32>
    %378 = vector.shape_cast %377 : vector<8xf32> to vector<8x1xf32>
    %cst_102 = arith.constant 3.200000e+01 : f32
    %379 = vector.broadcast %cst_102 : f32 to vector<8x1xf32>
    %380 = arith.divf %378, %379 : vector<8x1xf32>
    %cst_103 = arith.constant 9.99999974E-6 : f32
    %381 = vector.broadcast %cst_103 : f32 to vector<8x1xf32>
    %382 = arith.addf %380, %381 : vector<8x1xf32>
    %383 = math.rsqrt %382 : vector<8x1xf32>
    %384 = vector.broadcast %383 : vector<8x1xf32> to vector<8x32xf32>
    %385 = arith.mulf %375, %384 : vector<8x32xf32>
    %386 = vector.broadcast %368 : vector<1x32xf32> to vector<8x32xf32>
    %387 = arith.mulf %385, %386 : vector<8x32xf32>
    %388 = vector.broadcast %369 : vector<1x32xf32> to vector<8x32xf32>
    %389 = arith.addf %387, %388 : vector<8x32xf32>
    %390 = arith.truncf %389 : vector<8x32xf32> to vector<8x32xbf16>
    %c0_104 = arith.constant 0 : index
    %c0_105 = arith.constant 0 : index
    %391 = vector.load %arg14[%c0_104, %c0_105] : memref<32x64xbf16, #tpu.memory_space<vmem>>, vector<32x64xbf16>
    %cst_106 = arith.constant dense<0.000000e+00> : vector<8x64xf32>
    %392 = tpu.matmul %390, %391, %cst_106 {dimension_numbers = #tpu.dot_dimension_numbers<[1], [0], [0], [1], [0, 0, 1, 1], [], []>} : vector<8x32xbf16>, vector<32x64xbf16>, vector<8x64xf32> -> vector<8x64xf32>
    %c0_107 = arith.constant 0 : index
    %c0_108 = arith.constant 0 : index
    %393 = vector.load %arg15[%c0_107, %c0_108] : memref<1x64xf32, #tpu.memory_space<vmem>>, vector<1x64xf32>
    %394 = vector.broadcast %393 : vector<1x64xf32> to vector<8x64xf32>
    %395 = arith.addf %392, %394 : vector<8x64xf32>
    %cst_109 = arith.constant 0.000000e+00 : f32
    %396 = vector.broadcast %cst_109 : f32 to vector<8x64xf32>
    %397 = arith.maximumf %395, %396 : vector<8x64xf32>
    %398 = arith.truncf %397 : vector<8x64xf32> to vector<8x64xbf16>
    %c0_110 = arith.constant 0 : index
    %c0_111 = arith.constant 0 : index
    %399 = vector.load %arg16[%c0_110, %c0_111] : memref<64x32xbf16, #tpu.memory_space<vmem>>, vector<64x32xbf16>
    %cst_112 = arith.constant dense<0.000000e+00> : vector<8x32xf32>
    %400 = tpu.matmul %398, %399, %cst_112 {dimension_numbers = #tpu.dot_dimension_numbers<[1], [0], [0], [1], [0, 0, 1, 1], [], []>} : vector<8x64xbf16>, vector<64x32xbf16>, vector<8x32xf32> -> vector<8x32xf32>
    %c0_113 = arith.constant 0 : index
    %c0_114 = arith.constant 0 : index
    %401 = vector.load %arg17[%c0_113, %c0_114] : memref<1x32xf32, #tpu.memory_space<vmem>>, vector<1x32xf32>
    %402 = vector.broadcast %401 : vector<1x32xf32> to vector<8x32xf32>
    %403 = arith.addf %400, %402 : vector<8x32xf32>
    %404 = arith.addf %389, %403 : vector<8x32xf32>
    %c0_115 = arith.constant 0 : index
    %c0_116 = arith.constant 0 : index
    %405 = vector.load %arg22[%c0_115, %c0_116] : memref<1x32xf32, #tpu.memory_space<vmem>>, vector<1x32xf32>
    %c0_117 = arith.constant 0 : index
    %c0_118 = arith.constant 0 : index
    %406 = vector.load %arg23[%c0_117, %c0_118] : memref<1x32xf32, #tpu.memory_space<vmem>>, vector<1x32xf32>
    %cst_119 = arith.constant dense<0.000000e+00> : vector<8xf32>
    %407 = vector.multi_reduction <add>, %404, %cst_119 [1] : vector<8x32xf32> to vector<8xf32>
    %408 = vector.shape_cast %407 : vector<8xf32> to vector<8x1xf32>
    %cst_120 = arith.constant 3.200000e+01 : f32
    %409 = vector.broadcast %cst_120 : f32 to vector<8x1xf32>
    %410 = arith.divf %408, %409 : vector<8x1xf32>
    %411 = vector.broadcast %410 : vector<8x1xf32> to vector<8x32xf32>
    %412 = arith.subf %404, %411 : vector<8x32xf32>
    %413 = arith.mulf %412, %412 : vector<8x32xf32>
    %cst_121 = arith.constant dense<0.000000e+00> : vector<8xf32>
    %414 = vector.multi_reduction <add>, %413, %cst_121 [1] : vector<8x32xf32> to vector<8xf32>
    %415 = vector.shape_cast %414 : vector<8xf32> to vector<8x1xf32>
    %cst_122 = arith.constant 3.200000e+01 : f32
    %416 = vector.broadcast %cst_122 : f32 to vector<8x1xf32>
    %417 = arith.divf %415, %416 : vector<8x1xf32>
    %cst_123 = arith.constant 9.99999974E-6 : f32
    %418 = vector.broadcast %cst_123 : f32 to vector<8x1xf32>
    %419 = arith.addf %417, %418 : vector<8x1xf32>
    %420 = math.rsqrt %419 : vector<8x1xf32>
    %421 = vector.broadcast %420 : vector<8x1xf32> to vector<8x32xf32>
    %422 = arith.mulf %412, %421 : vector<8x32xf32>
    %423 = vector.broadcast %405 : vector<1x32xf32> to vector<8x32xf32>
    %424 = arith.mulf %422, %423 : vector<8x32xf32>
    %425 = vector.broadcast %406 : vector<1x32xf32> to vector<8x32xf32>
    %426 = arith.addf %424, %425 : vector<8x32xf32>
    %427 = vector.shape_cast %426 : vector<8x32xf32> to vector<1x8x32xf32>
    %c0_124 = arith.constant 0 : index
    %c0_125 = arith.constant 0 : index
    %c0_126 = arith.constant 0 : index
    %428 = vector.load %arg24[%c0_124, %c0_125, %c0_126] : memref<1x8x32xf32, #tpu.memory_space<vmem>>, vector<1x8x32xf32>
    tpu.vector_store %arg24[%c0_124, %c0_125, %c0_126], %427 {strides = array<i32>} : memref<1x8x32xf32, #tpu.memory_space<vmem>>, vector<1x8x32xf32>,
    return
  }
  func.func @transform_0(%arg0: i32) -> (i32, i32, i32) {
    %c0_i32 = arith.constant 0 : i32
    %c0_i32_0 = arith.constant 0 : i32
    %c0_i32_1 = arith.constant 0 : i32
    return %arg0, %c0_i32, %c0_i32_0 : i32, i32, i32
  }
  func.func @transform_1(%arg0: i32) -> (i32, i32, i32) {
    %c0_i32 = arith.constant 0 : i32
    %c0_i32_0 = arith.constant 0 : i32
    %c0_i32_1 = arith.constant 0 : i32
    return %arg0, %c0_i32, %c0_i32_0 : i32, i32, i32
  }
  func.func @transform_2(%arg0: i32) -> (i32, i32) {
    %c0_i32 = arith.constant 0 : i32
    %c0_i32_0 = arith.constant 0 : i32
    %c0_i32_1 = arith.constant 0 : i32
    return %c0_i32, %c0_i32_0 : i32, i32
  }
  func.func @transform_3(%arg0: i32) -> (i32, i32, i32) {
    %c0_i32 = arith.constant 0 : i32
    %c0_i32_0 = arith.constant 0 : i32
    %c0_i32_1 = arith.constant 0 : i32
    return %arg0, %c0_i32, %c0_i32_0 : i32, i32, i32
  }
  func.func @transform_4(%arg0: i32) -> (i32, i32, i32) {
    %c0_i32 = arith.constant 0 : i32
    %c0_i32_0 = arith.constant 0 : i32
    %c0_i32_1 = arith.constant 0 : i32
    return %arg0, %c0_i32, %c0_i32_0 : i32, i32, i32
  }
  func.func @transform_5(%arg0: i32) -> (i32, i32, i32) {
    %c0_i32 = arith.constant 0 : i32
    %c0_i32_0 = arith.constant 0 : i32
    %c0_i32_1 = arith.constant 0 : i32
    %c0_i32_2 = arith.constant 0 : i32
    return %c0_i32, %c0_i32_0, %c0_i32_1 : i32, i32, i32
  }
  func.func @transform_6(%arg0: i32) -> (i32, i32, i32) {
    %c0_i32 = arith.constant 0 : i32
    %c0_i32_0 = arith.constant 0 : i32
    %c0_i32_1 = arith.constant 0 : i32
    %c0_i32_2 = arith.constant 0 : i32
    return %c0_i32, %c0_i32_0, %c0_i32_1 : i32, i32, i32
  }
  func.func @transform_7(%arg0: i32) -> (i32, i32, i32) {
    %c0_i32 = arith.constant 0 : i32
    %c0_i32_0 = arith.constant 0 : i32
    %c0_i32_1 = arith.constant 0 : i32
    %c0_i32_2 = arith.constant 0 : i32
    return %c0_i32, %c0_i32_0, %c0_i32_1 : i32, i32, i32
  }
  func.func @transform_8(%arg0: i32) -> (i32, i32) {
    %c0_i32 = arith.constant 0 : i32
    %c0_i32_0 = arith.constant 0 : i32
    %c0_i32_1 = arith.constant 0 : i32
    return %c0_i32, %c0_i32_0 : i32, i32
  }
  func.func @transform_9(%arg0: i32) -> (i32, i32, i32) {
    %c0_i32 = arith.constant 0 : i32
    %c0_i32_0 = arith.constant 0 : i32
    %c0_i32_1 = arith.constant 0 : i32
    %c0_i32_2 = arith.constant 0 : i32
    return %c0_i32, %c0_i32_0, %c0_i32_1 : i32, i32, i32
  }
  func.func @transform_10(%arg0: i32) -> (i32, i32, i32) {
    %c0_i32 = arith.constant 0 : i32
    %c0_i32_0 = arith.constant 0 : i32
    %c0_i32_1 = arith.constant 0 : i32
    %c0_i32_2 = arith.constant 0 : i32
    return %c0_i32, %c0_i32_0, %c0_i32_1 : i32, i32, i32
  }
  func.func @transform_11(%arg0: i32) -> (i32, i32, i32) {
    %c0_i32 = arith.constant 0 : i32
    %c0_i32_0 = arith.constant 0 : i32
    %c0_i32_1 = arith.constant 0 : i32
    %c0_i32_2 = arith.constant 0 : i32
    return %c0_i32, %c0_i32_0, %c0_i32_1 : i32, i32, i32
  }
  func.func @transform_12(%arg0: i32) -> (i32, i32) {
    %c0_i32 = arith.constant 0 : i32
    %c0_i32_0 = arith.constant 0 : i32
    %c0_i32_1 = arith.constant 0 : i32
    return %c0_i32, %c0_i32_0 : i32, i32
  }
  func.func @transform_13(%arg0: i32) -> (i32, i32) {
    %c0_i32 = arith.constant 0 : i32
    %c0_i32_0 = arith.constant 0 : i32
    %c0_i32_1 = arith.constant 0 : i32
    return %c0_i32, %c0_i32_0 : i32, i32
  }
  func.func @transform_14(%arg0: i32) -> (i32, i32) {
    %c0_i32 = arith.constant 0 : i32
    %c0_i32_0 = arith.constant 0 : i32
    %c0_i32_1 = arith.constant 0 : i32
    return %c0_i32, %c0_i32_0 : i32, i32
  }
  func.func @transform_15(%arg0: i32) -> (i32, i32) {
    %c0_i32 = arith.constant 0 : i32
    %c0_i32_0 = arith.constant 0 : i32
    %c0_i32_1 = arith.constant 0 : i32
    return %c0_i32, %c0_i32_0 : i32, i32
  }
  func.func @transform_16(%arg0: i32) -> (i32, i32) {
    %c0_i32 = arith.constant 0 : i32
    %c0_i32_0 = arith.constant 0 : i32
    %c0_i32_1 = arith.constant 0 : i32
    return %c0_i32, %c0_i32_0 : i32, i32
  }
  func.func @transform_17(%arg0: i32) -> (i32, i32) {
    %c0_i32 = arith.constant 0 : i32
    %c0_i32_0 = arith.constant 0 : i32
    %c0_i32_1 = arith.constant 0 : i32
    return %c0_i32, %c0_i32_0 : i32, i32
  }
  func.func @transform_18(%arg0: i32) -> (i32, i32) {
    %c0_i32 = arith.constant 0 : i32
    %c0_i32_0 = arith.constant 0 : i32
    %c0_i32_1 = arith.constant 0 : i32
    return %c0_i32, %c0_i32_0 : i32, i32
  }
  func.func @transform_19(%arg0: i32) -> (i32, i32) {
    %c0_i32 = arith.constant 0 : i32
    %c0_i32_0 = arith.constant 0 : i32
    %c0_i32_1 = arith.constant 0 : i32
    return %c0_i32, %c0_i32_0 : i32, i32
  }
  func.func @transform_20(%arg0: i32) -> (i32, i32) {
    %c0_i32 = arith.constant 0 : i32
    %c0_i32_0 = arith.constant 0 : i32
    %c0_i32_1 = arith.constant 0 : i32
    return %c0_i32, %c0_i32_0 : i32, i32
  }
  func.func @transform_21(%arg0: i32) -> (i32, i32) {
    %c0_i32 = arith.constant 0 : i32
    %c0_i32_0 = arith.constant 0 : i32
    %c0_i32_1 = arith.constant 0 : i32
    return %c0_i32, %c0_i32_0 : i32, i32
  }
  func.func @transform_22(%arg0: i32) -> (i32, i32) {
    %c0_i32 = arith.constant 0 : i32
    %c0_i32_0 = arith.constant 0 : i32
    %c0_i32_1 = arith.constant 0 : i32
    return %c0_i32, %c0_i32_0 : i32, i32
  }
  func.func @transform_23(%arg0: i32) -> (i32, i32, i32) {
    %c0_i32 = arith.constant 0 : i32
    %c0_i32_0 = arith.constant 0 : i32
    %c0_i32_1 = arith.constant 0 : i32
    return %arg0, %c0_i32, %c0_i32_0 : i32, i32, i32
  }
}

</mosaic_0001>

<bundles_post_ra>
// kernel: tpu_custom_call.1
= control target key start
LH: loop header
LB: loop body
LE: loop exit
PB: predicated region body
PF: predicated region fallthrough
CT: control target
= control target key end

     0   :  { %s4398_s0 = inlined_call_operand.vmem [shape: f32[4,8,32], index: 0, kind: input, shape index: {}]   ;;  %s4399_s1 = inlined_call_operand.vmem [shape: f32[4,12,32], index: 1, kind: input, shape index: {}]   ;;  %s4400_s2 = inlined_call_operand.vmem [shape: f32[8,8], index: 2, kind: input, shape index: {}]   ;;  %s4401_s3 = inlined_call_operand.vmem [shape: f32[4,1,8], index: 3, kind: input, shape index: {}]   ;;  %s4402_s4 = inlined_call_operand.vmem [shape: f32[4,1,12], index: 4, kind: input, shape index: {}]   ;;  %s4403_s5 = inlined_call_operand.vmem [shape: bf16[4,32,24], index: 5, kind: input, shape index: {}]   ;;  %s4404_s6 = inlined_call_operand.vmem [shape: f32[4,1,24], index: 6, kind: input, shape index: {}]   ;;  %s4405_s7 = inlined_call_operand.vmem [shape: bf16[4,8,32], index: 7, kind: input, shape index: {}]   ;;  %s4406_s8 = inlined_call_operand.vmem [shape: f32[1,32], index: 8, kind: input, shape index: {}]   ;;  %s4407_s9 = inlined_call_operand.vmem [shape: bf16[4,32,24], index: 9, kind: input, shape index: {}]   ;;  %s4408_s10 = inlined_call_operand.vmem [shape: f32[4,1,24], index: 10, kind: input, shape index: {}]   ;;  %s4409_s11 = inlined_call_operand.vmem [shape: bf16[4,8,32], index: 11, kind: input, shape index: {}]   ;;  %s4410_s12 = inlined_call_operand.vmem [shape: f32[1,32], index: 12, kind: input, shape index: {}]   ;;  %s4411_s13 = inlined_call_operand.vmem [shape: bf16[32,64], index: 13, kind: input, shape index: {}]   ;;  %s4412_s14 = inlined_call_operand.vmem [shape: f32[1,64], index: 14, kind: input, shape index: {}]   ;;  %s4413_s15 = inlined_call_operand.vmem [shape: bf16[64,32], index: 15, kind: input, shape index: {}]   ;;  %s4414_s16 = inlined_call_operand.vmem [shape: f32[1,32], index: 16, kind: input, shape index: {}]   ;;  %s4415_s17 = inlined_call_operand.vmem [shape: f32[1,32], index: 17, kind: input, shape index: {}]   ;;  %s4416_s18 = inlined_call_operand.vmem [shape: f32[1,32], index: 18, kind: input, shape index: {}]   ;;  %s4417_s19 = inlined_call_operand.vmem [shape: f32[1,32], index: 19, kind: input, shape index: {}]   ;;  %s4418_s20 = inlined_call_operand.vmem [shape: f32[1,32], index: 20, kind: input, shape index: {}]   ;;  %s4419_s21 = inlined_call_operand.vmem [shape: f32[1,32], index: 21, kind: input, shape index: {}]   ;;  %s4420_s22 = inlined_call_operand.vmem [shape: f32[1,32], index: 22, kind: input, shape index: {}]   ;;  %s4421_s23 = inlined_call_operand.hbm [shape: f32[4,8,32], index: 23, kind: output, shape index: {}]  }
   0x1   :  { %4432 = sst [smem:[#allocation9_spill]] %s4398_s0 }
   0x2   :  { %4433 = sst [smem:[#allocation10_spill]] %s4399_s1 }
   0x3   :  { %4434 = sst [smem:[#allocation11_spill]] %s4400_s2 }
   0x4   :  { %4435 = sst [smem:[#allocation12_spill]] %s4401_s3 }
   0x5   :  { %4436 = sst [smem:[#allocation13_spill]] %s4402_s4 }
   0x6   :  { %4437 = sst [smem:[#allocation14_spill]] %s4403_s5 }
   0x7   :  { %4438 = sst [smem:[#allocation15_spill]] %s4404_s6 }
   0x8   :  { %4439 = sst [smem:[#allocation16_spill]] %s4405_s7 }
   0x9   :  { %4440 = sst [smem:[#allocation17_spill]] %s4406_s8 }
   0xa   :  { %4441 = sst [smem:[#allocation18_spill]] %s4407_s9 }
   0xb   :  { %4442 = sst [smem:[#allocation19_spill]] %s4408_s10 }
   0xc   :  { %4443 = sst [smem:[#allocation20_spill]] %s4409_s11 }
   0xd   :  { %4444 = sst [smem:[#allocation21_spill]] %s4410_s12 }
   0xe   :  { %28 = vsyncpa [#allocation3], 0 }
   0xf   :  { %30 = vsyncpa [#allocation3 + $0x1], 0  ;;  %s3859_s4 = smov 0   ;;  %s3861_s30 = smov 0  }
  0x10   :  { %s3863_s24 = smov 0   ;;  %s3865_s25 = smov 0  }
  0x11 LB: > { %4445 = sst [smem:[#allocation5_spill]] %s3728_s24  ;;  %s3880_s5 = sadd.s32 4294967295, %s3732_s25   ;;  %s3732_s25 = sphi %s3865_s25, %s4466_s25   ;;  %s3728_s24 = sphi %s3863_s24, %s4468_s24   ;;  %s3724_s30 = sphi %s3861_s30, %s4470_s30   ;;  %s3720_s4 = sphi %s3859_s4, %s4469_s4  }
  0x12   : > { %s3124_s1 = sadd.s32 4294967294, %s3732_s25   ;;  %s3884_s26 = sadd.s32 1, %s3732_s25  }
  0x13   : > { %4446 = sst [smem:[#allocation6_spill]] %s3884_s26  ;;  %s546_s2 = sadd.s32 1, %s3728_s24 }
  0x14   : > { %s543_s6 = ssub.s32 %s3732_s25, %s3884_s26  ;;  %p556_p0 = scmp.ne.s32.totalorder %s3728_s24, %s3724_s30 }
  0x15   : > { %p544_p1 = scmp.eq.s32.totalorder %s543_s6, 0  ;;  %p557_p2 = scmp.eq.s32.totalorder %s3880_s5, 3 }
  0x16   : > { %p562_p3 = scmp.ne.s32.totalorder %s3724_s30, %s3720_s4  ;;  %p563_p4 = scmp.eq.s32.totalorder %s3124_s1, 3 }
  0x17   : > { %s3895_s27 = scalar_select %p544_p1, %s3728_s24, %s546_s2  }
  0x18   : > { %p3897_p5 = por %p557_p2, %p556_p0  ;;  %p3901_p6 = por %p563_p4, %p562_p3 }
  0x19   : > { %4447 = sst [smem:[#allocation7_spill]] %s3895_s27  ;;  %p3127_p7 = scmp.ge.s32.totalorder %s3732_s25, 1 }
  0x1a   : > { %s4449_s28 = scalar_select %p3901_p6, 1, 0 }
  0x1b   : > { %p665_p8 = scmp.lt.s32.totalorder %s3732_s25, 5 }
  0x1c   : > { %4450 = sst [smem:[#allocation8_spill]] %s4449_s28 }
  0x1d   : > { %p666_p9 = pnand %p3127_p7, %p665_p8 }
  0x1e   : > { %s4451_s0 = sld [smem:[#allocation14_spill]] (!%p666_p9)  ;;  %p739_p10 = scmp.lt.s32.totalorder (!%p666_p9), %s3880_s5, 3 }
  0x1f   : > { %669 = sbr.rel (%p666_p9) target bundleno = 8975 (0x230f), region = 112  ;;  %s4452_s24 = sld [smem:[#allocation9_spill]] (!%p666_p9) }
  0x20   : > { %s4453_s28 = sld [smem:[#allocation15_spill]] (!%p666_p9)  ;;  %s736_s2 = sand.u32 (!%p666_p9), 1, %s3724_s30  }
  0x21   : > { %s4456_s26 = sld [smem:[#allocation16_spill]] (!%p666_p9) }
  0x22   : > { %s4458_s8 = sld [smem:[#allocation17_spill]] (!%p666_p9) }
  0x23   : > { %s4459_s9 = sld [smem:[#allocation18_spill]] (!%p666_p9) }
  0x24   : > { %v3612_v0 = vld [vmem:[%s4451_s0 + $0x8] sm:$0xff]   ;;  %v3734_v1 = vmov 0.0   ;;  %v3613_v2 = vld [vmem:[%s4451_s0] sm:$0xff]   ;;  %vm3735_vm0 = vmmov 0   ;;  %s3922_s6 = scalar_select %p739_p10, %s3880_s5, 3  ;;  %vm818_vm1 = vcmask 261120  }
  0x25   : > { %3309 = vmatprep.subr.bf16.mxu0 %v3734_v1  ;;  %3317 = vmatprep.subr.bf16.mxu1 %v3734_v1  ;;  %vm866_vm2 = vcmask 64512   ;;  %vm930_vm3 = vcmask 1043456   ;;  %v3614_v33 = vld [vmem:[%s4451_s0 + $0x18] sm:$0xff]   ;;  %v3615_v35 = vld [vmem:[%s4451_s0 + $0x10] sm:$0xff]   ;;  %s4460_s10 = sld [smem:[#allocation19_spill]]  ;;  %vm1902_vm4 = vcmask 97280  }
  0x26   : > { %3310 = vmatpush3.bf16.msra.mxu0 %v3612_v0  ;;  %3313 = vmatprep.mubr.msk.bf16.mxu0 %vm3735_vm0, %v3734_v1  ;;  %s3129_s29 = sshll.u32 %s3922_s6, 3  ;;  %v3134_v5 = vld [vmem:[%s4453_s28] ss:$0 sm:$0xff]  ;;  %v3141_v43 = vld [vmem:[%s4453_s28 + $0x1] ss:$0 sm:$0xff]  ;;  %s4462_s27 = sld [smem:[#allocation13_spill]] }
  0x27   : > { %3311 = vmatprep.subr.bf16.mxu0 %v3734_v1  ;;  %3319 = vmatprep.mubr.msk.bf16.mxu1 %vm3735_vm0, %v3734_v1  ;;  %s742_s1 = scalar_lea.vmem %s4452_s24, %s3129_s29  ;;  %s4429_s24 = smov 120   ;;  %v788_v36 = vld [vmem:[%s4456_s26] sm:$0xf]  ;;  %vm1921_vm5 = vcmask 1045504   ;;  %vm2946_vm6 = vcmask 523264  }
  0x28   : > { %v3929_v3 = vld [vmem:[%s742_s1] sm:$0xff]  ;;  %s4454_s29 = sld [smem:[#allocation12_spill]]  ;;  %v979_v37 = vsel %vm930_vm3, %v788_v36, 0  ;;  %s3216_s1 = sshll.u32 %s3922_s6, 4 }
  0x29   : > { %v3933_v4 = vpack.c.bf16 %v3929_v3, %v3929_v3  ;;  %s4463_s11 = sld [smem:[#allocation20_spill]] }
  0x2a   : > { %3312 = vmatpush3.bf16.msra.mxu0 %v3613_v2  ;;  %s4464_s12 = sld [smem:[#allocation21_spill]] }
  0x2b   : > { %3323 = vmatprep.subr.bf16.mxu0 %v3734_v1 }
  0x2d   : > { %3314 = vmatmul.mubr.msk.bf16.vlgmr.msra.gmra.mxu0 %vm818_vm1, %v3933_v4 }
  0x2e   : > { %3325 = vmatprep.mubr.msk.bf16.mxu0 %vm3735_vm0, %v3734_v1  ;;  %s750_s3 = scalar_lea.vmem %s4454_s29, %s3922_s6 }
  0x2f   : > { %v3132_v15 = vld [vmem:[%s750_s3] ss:$0 sm:$0xff]  ;;  %s4457_s3 = smov 120  }
  0xed   : > { %v856_v6 = vpop.f32.mrf.mxu0 }
  0xee   : > { %v857_v7 = vadd.f32 %v3134_v5, %v856_v6 }
  0xef   : > { %v3315_v8 = vpop.f32.mrf.mxu0 }
  0xf0   : > { %v862_v9 = vpack.c.bf16 %v857_v7, %v857_v7 }
  0xf1   : > { %v859_v10 = vpop.f32.mrf.mxu0 }
  0xf2   : > { %864 = vrot.lane.b32.xlu0 %v862_v9, %s4429_s24  ;;  %s4455_s24 = sld [smem:[#allocation11_spill]] }
  0xf3   : > { %v3316_v11 = vpop.f32.mrf.mxu0 }
  0xf4   : > { %v3616_v11 = vld [vmem:[%s4451_s0 + $0x28] sm:$0xff]  }
  0xf8   : > { %v758_v14 = vld [vmem:[%s4455_s24] sm:$0xff]  ;;  %s3737_s24 = smov 112  }
  0xf9   : > { %v3955_v16 = vadd.f32 %v3132_v15, %v758_v14  ;;  %v789_v14 = vld [vmem:[%s4456_s26 + $0x4] sm:$0xf] }
  0xfa   : > { %v1195_v15 = vsel %vm930_vm3, %v789_v14, 0 }
 0x164   : > { %v865_v12 = vpop.permute.xlu0 %864 }
 0x165   : > { %v871_v13 = vsel %vm866_vm2, %v865_v12, 0 }
 0x166   : > { %3318 = vmatpush3.bf16.xpose.msra.mxu1 %v871_v13  ;;  %v3617_v13 = vld [vmem:[%s4451_s0 + $0x20] sm:$0xff]  }
 0x167   : > { %3329 = vmatprep.subr.bf16.mxu1 %v3734_v1 }
 0x16d   : > { %3320 = vmatmul.mubr.msk.bf16.vlgmr.msra.gmra.mxu1 %vm866_vm2, %v862_v9 }
 0x16e   : > { %3331 = vmatprep.mubr.msk.bf16.mxu1 %vm3735_vm0, %v3734_v1  ;;  %3330 = vmatpush3.bf16.msra.mxu1 %v979_v37 }
 0x16f   : > { %3343 = vmatprep.subr.bf16.mxu1 %v3734_v1 }
 0x22d   : > { %v907_v17 = vpop.f32.mrf.mxu1 }
 0x22e   : > { %v908_v18 = vadd.f32 %v907_v17, %v3955_v16 }
 0x22f   : > { %v3321_v19 = vpop.f32.mrf.mxu1 }
 0x230   : > { %v913_v20 = vsel %vm866_vm2, %v908_v18, -inf }
 0x231   : > { %914 = vmax.xlane.f32.xlu0 %v913_v20  ;;  %v910_v21 = vpop.f32.mrf.mxu1 }
 0x233   : > { %v3322_v22 = vpop.f32.mrf.mxu1 }
 0x234   : > { %v3148_v22 = vld [vmem:[%s4453_s28 + $0x2] ss:$0 sm:$0xff] }
 0x2ba   : > { %v915_v23 = vpop.xlane.xlu0 %914 }
 0x2bb   : > { %v916_v24 = vsub.f32 %v908_v18, %v915_v23 }
 0x2bd   : > { %v917_v25 = vmul.f32 1.442695, %v916_v24 }
 0x2bf   : > { %3634 = vpow2.f32 %v917_v25 }
 0x2cc   : > { %v3635_v26 = vpop.eup %3634 }
 0x2cd   : > { %v919_v27 = vsel %vm866_vm2, %v3635_v26, 0.0 }
 0x2ce   : > { %920 = vadd.xlane.f32.xlu1 %v919_v27 }
 0x2df   : > { %925 = vrot.lane.b32.xlu1 %v862_v9, %s3737_s24 }
 0x357   : > { %v921_v28 = vpop.xlane.xlu1 %920 }
 0x358   : > { %3636 = vrcp.f32 %v921_v28 }
 0x35b   : > { %v926_v29 = vpop.permute.xlu1 %925 }
 0x35c   : > { %v932_v30 = vsel %vm930_vm3, %v926_v29, 0 }
 0x35d   : > { %3324 = vmatpush3.bf16.msra.mxu0 %v932_v30 }
 0x35e   : > { %3335 = vmatprep.subr.bf16.mxu0 %v3734_v1 }
 0x365   : > { %v3637_v31 = vpop.eup %3636 }
 0x366   : > { %v923_v32 = vmul.f32 %v3637_v31, %v3635_v26  ;;  %v3133_v31 = vld [vmem:[%s4458_s8] ss:$0 sm:$0xff] }
 0x368   : > { %v924_v34 = vpack.c.bf16 %v923_v32, %v923_v32 }
 0x36a   : > { %3326 = vmatmul.mubr.msk.bf16.vlgmr.msra.gmra.mxu0 %vm866_vm2, %v924_v34 }
 0x36b   : > { %3336 = vmatpush3.bf16.msra.mxu0 %v3614_v33  ;;  %3339 = vmatprep.mubr.msk.bf16.mxu0 %vm3735_vm0, %v3734_v1 }
 0x36c   : > { %3337 = vmatprep.subr.bf16.mxu0 %v3734_v1 }
 0x36f   : > { %3338 = vmatpush3.bf16.msra.mxu0 %v3615_v35 }
 0x370   : > { %3349 = vmatprep.subr.bf16.mxu0 %v3734_v1 }
 0x372   : > { %3340 = vmatmul.mubr.msk.bf16.vlgmr.msra.gmra.mxu0 %vm818_vm1, %v3933_v4 }
 0x373   : > { %3351 = vmatprep.mubr.msk.bf16.mxu0 %vm3735_vm0, %v3734_v1 }
 0x42a   : > { %v968_v38 = vpop.f32.mrf.mxu0 }
 0x42b   : > { %v974_v39 = vpack.c.bf16 %v968_v38, %v968_v38 }
 0x42c   : > { %v3327_v40 = vpop.f32.mrf.mxu0 }
 0x42d   : > { %3332 = vmatmul.mubr.msk.bf16.vlgmr.msra.gmra.mxu1 %vm866_vm2, %v974_v39 }
 0x42e   : > { %v971_v41 = vpop.f32.mrf.mxu0  ;;  %3345 = vmatprep.mubr.msk.bf16.mxu1 %vm3735_vm0, %v3734_v1 }
 0x430   : > { %v3328_v42 = vpop.f32.mrf.mxu0 }
 0x432   : > { %v1074_v44 = vpop.f32.mrf.mxu0 }
 0x433   : > { %v1075_v45 = vadd.f32 %v3141_v43, %v1074_v44 }
 0x434   : > { %v3341_v46 = vpop.f32.mrf.mxu0 }
 0x435   : > { %v1080_v47 = vpack.c.bf16 %v1075_v45, %v1075_v45 }
 0x436   : > { %v1077_v48 = vpop.f32.mrf.mxu0 }
 0x437   : > { %1082 = vrot.lane.b32.xlu1 %v1080_v47, %s4457_s3 }
 0x438   : > { %v3342_v49 = vpop.f32.mrf.mxu0 }
 0x4a9   : > { %v1083_v50 = vpop.permute.xlu1 %1082 }
 0x4aa   : > { %v1088_v51 = vsel %vm866_vm2, %v1083_v50, 0 }
 0x4ab   : > { %3344 = vmatpush3.bf16.xpose.msra.mxu1 %v1088_v51 }
 0x4ac   : > { %3355 = vmatprep.subr.bf16.mxu1 %v3734_v1 }
 0x4b2   : > { %3346 = vmatmul.mubr.msk.bf16.vlgmr.msra.gmra.mxu1 %vm866_vm2, %v1080_v47 }
 0x4b3   : > { %3357 = vmatprep.mubr.msk.bf16.mxu1 %vm3735_vm0, %v3734_v1  ;;  %3356 = vmatpush3.bf16.msra.mxu1 %v1195_v15 }
 0x4b4   : > { %3369 = vmatprep.subr.bf16.mxu1 %v3734_v1 }
 0x4ed   : > { %v3995_v52 = vpop.f32.mrf.mxu1 }
 0x4ee   : > { %v1021_v32 = vadd.f32 %v3133_v31, %v3995_v52 }
 0x4ef   : > { %v3333_v53 = vpop.f32.mrf.mxu1 }
 0x4f1   : > { %v1018_v54 = vpop.f32.mrf.mxu1 }
 0x4f2   : > { %v3618_v54 = vld [vmem:[%s4451_s0 + $0x38] sm:$0xff]  }
 0x4f3   : > { %v3334_v55 = vpop.f32.mrf.mxu1 }
 0x572   : > { %v1124_v56 = vpop.f32.mrf.mxu1 }
 0x573   : > { %v1125_v57 = vadd.f32 %v1124_v56, %v3955_v16  ;;  %v3619_v56 = vld [vmem:[%s4451_s0 + $0x30] sm:$0xff]   ;;  %s4461_s0 = sld [smem:[#allocation10_spill]] }
 0x574   : > { %v3347_v58 = vpop.f32.mrf.mxu1 }
 0x575   : > { %v1130_v59 = vsel %vm866_vm2, %v1125_v57, -inf }
 0x576   : > { %1131 = vmax.xlane.f32.xlu1 %v1130_v59  ;;  %v1127_v60 = vpop.f32.mrf.mxu1 }
 0x578   : > { %v3348_v61 = vpop.f32.mrf.mxu1 }
 0x579   : > { %s747_s8 = scalar_lea.vmem %s4461_s0, %s3216_s1  ;;  %s753_s0 = scalar_lea.vmem %s4462_s27, %s3922_s6 }
 0x57a   : > { %s3128_s27 = sshll.u32 %s736_s2, 3  ;;  %s3738_s6 = smov [#allocation2]  }
 0x57b   : > { %s3676_s29 = sshll.u32 %s3738_s6, 4  ;;  %s3677_s29 = int_to_ptr.vmem [resolvable:$false] %s3676_s29 }
 0x5ff   : > { %v1132_v62 = vpop.xlane.xlu1 %1131 }
 0x600   : > { %v1133_v63 = vsub.f32 %v1125_v57, %v1132_v62  ;;  %v790_v57 = vld [vmem:[%s4456_s26 + $0x8] sm:$0xf] }
 0x601   : > { %v1411_v58 = vsel %vm930_vm3, %v790_v57, 0  ;;  %v756_v57 = vld [vmem:[%s747_s8] sm:$0xff] }
 0x602   : > { %v1134_v0 = vmul.f32 1.442695, %v1133_v63  ;;  %v3155_v63 = vld [vmem:[%s4453_s28 + $0x3] ss:$0 sm:$0xff] }
 0x604   : > { %3638 = vpow2.f32 %v1134_v0 }
 0x611   : > { %v3639_v2 = vpop.eup %3638 }
 0x612   : > { %v1136_v5 = vsel %vm866_vm2, %v3639_v2, 0.0 }
 0x613   : > { %1137 = vadd.xlane.f32.xlu0 %v1136_v5 }
 0x629   : > { %1142 = vrot.lane.b32.xlu0 %v1080_v47, %s3737_s24 }
 0x69c   : > { %v1138_v6 = vpop.xlane.xlu0 %1137 }
 0x69d   : > { %3640 = vrcp.f32 %v1138_v6 }
 0x6a0   : > { %v1143_v7 = vpop.permute.xlu0 %1142 }
 0x6a1   : > { %v1148_v8 = vsel %vm930_vm3, %v1143_v7, 0 }
 0x6a2   : > { %3350 = vmatpush3.bf16.msra.mxu0 %v1148_v8 }
 0x6a3   : > { %3361 = vmatprep.subr.bf16.mxu0 %v3734_v1 }
 0x6aa   : > { %v3641_v9 = vpop.eup %3640 }
 0x6ab   : > { %v1140_v10 = vmul.f32 %v3641_v9, %v3639_v2 }
 0x6ad   : > { %v1141_v12 = vpack.c.bf16 %v1140_v10, %v1140_v10 }
 0x6af   : > { %3352 = vmatmul.mubr.msk.bf16.vlgmr.msra.gmra.mxu0 %vm866_vm2, %v1141_v12 }
 0x6b0   : > { %3362 = vmatpush3.bf16.msra.mxu0 %v3616_v11  ;;  %3365 = vmatprep.mubr.msk.bf16.mxu0 %vm3735_vm0, %v3734_v1 }
 0x6b1   : > { %3363 = vmatprep.subr.bf16.mxu0 %v3734_v1 }
 0x6b4   : > { %3364 = vmatpush3.bf16.msra.mxu0 %v3617_v13 }
 0x6b5   : > { %3375 = vmatprep.subr.bf16.mxu0 %v3734_v1 }
 0x6b7   : > { %3366 = vmatmul.mubr.msk.bf16.vlgmr.msra.gmra.mxu0 %vm818_vm1, %v3933_v4 }
 0x6b8   : > { %3377 = vmatprep.mubr.msk.bf16.mxu0 %vm3735_vm0, %v3734_v1 }
 0x76f   : > { %v1184_v17 = vpop.f32.mrf.mxu0 }
 0x770   : > { %v1190_v18 = vpack.c.bf16 %v1184_v17, %v1184_v17 }
 0x771   : > { %v3353_v19 = vpop.f32.mrf.mxu0 }
 0x772   : > { %3358 = vmatmul.mubr.msk.bf16.vlgmr.msra.gmra.mxu1 %vm866_vm2, %v1190_v18 }
 0x773   : > { %v1187_v20 = vpop.f32.mrf.mxu0  ;;  %3371 = vmatprep.mubr.msk.bf16.mxu1 %vm3735_vm0, %v3734_v1 }
 0x775   : > { %v3354_v21 = vpop.f32.mrf.mxu0 }
 0x777   : > { %v1290_v23 = vpop.f32.mrf.mxu0 }
 0x778   : > { %v1291_v24 = vadd.f32 %v3148_v22, %v1290_v23 }
 0x779   : > { %v3367_v25 = vpop.f32.mrf.mxu0 }
 0x77a   : > { %v1296_v26 = vpack.c.bf16 %v1291_v24, %v1291_v24 }
 0x77b   : > { %v1293_v27 = vpop.f32.mrf.mxu0 }
 0x77c   : > { %1298 = vrot.lane.b32.xlu0 %v1296_v26, %s4457_s3 }
 0x77d   : > { %v3368_v28 = vpop.f32.mrf.mxu0 }
 0x7ee   : > { %v1299_v29 = vpop.permute.xlu0 %1298 }
 0x7ef   : > { %v1304_v30 = vsel %vm866_vm2, %v1299_v29, 0 }
 0x7f0   : > { %3370 = vmatpush3.bf16.xpose.msra.mxu1 %v1304_v30 }
 0x7f1   : > { %3381 = vmatprep.subr.bf16.mxu1 %v3734_v1 }
 0x7f7   : > { %3372 = vmatmul.mubr.msk.bf16.vlgmr.msra.gmra.mxu1 %vm866_vm2, %v1296_v26 }
 0x7f8   : > { %3383 = vmatprep.mubr.msk.bf16.mxu1 %vm3735_vm0, %v3734_v1  ;;  %3382 = vmatpush3.bf16.msra.mxu1 %v1411_v58  ;;  %v757_v58 = vld [vmem:[%s747_s8 + $0x8] sm:$0xf] }
 0x7f9   : > { %3395 = vmatprep.subr.bf16.mxu1 %v3734_v1 }
 0x832   : > { %v1231_v33 = vpop.f32.mrf.mxu1 }
 0x833   : > { %v4039_v34 = vadd.f32 %v1231_v33, %v1021_v32 }
 0x834   : > { %v3359_v35 = vpop.f32.mrf.mxu1 }
 0x836   : > { %v1234_v36 = vpop.f32.mrf.mxu1 }
 0x838   : > { %v3360_v37 = vpop.f32.mrf.mxu1 }
 0x8b7   : > { %v1340_v38 = vpop.f32.mrf.mxu1 }
 0x8b8   : > { %v1341_v39 = vadd.f32 %v1340_v38, %v3955_v16 }
 0x8b9   : > { %v3373_v40 = vpop.f32.mrf.mxu1 }
 0x8ba   : > { %v1346_v41 = vsel %vm866_vm2, %v1341_v39, -inf  ;;  %v3620_v40 = vld [vmem:[%s4459_s9 + $0x8] sm:$0xff]  }
 0x8bb   : > { %1347 = vmax.xlane.f32.xlu1 %v1346_v41  ;;  %v1343_v42 = vpop.f32.mrf.mxu1 }
 0x8bd   : > { %v3374_v43 = vpop.f32.mrf.mxu1 }
 0x8cc   : > { %1358 = vrot.lane.b32.xlu1 %v1296_v26, %s3737_s24 }
 0x944   : > { %v1348_v44 = vpop.xlane.xlu1 %1347 }
 0x945   : > { %v1349_v45 = vsub.f32 %v1341_v39, %v1348_v44 }
 0x947   : > { %v1350_v46 = vmul.f32 1.442695, %v1349_v45 }
 0x948   : > { %v1359_v47 = vpop.permute.xlu1 %1358 }
 0x949   : > { %3642 = vpow2.f32 %v1350_v46  ;;  %v1364_v48 = vsel %vm930_vm3, %v1359_v47, 0 }
 0x94a   : > { %3376 = vmatpush3.bf16.msra.mxu0 %v1364_v48  ;;  %v3621_v48 = vld [vmem:[%s4459_s9] sm:$0xff]  }
 0x94b   : > { %3387 = vmatprep.subr.bf16.mxu0 %v3734_v1 }
 0x956   : > { %v3643_v49 = vpop.eup %3642 }
 0x957   : > { %v1352_v50 = vsel %vm866_vm2, %v3643_v49, 0.0 }
 0x958   : > { %1353 = vadd.xlane.f32.xlu0 %v1352_v50 }
 0x9e1   : > { %v1354_v51 = vpop.xlane.xlu0 %1353 }
 0x9e2   : > { %3644 = vrcp.f32 %v1354_v51 }
 0x9ef   : > { %v3645_v52 = vpop.eup %3644 }
 0x9f0   : > { %v1356_v53 = vmul.f32 %v3645_v52, %v3643_v49 }
 0x9f2   : > { %v1357_v55 = vpack.c.bf16 %v1356_v53, %v1356_v53 }
 0x9f4   : > { %3378 = vmatmul.mubr.msk.bf16.vlgmr.msra.gmra.mxu0 %vm866_vm2, %v1357_v55 }
 0x9f5   : > { %3388 = vmatpush3.bf16.msra.mxu0 %v3618_v54  ;;  %3391 = vmatprep.mubr.msk.bf16.mxu0 %vm3735_vm0, %v3734_v1  ;;  %v3165_v54 = vld [vmem:[%s4460_s10] ss:$0 sm:$0xff] }
 0x9f6   : > { %3389 = vmatprep.subr.bf16.mxu0 %v3734_v1 }
 0x9f9   : > { %3390 = vmatpush3.bf16.msra.mxu0 %v3619_v56 }
 0x9fa   : > { %3401 = vmatprep.subr.bf16.mxu0 %v3734_v1 }
 0x9fc   : > { %3392 = vmatmul.mubr.msk.bf16.vlgmr.msra.gmra.mxu0 %vm818_vm1, %v3933_v4 }
 0x9fd   : > { %3403 = vmatprep.mubr.msk.bf16.mxu0 %vm3735_vm0, %v3734_v1 }
 0xab4   : > { %v1400_v59 = vpop.f32.mrf.mxu0 }
 0xab5   : > { %v1406_v60 = vpack.c.bf16 %v1400_v59, %v1400_v59 }
 0xab6   : > { %v3379_v61 = vpop.f32.mrf.mxu0 }
 0xab7   : > { %3384 = vmatmul.mubr.msk.bf16.vlgmr.msra.gmra.mxu1 %vm866_vm2, %v1406_v60  ;;  %v4119_v61 = vpack.c.bf16 %v757_v58, %v756_v57 }
 0xab8   : > { %v1403_v62 = vpop.f32.mrf.mxu0  ;;  %3397 = vmatprep.mubr.msk.bf16.mxu1 %vm3735_vm0, %v3734_v1 }
 0xaba   : > { %v3380_v4 = vpop.f32.mrf.mxu0 }
 0xabb   : > { %v3162_v4 = vld [vmem:[%s4415_s17] ss:$0 sm:$0xff] }
 0xabc   : > { %v1506_v0 = vpop.f32.mrf.mxu0 }
 0xabd   : > { %v1507_v2 = vadd.f32 %v3155_v63, %v1506_v0  ;;  %v3163_v0 = vld [vmem:[%s4416_s18] ss:$0 sm:$0xff] }
 0xabe   : > { %v3393_v5 = vpop.f32.mrf.mxu0 }
 0xabf   : > { %v1512_v6 = vpack.c.bf16 %v1507_v2, %v1507_v2 }
 0xac0   : > { %v1509_v7 = vpop.f32.mrf.mxu0 }
 0xac1   : > { %1514 = vrot.lane.b32.xlu1 %v1512_v6, %s4457_s3 }
 0xac2   : > { %v3394_v8 = vpop.f32.mrf.mxu0 }
 0xb33   : > { %v1515_v9 = vpop.permute.xlu1 %1514 }
 0xb34   : > { %v1520_v10 = vsel %vm866_vm2, %v1515_v9, 0 }
 0xb35   : > { %3396 = vmatpush3.bf16.xpose.msra.mxu1 %v1520_v10 }
 0xb36   : > { %3407 = vmatprep.subr.bf16.mxu1 %v3734_v1 }
 0xb3c   : > { %3398 = vmatmul.mubr.msk.bf16.vlgmr.msra.gmra.mxu1 %vm866_vm2, %v1512_v6 }
 0xb3d   : > { %3409 = vmatprep.mubr.msk.bf16.mxu1 %vm3735_vm0, %v3734_v1 }
 0xb77   : > { %v1447_v11 = vpop.f32.mrf.mxu1 }
 0xb78   : > { %v1453_v12 = vadd.f32 %v1447_v11, %v4039_v34 }
 0xb79   : > { %v3385_v13 = vpop.f32.mrf.mxu1 }
 0xb7b   : > { %v1450_v14 = vpop.f32.mrf.mxu1 }
 0xb7d   : > { %v3386_v15 = vpop.f32.mrf.mxu1 }
 0xbfc   : > { %v1556_v17 = vpop.f32.mrf.mxu1 }
 0xbfd   : > { %v1557_v18 = vadd.f32 %v1556_v17, %v3955_v16  ;;  %v791_v16 = vld [vmem:[%s4456_s26 + $0xc] sm:$0xf] }
 0xbfe   : > { %v3399_v19 = vpop.f32.mrf.mxu1  ;;  %v1627_v28 = vsel %vm930_vm3, %v791_v16, 0 }
 0xbff   : > { %v1562_v20 = vsel %vm866_vm2, %v1557_v18, -inf  ;;  %3408 = vmatpush3.bf16.msra.mxu1 %v1627_v28 }
 0xc00   : > { %1563 = vmax.xlane.f32.xlu1 %v1562_v20  ;;  %v1559_v21 = vpop.f32.mrf.mxu1  ;;  %3421 = vmatprep.subr.bf16.mxu1 %v3734_v1 }
 0xc02   : > { %v3400_v22 = vpop.f32.mrf.mxu1 }
 0xc11   : > { %1797 = vrot.lane.b32.xlu1 %v3620_v40, %s4457_s3 }
 0xc89   : > { %v1564_v23 = vpop.xlane.xlu1 %1563 }
 0xc8a   : > { %v1565_v24 = vsub.f32 %v1557_v18, %v1564_v23  ;;  %v4151_v23 = vld [vmem:[%s753_s0] ss:$0 sm:$0xff] }
 0xc8c   : > { %v1566_v25 = vmul.f32 1.442695, %v1565_v24 }
 0xc8d   : > { %v1798_v49 = vpop.permute.xlu1 %1797 }
 0xc8e   : > { %3646 = vpow2.f32 %v1566_v25 }
 0xc9b   : > { %v3647_v26 = vpop.eup %3646 }
 0xc9c   : > { %v1568_v27 = vsel %vm866_vm2, %v3647_v26, 0.0 }
 0xc9d   : > { %1569 = vadd.xlane.f32.xlu0 %v1568_v27 }
 0xcb3   : > { %1574 = vrot.lane.b32.xlu0 %v1512_v6, %s3737_s24  ;;  %s3213_s24 = sshll.u32 %s3880_s5, 7  ;;  %s3678_s5 = scalar_lea.vmem %s3677_s29, 256 }
 0xd26   : > { %v1570_v29 = vpop.xlane.xlu0 %1569 }
 0xd27   : > { %3648 = vrcp.f32 %v1570_v29 }
 0xd2a   : > { %v1575_v30 = vpop.permute.xlu0 %1574 }
 0xd2b   : > { %v1580_v31 = vsel %vm930_vm3, %v1575_v30, 0 }
 0xd2c   : > { %3402 = vmatpush3.bf16.msra.mxu0 %v1580_v31 }
 0xd2d   : > { %3413 = vmatprep.subr.bf16.mxu0 %v3734_v1 }
 0xd34   : > { %v3649_v32 = vpop.eup %3648 }
 0xd35   : > { %v1572_v33 = vmul.f32 %v3649_v32, %v3647_v26 }
 0xd37   : > { %v1573_v34 = vpack.c.bf16 %v1572_v33, %v1572_v33 }
 0xd39   : > { %3404 = vmatmul.mubr.msk.bf16.vlgmr.msra.gmra.mxu0 %vm866_vm2, %v1573_v34  ;;  %v3622_v34 = vld [vmem:[%s4459_s9 + $0x18] sm:$0xff]  }
 0xd3a   : > { %3417 = vmatprep.mubr.msk.bf16.mxu0 %vm3735_vm0, %v3734_v1  ;;  %3414 = vmatpush3.bf16.msra.mxu0 %v3620_v40 }
 0xd3b   : > { %3415 = vmatprep.subr.bf16.mxu0 %v3734_v1 }
 0xd3e   : > { %3416 = vmatpush3.bf16.msra.mxu0 %v3621_v48 }
 0xd3f   : > { %3429 = vmatprep.subr.bf16.mxu0 %v3734_v1 }
 0xdf9   : > { %v1616_v35 = vpop.f32.mrf.mxu0 }
 0xdfa   : > { %v1622_v36 = vpack.c.bf16 %v1616_v35, %v1616_v35  ;;  %v3623_v35 = vld [vmem:[%s4459_s9 + $0x10] sm:$0xff]  }
 0xdfb   : > { %v3405_v37 = vpop.f32.mrf.mxu0 }
 0xdfc   : > { %3410 = vmatmul.mubr.msk.bf16.vlgmr.msra.gmra.mxu1 %vm866_vm2, %v1622_v36  ;;  %v1721_v36 = vld [vmem:[%s4463_s11] sm:$0xf] }
 0xdfd   : > { %v1619_v38 = vpop.f32.mrf.mxu0  ;;  %3425 = vmatprep.mubr.msk.bf16.mxu1 %vm3735_vm0, %v3734_v1  ;;  %3422 = vmatpush3.bf16.msra.mxu1 %v1798_v49  ;;  %v1970_v37 = vsel %vm930_vm3, %v1721_v36, 0 }
 0xdfe   : > { %3423 = vmatprep.subr.bf16.mxu1 %v3734_v1 }
 0xdff   : > { %v3406_v39 = vpop.f32.mrf.mxu0 }
 0xebc   : > { %v1663_v41 = vpop.f32.mrf.mxu1 }
 0xebd   : > { %v1669_v42 = vadd.f32 %v1663_v41, %v1453_v12 }
 0xebe   : > { %v3411_v43 = vpop.f32.mrf.mxu1 }
 0xebf   : > { %v1670_v44 = vadd.f32 %v1669_v42, %v3929_v3 }
 0xec0   : > { %v1666_v45 = vpop.f32.mrf.mxu1 }
 0xec1   : > { %v1673_v46 = vsel %vm818_vm1, %v1670_v44, 0.0 }
 0xec2   : > { %1674 = vadd.xlane.f32.xlu0 %v1673_v46  ;;  %v3412_v47 = vpop.f32.mrf.mxu1 }
 0xf4b   : > { %v1675_v50 = vpop.xlane.xlu0 %1674 }
 0xf4c   : > { %v1677_v51 = vmul.f32 0.03125, %v1675_v50 }
 0xf4e   : > { %v1678_v3 = vsub.f32 %v1670_v44, %v1677_v51  ;;  %v3174_v44 = vld [vmem:[%s4460_s10 + $0x1] ss:$0 sm:$0xff] }
 0xf50   : > { %v1679_v52 = vmul.f32 %v1678_v3, %v1678_v3 }
 0xf52   : > { %v1680_v53 = vsel %vm818_vm1, %v1679_v52, 0.0 }
 0xf53   : > { %1681 = vadd.xlane.f32.xlu1 %v1680_v53 }
 0xf64   : > { %1795 = vrot.lane.b32.xlu1 %v3621_v48, %s4457_s3 }
 0xf68   : > { %1801 = vrot.lane.b32.xlu1 %v3165_v54, %s4457_s3 }
 0xfdc   : > { %v1682_v55 = vpop.xlane.xlu1 %1681 }
 0xfdd   : > { %v1683_v56 = vmul.f32 0.03125, %v1682_v55 }
 0xfdf   : > { %v1684_v59 = vadd.f32 1e-05, %v1683_v56 }
 0xfe0   : > { %v1796_v60 = vpop.permute.xlu1 %1795 }
 0xfe1   : > { %3650 = vrsqrt.f32 %v1684_v59  ;;  %3424 = vmatpush3.bf16.msra.mxu1 %v1796_v60 }
 0xfe2   : > { %3435 = vmatprep.subr.bf16.mxu1 %v3734_v1 }
 0xfe4   : > { %3426 = vmatmul.mubr.msk.bf16.vlgmr.msra.gmra.mxu1 %vm818_vm1, %v4119_v61  ;;  %v1802_v8 = vpop.permute.xlu1 %1801 }
 0xfe5   : > { %3437 = vmatprep.mubr.msk.bf16.mxu1 %vm3735_vm0, %v3734_v1 }
 0xfee   : > { %v3651_v62 = vpop.eup %3650 }
 0xfef   : > { %v1686_v63 = vmul.f32 %v3651_v62, %v1678_v3 }
 0xff1   : > { %v1693_v2 = vmul.f32 %v3162_v4, %v1686_v63 }
 0xff3   : > { %v4132_v5 = vadd.f32 %v3163_v0, %v1693_v2 }
 0xff5   : > { %v4136_v6 = vpack.c.bf16 %v4132_v5, %v4132_v5 }
 0xff7   : > { %3418 = vmatmul.mubr.msk.bf16.vlgmr.msra.gmra.mxu0 %vm818_vm1, %v4136_v6 }
 0xff8   : > { %3431 = vmatprep.mubr.msk.bf16.mxu0 %vm3735_vm0, %v3734_v1 }
0x10a4   : > { %v1841_v7 = vpop.f32.mrf.mxu1 }
0x10a5   : > { %v1842_v10 = vadd.f32 %v1841_v7, %v1802_v8 }
0x10a6   : > { %v3427_v9 = vpop.f32.mrf.mxu1 }
0x10a8   : > { %v1844_v11 = vpop.f32.mrf.mxu1 }
0x10a9   : > { %v1845_v12 = vadd.f32 %v1844_v11, %v1802_v8 }
0x10aa   : > { %v3428_v13 = vpop.f32.mrf.mxu1 }
0x10ab   : > { %v1849_v14 = vpack.c.bf16 %v1845_v12, %v1842_v10 }
0x10ad   : > { %v1860_v15 = vsel %vm866_vm2, %v1849_v14, 0 }
0x10ae   : > { %3430 = vmatpush3.bf16.xpose.msra.mxu0 %v1860_v15 }
0x10af   : > { %3441 = vmatprep.subr.bf16.mxu0 %v3734_v1 }
0x10b7   : > { %v1789_v17 = vpop.f32.mrf.mxu0 }
0x10b8   : > { %v1790_v18 = vadd.f32 %v3165_v54, %v1789_v17 }
0x10b9   : > { %v3419_v19 = vpop.f32.mrf.mxu0 }
0x10ba   : > { %v1848_v20 = vpack.c.bf16 %v1790_v18, %v1790_v18 }
0x10bb   : > { %v1792_v21 = vpop.f32.mrf.mxu0 }
0x10bc   : > { %3432 = vmatmul.mubr.msk.bf16.vlgmr.msra.gmra.mxu0 %vm866_vm2, %v1848_v20 }
0x10bd   : > { %v3420_v22 = vpop.f32.mrf.mxu0  ;;  %3443 = vmatprep.mubr.msk.bf16.mxu0 %vm3735_vm0, %v3734_v1  ;;  %3442 = vmatpush3.bf16.msra.mxu0 %v1970_v37 }
0x10be   : > { %3455 = vmatprep.subr.bf16.mxu0 %v3734_v1 }
0x117c   : > { %v1896_v24 = vpop.f32.mrf.mxu0 }
0x117d   : > { %v1897_v25 = vadd.f32 %v4151_v23, %v1896_v24 }
0x117e   : > { %v3433_v26 = vpop.f32.mrf.mxu0 }
0x117f   : > { %v1903_v27 = vsel %vm1902_vm4, %v1897_v25, -inf  ;;  %v3624_v26 = vld [vmem:[%s4459_s9 + $0x28] sm:$0xff]  }
0x1180   : > { %1904 = vmax.xlane.f32.xlu1 %v1903_v27  ;;  %v1899_v16 = vpop.f32.mrf.mxu0  ;;  %v3625_v27 = vld [vmem:[%s4459_s9 + $0x20] sm:$0xff]  }
0x1181   : > { %v1722_v16 = vld [vmem:[%s4463_s11 + $0x4] sm:$0xf] }
0x1182   : > { %v3434_v28 = vpop.f32.mrf.mxu0 }
0x1183   : > { %v2235_v28 = vsel %vm930_vm3, %v1722_v16, 0 }
0x1209   : > { %v1905_v29 = vpop.xlane.xlu1 %1904 }
0x120a   : > { %v1906_v30 = vsub.f32 %v1897_v25, %v1905_v29 }
0x120c   : > { %v1907_v31 = vmul.f32 1.442695, %v1906_v30 }
0x120e   : > { %3652 = vpow2.f32 %v1907_v31 }
0x121b   : > { %v3653_v32 = vpop.eup %3652 }
0x121c   : > { %v1909_v33 = vsel %vm1902_vm4, %v3653_v32, 0.0 }
0x121d   : > { %1910 = vadd.xlane.f32.xlu0 %v1909_v33  ;;  %v3182_v33 = vld [vmem:[%s4460_s10 + $0x2] ss:$0 sm:$0xff] }
0x1233   : > { %1916 = vrot.lane.b32.xlu0 %v1849_v14, %s4457_s3 }
0x1237   : > { %2073 = vrot.lane.b32.xlu0 %v3622_v34, %s4457_s3 }
0x123b   : > { %2071 = vrot.lane.b32.xlu0 %v3623_v35, %s4457_s3 }
0x123f   : > { %2077 = vrot.lane.b32.xlu0 %v3174_v44, %s4457_s3 }
0x12a6   : > { %v1911_v38 = vpop.xlane.xlu0 %1910 }
0x12a7   : > { %3654 = vrcp.f32 %v1911_v38 }
0x12aa   : > { %v1917_v39 = vpop.permute.xlu0 %1916 }
0x12ab   : > { %v1923_v40 = vsel %vm1921_vm5, %v1917_v39, 0 }
0x12ac   : > { %3436 = vmatpush3.bf16.msra.mxu1 %v1923_v40 }
0x12ad   : > { %3447 = vmatprep.subr.bf16.mxu1 %v3734_v1 }
0x12ae   : > { %v2074_v45 = vpop.permute.xlu0 %2073 }
0x12b2   : > { %v2072_v50 = vpop.permute.xlu0 %2071 }
0x12b4   : > { %v3655_v41 = vpop.eup %3654 }
0x12b5   : > { %v1913_v42 = vmul.f32 %v3655_v41, %v3653_v32 }
0x12b6   : > { %v2078_v60 = vpop.permute.xlu0 %2077 }
0x12b7   : > { %v1914_v43 = vpack.c.bf16 %v1913_v42, %v1913_v42 }
0x12b9   : > { %3438 = vmatmul.mubr.msk.bf16.vlgmr.msra.gmra.mxu1 %vm1902_vm4, %v1914_v43 }
0x12ba   : > { %3448 = vmatpush3.bf16.msra.mxu1 %v3622_v34  ;;  %3451 = vmatprep.mubr.msk.bf16.mxu1 %vm3735_vm0, %v3734_v1 }
0x12bb   : > { %3449 = vmatprep.subr.bf16.mxu1 %v3734_v1 }
0x12be   : > { %3450 = vmatpush3.bf16.msra.mxu1 %v3623_v35 }
0x12bf   : > { %3463 = vmatprep.subr.bf16.mxu1 %v3734_v1 }
0x12c1   : > { %3452 = vmatmul.mubr.msk.bf16.vlgmr.msra.gmra.mxu1 %vm818_vm1, %v4136_v6 }
0x12c2   : > { %3465 = vmatprep.mubr.msk.bf16.mxu1 %vm3735_vm0, %v3734_v1 }
0x1379   : > { %v1959_v46 = vpop.f32.mrf.mxu1 }
0x137a   : > { %v1965_v47 = vpack.c.bf16 %v1959_v46, %v1959_v46 }
0x137b   : > { %v3439_v48 = vpop.f32.mrf.mxu1 }
0x137c   : > { %3444 = vmatmul.mubr.msk.bf16.vlgmr.msra.gmra.mxu0 %vm866_vm2, %v1965_v47 }
0x137d   : > { %v1962_v49 = vpop.f32.mrf.mxu1  ;;  %3456 = vmatpush3.bf16.msra.mxu0 %v2074_v45  ;;  %3459 = vmatprep.mubr.msk.bf16.mxu0 %vm3735_vm0, %v3734_v1  ;;  %v3164_v45 = vld [vmem:[%s4464_s12] ss:$0 sm:$0xff]  ;;  %s3022_s12 = scalar_lea.sflag [#allocation3], %s736_s2 }
0x137e   : > { %3457 = vmatprep.subr.bf16.mxu0 %v3734_v1 }
0x137f   : > { %v3440_v51 = vpop.f32.mrf.mxu1 }
0x1381   : > { %v2065_v3 = vpop.f32.mrf.mxu1  ;;  %3458 = vmatpush3.bf16.msra.mxu0 %v2072_v50 }
0x1382   : > { %3469 = vmatprep.subr.bf16.mxu0 %v3734_v1  ;;  %v2066_v9 = vadd.f32 %v3174_v44, %v2065_v3 }
0x1383   : > { %v3453_v52 = vpop.f32.mrf.mxu1 }
0x1384   : > { %3460 = vmatmul.mubr.msk.bf16.vlgmr.msra.gmra.mxu0 %vm818_vm1, %v4119_v61  ;;  %v2121_v10 = vpack.c.bf16 %v2066_v9, %v2066_v9 }
0x1385   : > { %v2068_v53 = vpop.f32.mrf.mxu1  ;;  %3471 = vmatprep.mubr.msk.bf16.mxu0 %vm3735_vm0, %v3734_v1 }
0x1387   : > { %v3454_v54 = vpop.f32.mrf.mxu1 }
0x143c   : > { %v4194_v55 = vpop.f32.mrf.mxu0 }
0x143d   : > { %v2012_v46 = vadd.f32 %v3164_v45, %v4194_v55 }
0x143e   : > { %v3445_v56 = vpop.f32.mrf.mxu0 }
0x1440   : > { %v2009_v57 = vpop.f32.mrf.mxu0 }
0x1442   : > { %v3446_v58 = vpop.f32.mrf.mxu0 }
0x1444   : > { %v2114_v59 = vpop.f32.mrf.mxu0 }
0x1445   : > { %v2115_v63 = vadd.f32 %v2114_v59, %v2078_v60 }
0x1446   : > { %v3461_v62 = vpop.f32.mrf.mxu0 }
0x1448   : > { %v2117_v4 = vpop.f32.mrf.mxu0 }
0x1449   : > { %v2118_v0 = vadd.f32 %v2117_v4, %v2078_v60 }
0x144a   : > { %v3462_v2 = vpop.f32.mrf.mxu0 }
0x144b   : > { %v2122_v7 = vpack.c.bf16 %v2118_v0, %v2115_v63 }
0x144d   : > { %v2127_v8 = vsel %vm866_vm2, %v2122_v7, 0 }
0x144e   : > { %3464 = vmatpush3.bf16.xpose.msra.mxu1 %v2127_v8 }
0x144f   : > { %3475 = vmatprep.subr.bf16.mxu1 %v3734_v1 }
0x1455   : > { %3466 = vmatmul.mubr.msk.bf16.vlgmr.msra.gmra.mxu1 %vm866_vm2, %v2121_v10 }
0x1456   : > { %3477 = vmatprep.mubr.msk.bf16.mxu1 %vm3735_vm0, %v3734_v1  ;;  %3476 = vmatpush3.bf16.msra.mxu1 %v2235_v28 }
0x1457   : > { %3489 = vmatprep.subr.bf16.mxu1 %v3734_v1 }
0x1515   : > { %v2163_v11 = vpop.f32.mrf.mxu1 }
0x1516   : > { %v2164_v12 = vadd.f32 %v4151_v23, %v2163_v11 }
0x1517   : > { %v3467_v13 = vpop.f32.mrf.mxu1 }
0x1518   : > { %v2169_v14 = vsel %vm1902_vm4, %v2164_v12, -inf }
0x1519   : > { %2170 = vmax.xlane.f32.xlu1 %v2169_v14  ;;  %v2166_v15 = vpop.f32.mrf.mxu1  ;;  %v3626_v14 = vld [vmem:[%s4459_s9 + $0x38] sm:$0xff]  }
0x151a   : > { %v3627_v15 = vld [vmem:[%s4459_s9 + $0x30] sm:$0xff]  }
0x151b   : > { %v3468_v17 = vpop.f32.mrf.mxu1 }
0x151c   : > { %v1723_v17 = vld [vmem:[%s4463_s11 + $0x8] sm:$0xf] }
0x152a   : > { %2182 = vrot.lane.b32.xlu1 %v2122_v7, %s4457_s3 }
0x152e   : > { %2338 = vrot.lane.b32.xlu1 %v3624_v26, %s4457_s3 }
0x1532   : > { %2336 = vrot.lane.b32.xlu1 %v3625_v27, %s4457_s3 }
0x1536   : > { %2342 = vrot.lane.b32.xlu1 %v3182_v33, %s4457_s3 }
0x15a2   : > { %v2171_v18 = vpop.xlane.xlu1 %2170 }
0x15a3   : > { %v2172_v19 = vsub.f32 %v2164_v12, %v2171_v18  ;;  %v2500_v18 = vsel %vm930_vm3, %v1723_v17, 0 }
0x15a5   : > { %v2173_v20 = vmul.f32 1.442695, %v2172_v19 }
0x15a6   : > { %v2183_v21 = vpop.permute.xlu1 %2182 }
0x15a7   : > { %3656 = vpow2.f32 %v2173_v20  ;;  %v2188_v22 = vsel %vm1921_vm5, %v2183_v21, 0 }
0x15a8   : > { %3470 = vmatpush3.bf16.msra.mxu0 %v2188_v22 }
0x15a9   : > { %3481 = vmatprep.subr.bf16.mxu0 %v3734_v1 }
0x15aa   : > { %v2339_v34 = vpop.permute.xlu1 %2338 }
0x15ae   : > { %v2337_v39 = vpop.permute.xlu1 %2336 }
0x15b2   : > { %v2343_v52 = vpop.permute.xlu1 %2342 }
0x15b4   : > { %v3657_v24 = vpop.eup %3656 }
0x15b5   : > { %v2175_v25 = vsel %vm1902_vm4, %v3657_v24, 0.0 }
0x15b6   : > { %2176 = vadd.xlane.f32.xlu0 %v2175_v25 }
0x163f   : > { %v2177_v29 = vpop.xlane.xlu0 %2176 }
0x1640   : > { %3658 = vrcp.f32 %v2177_v29 }
0x164d   : > { %v3659_v30 = vpop.eup %3658 }
0x164e   : > { %v2179_v31 = vmul.f32 %v3659_v30, %v3657_v24 }
0x1650   : > { %v2180_v32 = vpack.c.bf16 %v2179_v31, %v2179_v31 }
0x1652   : > { %3472 = vmatmul.mubr.msk.bf16.vlgmr.msra.gmra.mxu0 %vm1902_vm4, %v2180_v32 }
0x1653   : > { %3482 = vmatpush3.bf16.msra.mxu0 %v3624_v26  ;;  %3485 = vmatprep.mubr.msk.bf16.mxu0 %vm3735_vm0, %v3734_v1  ;;  %v3190_v26 = vld [vmem:[%s4460_s10 + $0x3] ss:$0 sm:$0xff] }
0x1654   : > { %3483 = vmatprep.subr.bf16.mxu0 %v3734_v1 }
0x1657   : > { %3484 = vmatpush3.bf16.msra.mxu0 %v3625_v27 }
0x1658   : > { %3497 = vmatprep.subr.bf16.mxu0 %v3734_v1 }
0x165a   : > { %3486 = vmatmul.mubr.msk.bf16.vlgmr.msra.gmra.mxu0 %vm818_vm1, %v4136_v6 }
0x165b   : > { %3499 = vmatprep.mubr.msk.bf16.mxu0 %vm3735_vm0, %v3734_v1 }
0x1712   : > { %v2224_v35 = vpop.f32.mrf.mxu0 }
0x1713   : > { %v2230_v36 = vpack.c.bf16 %v2224_v35, %v2224_v35 }
0x1714   : > { %v3473_v37 = vpop.f32.mrf.mxu0 }
0x1715   : > { %3478 = vmatmul.mubr.msk.bf16.vlgmr.msra.gmra.mxu1 %vm866_vm2, %v2230_v36 }
0x1716   : > { %v2227_v38 = vpop.f32.mrf.mxu0  ;;  %3490 = vmatpush3.bf16.msra.mxu1 %v2339_v34  ;;  %3493 = vmatprep.mubr.msk.bf16.mxu1 %vm3735_vm0, %v3734_v1 }
0x1717   : > { %3491 = vmatprep.subr.bf16.mxu1 %v3734_v1 }
0x1718   : > { %v3474_v40 = vpop.f32.mrf.mxu0 }
0x171a   : > { %v2330_v41 = vpop.f32.mrf.mxu0  ;;  %3492 = vmatpush3.bf16.msra.mxu1 %v2337_v39 }
0x171b   : > { %3503 = vmatprep.subr.bf16.mxu1 %v3734_v1  ;;  %v2331_v62 = vadd.f32 %v3182_v33, %v2330_v41 }
0x171c   : > { %v3487_v42 = vpop.f32.mrf.mxu0 }
0x171d   : > { %3494 = vmatmul.mubr.msk.bf16.vlgmr.msra.gmra.mxu1 %vm818_vm1, %v4119_v61  ;;  %v2386_v55 = vpack.c.bf16 %v2331_v62, %v2331_v62 }
0x171e   : > { %v2333_v43 = vpop.f32.mrf.mxu0  ;;  %3505 = vmatprep.mubr.msk.bf16.mxu1 %vm3735_vm0, %v3734_v1 }
0x1720   : > { %v3488_v44 = vpop.f32.mrf.mxu0 }
0x17d5   : > { %v2271_v47 = vpop.f32.mrf.mxu1 }
0x17d6   : > { %v4246_v48 = vadd.f32 %v2271_v47, %v2012_v46 }
0x17d7   : > { %v3479_v49 = vpop.f32.mrf.mxu1 }
0x17d9   : > { %v2274_v50 = vpop.f32.mrf.mxu1 }
0x17db   : > { %v3480_v51 = vpop.f32.mrf.mxu1 }
0x17dd   : > { %v2379_v3 = vpop.f32.mrf.mxu1 }
0x17de   : > { %v2380_v56 = vadd.f32 %v2379_v3, %v2343_v52 }
0x17df   : > { %v3495_v53 = vpop.f32.mrf.mxu1 }
0x17e1   : > { %v2382_v54 = vpop.f32.mrf.mxu1 }
0x17e2   : > { %v2383_v57 = vadd.f32 %v2382_v54, %v2343_v52 }
0x17e3   : > { %v3496_v58 = vpop.f32.mrf.mxu1 }
0x17e4   : > { %v2387_v59 = vpack.c.bf16 %v2383_v57, %v2380_v56 }
0x17e6   : > { %v2392_v60 = vsel %vm866_vm2, %v2387_v59, 0 }
0x17e7   : > { %3498 = vmatpush3.bf16.xpose.msra.mxu0 %v2392_v60 }
0x17e8   : > { %3509 = vmatprep.subr.bf16.mxu0 %v3734_v1 }
0x17ee   : > { %3500 = vmatmul.mubr.msk.bf16.vlgmr.msra.gmra.mxu0 %vm866_vm2, %v2386_v55 }
0x17ef   : > { %3511 = vmatprep.mubr.msk.bf16.mxu0 %vm3735_vm0, %v3734_v1  ;;  %3510 = vmatpush3.bf16.msra.mxu0 %v2500_v18 }
0x17f0   : > { %3523 = vmatprep.subr.bf16.mxu0 %v3734_v1 }
0x18ae   : > { %v2428_v4 = vpop.f32.mrf.mxu0 }
0x18af   : > { %v2429_v63 = vadd.f32 %v4151_v23, %v2428_v4  ;;  %v1724_v4 = vld [vmem:[%s4463_s11 + $0xc] sm:$0xf]  ;;  %s3033_s11 = scalar_lea.hbm %s4421_s23, %s3213_s24 }
0x18b0   : > { %v3501_v0 = vpop.f32.mrf.mxu0 }
0x18b1   : > { %v2434_v2 = vsel %vm1902_vm4, %v2429_v63, -inf }
0x18b2   : > { %2435 = vmax.xlane.f32.xlu1 %v2434_v2  ;;  %v2431_v7 = vpop.f32.mrf.mxu0 }
0x18b4   : > { %v3502_v8 = vpop.f32.mrf.mxu0 }
0x193b   : > { %v2436_v9 = vpop.xlane.xlu1 %2435 }
0x193c   : > { %v2437_v10 = vsub.f32 %v2429_v63, %v2436_v9  ;;  %v2765_v63 = vsel %vm930_vm3, %v1724_v4, 0  ;;  %v3210_v4 = vld [vmem:[%s4419_s21] ss:$0 sm:$0xff] }
0x193e   : > { %v2438_v11 = vmul.f32 1.442695, %v2437_v10 }
0x1940   : > { %3660 = vpow2.f32 %v2438_v11 }
0x194d   : > { %v3661_v12 = vpop.eup %3660 }
0x194e   : > { %v2440_v13 = vsel %vm1902_vm4, %v3661_v12, 0.0 }
0x194f   : > { %2441 = vadd.xlane.f32.xlu0 %v2440_v13 }
0x1965   : > { %2447 = vrot.lane.b32.xlu0 %v2387_v59, %s4457_s3 }
0x1969   : > { %2603 = vrot.lane.b32.xlu0 %v3626_v14, %s4457_s3 }
0x196d   : > { %2601 = vrot.lane.b32.xlu0 %v3627_v15, %s4457_s3 }
0x1971   : > { %2607 = vrot.lane.b32.xlu0 %v3190_v26, %s4457_s3 }
0x19d8   : > { %v2442_v19 = vpop.xlane.xlu0 %2441 }
0x19d9   : > { %3662 = vrcp.f32 %v2442_v19 }
0x19dc   : > { %v2448_v20 = vpop.permute.xlu0 %2447 }
0x19dd   : > { %v2453_v21 = vsel %vm1921_vm5, %v2448_v20, 0 }
0x19de   : > { %3504 = vmatpush3.bf16.msra.mxu1 %v2453_v21 }
0x19df   : > { %3515 = vmatprep.subr.bf16.mxu1 %v3734_v1 }
0x19e0   : > { %v2604_v27 = vpop.permute.xlu0 %2603 }
0x19e6   : > { %v3663_v22 = vpop.eup %3662 }
0x19e7   : > { %v2444_v24 = vmul.f32 %v3663_v22, %v3661_v12 }
0x19e9   : > { %v2445_v25 = vpack.c.bf16 %v2444_v24, %v2444_v24 }
0x19eb   : > { %3506 = vmatmul.mubr.msk.bf16.vlgmr.msra.gmra.mxu1 %vm1902_vm4, %v2445_v25 }
0x19ec   : > { %3516 = vmatpush3.bf16.msra.mxu1 %v3626_v14  ;;  %3519 = vmatprep.mubr.msk.bf16.mxu1 %vm3735_vm0, %v3734_v1 }
0x19ed   : > { %3517 = vmatprep.subr.bf16.mxu1 %v3734_v1 }
0x19f0   : > { %3518 = vmatpush3.bf16.msra.mxu1 %v3627_v15 }
0x19f1   : > { %3531 = vmatprep.subr.bf16.mxu1 %v3734_v1 }
0x19f3   : > { %3520 = vmatmul.mubr.msk.bf16.vlgmr.msra.gmra.mxu1 %vm818_vm1, %v4136_v6  ;;  %v2602_v6 = vpop.permute.xlu0 %2601 }
0x19f4   : > { %3533 = vmatprep.mubr.msk.bf16.mxu1 %vm3735_vm0, %v3734_v1 }
0x19f7   : > { %v2608_v42 = vpop.permute.xlu0 %2607 }
0x1aab   : > { %v2489_v16 = vpop.f32.mrf.mxu1 }
0x1aac   : > { %v2495_v28 = vpack.c.bf16 %v2489_v16, %v2489_v16  ;;  %v3628_v16 = vld [vmem:[%s4411_s13 + $0x8] sm:$0xff]  }
0x1aad   : > { %v3507_v29 = vpop.f32.mrf.mxu1 }
0x1aae   : > { %3512 = vmatmul.mubr.msk.bf16.vlgmr.msra.gmra.mxu0 %vm866_vm2, %v2495_v28  ;;  %v3630_v28 = vld [vmem:[%s4413_s15 + $0x18] sm:$0xff]   ;;  %v3631_v29 = vld [vmem:[%s4413_s15 + $0x10] sm:$0xff]  }
0x1aaf   : > { %v2492_v30 = vpop.f32.mrf.mxu1  ;;  %3524 = vmatpush3.bf16.msra.mxu0 %v2604_v27  ;;  %3527 = vmatprep.mubr.msk.bf16.mxu0 %vm3735_vm0, %v3734_v1 }
0x1ab0   : > { %3525 = vmatprep.subr.bf16.mxu0 %v3734_v1 }
0x1ab1   : > { %v3508_v31 = vpop.f32.mrf.mxu1 }
0x1ab3   : > { %v2595_v32 = vpop.f32.mrf.mxu1  ;;  %3526 = vmatpush3.bf16.msra.mxu0 %v2602_v6 }
0x1ab4   : > { %3537 = vmatprep.subr.bf16.mxu0 %v3734_v1  ;;  %v2596_v50 = vadd.f32 %v3190_v26, %v2595_v32 }
0x1ab5   : > { %v3521_v33 = vpop.f32.mrf.mxu1 }
0x1ab6   : > { %3528 = vmatmul.mubr.msk.bf16.vlgmr.msra.gmra.mxu0 %vm818_vm1, %v4119_v61  ;;  %v2651_v51 = vpack.c.bf16 %v2596_v50, %v2596_v50  ;;  %v3198_v33 = vld [vmem:[%s4417_s19] ss:$0 sm:$0xff] }
0x1ab7   : > { %v2598_v34 = vpop.f32.mrf.mxu1  ;;  %3539 = vmatprep.mubr.msk.bf16.mxu0 %vm3735_vm0, %v3734_v1 }
0x1ab9   : > { %v3522_v35 = vpop.f32.mrf.mxu1 }
0x1aba   : > { %v3199_v35 = vld [vmem:[%s4418_s20] ss:$0 sm:$0xff] }
0x1b6e   : > { %v2536_v36 = vpop.f32.mrf.mxu0 }
0x1b6f   : > { %v2542_v37 = vadd.f32 %v2536_v36, %v4246_v48 }
0x1b70   : > { %v3513_v38 = vpop.f32.mrf.mxu0 }
0x1b72   : > { %v2539_v39 = vpop.f32.mrf.mxu0 }
0x1b73   : > { %v3632_v39 = vld [vmem:[%s4413_s15 + $0x8] sm:$0xff]  }
0x1b74   : > { %v3514_v40 = vpop.f32.mrf.mxu0 }
0x1b75   : > { %v3633_v40 = vld [vmem:[%s4413_s15] sm:$0xff]  }
0x1b76   : > { %v2644_v41 = vpop.f32.mrf.mxu0 }
0x1b77   : > { %v2645_v45 = vadd.f32 %v2644_v41, %v2608_v42  ;;  %v3200_v41 = vld [vmem:[%s4412_s14] ss:$0 sm:$0xff] }
0x1b78   : > { %v3529_v43 = vpop.f32.mrf.mxu0 }
0x1b7a   : > { %v2647_v44 = vpop.f32.mrf.mxu0 }
0x1b7b   : > { %v2648_v46 = vadd.f32 %v2647_v44, %v2608_v42 }
0x1b7c   : > { %v3530_v47 = vpop.f32.mrf.mxu0 }
0x1b7d   : > { %v2652_v49 = vpack.c.bf16 %v2648_v46, %v2645_v45 }
0x1b7f   : > { %v2657_v61 = vsel %vm866_vm2, %v2652_v49, 0 }
0x1b80   : > { %3532 = vmatpush3.bf16.xpose.msra.mxu1 %v2657_v61 }
0x1b81   : > { %3543 = vmatprep.subr.bf16.mxu1 %v3734_v1 }
0x1b87   : > { %3534 = vmatmul.mubr.msk.bf16.vlgmr.msra.gmra.mxu1 %vm866_vm2, %v2651_v51 }
0x1b88   : > { %3545 = vmatprep.mubr.msk.bf16.mxu1 %vm3735_vm0, %v3734_v1  ;;  %3544 = vmatpush3.bf16.msra.mxu1 %v2765_v63 }
0x1b89   : > { %3557 = vmatprep.subr.bf16.mxu1 %v3734_v1 }
0x1c47   : > { %v2693_v48 = vpop.f32.mrf.mxu1 }
0x1c48   : > { %v2694_v3 = vadd.f32 %v4151_v23, %v2693_v48 }
0x1c49   : > { %v3535_v52 = vpop.f32.mrf.mxu1 }
0x1c4a   : > { %v2699_v53 = vsel %vm1902_vm4, %v2694_v3, -inf }
0x1c4b   : > { %2700 = vmax.xlane.f32.xlu1 %v2699_v53  ;;  %v2696_v54 = vpop.f32.mrf.mxu1 }
0x1c4d   : > { %v3536_v56 = vpop.f32.mrf.mxu1 }
0x1c5c   : > { %2712 = vrot.lane.b32.xlu1 %v2652_v49, %s4457_s3  ;;  %s738_s3 = scalar_lea.vmem [#allocation2], %s3128_s27 }
0x1c5d   : > { %s3035_s1 = sshll.u32 %s738_s3, 4  ;;  %s3036_s1 = int_to_ptr.vmem [resolvable:$true] %s3035_s1 }
0x1c5e   : > { %s3672_s0 = scalar_lea.vmem %s3036_s1, 128  ;;  %p3679_p0 = scmp.lt.s32.totalorder %s3036_s1, %s3677_s29 }
0x1c5f   : > { %p3673_p11 = scmp.ne.s32.totalorder %s3036_s1, %s3672_s0  ;;  %p3680_p1 = scmp.lt.s32.totalorder %s3678_s5, %s3672_s0 }
0x1c61   : > { %p3674_p12 = pnand %p3673_p11, %p3897_p5  ;;  %p3681_p2 = por %p3680_p1, %p3679_p0 }
0x1c63   : > { %p3675_p13 = pneg %p3674_p12 }
0x1c65   : > { %p3682_p3 = pnand %p3681_p2, %p3675_p13 }
0x1cd4   : > { %v2701_v57 = vpop.xlane.xlu1 %2700 }
0x1cd5   : > { %v2702_v58 = vsub.f32 %v2694_v3, %v2701_v57 }
0x1cd7   : > { %v2703_v59 = vmul.f32 1.442695, %v2702_v58 }
0x1cd8   : > { %v2713_v60 = vpop.permute.xlu1 %2712 }
0x1cd9   : > { %3664 = vpow2.f32 %v2703_v59  ;;  %v2718_v62 = vsel %vm1921_vm5, %v2713_v60, 0 }
0x1cda   : > { %3538 = vmatpush3.bf16.msra.mxu0 %v2718_v62 }
0x1cdb   : > { %3549 = vmatprep.subr.bf16.mxu0 %v3734_v1 }
0x1ce6   : > { %v3665_v55 = vpop.eup %3664 }
0x1ce7   : > { %v2705_v23 = vsel %vm1902_vm4, %v3665_v55, 0.0 }
0x1ce8   : > { %2706 = vadd.xlane.f32.xlu0 %v2705_v23 }
0x1d71   : > { %v2707_v0 = vpop.xlane.xlu0 %2706 }
0x1d72   : > { %3666 = vrcp.f32 %v2707_v0  ;;  %v3211_v0 = vld [vmem:[%s4420_s22] ss:$0 sm:$0xff] }
0x1d7f   : > { %v3667_v2 = vpop.eup %3666 }
0x1d80   : > { %v2709_v7 = vmul.f32 %v3667_v2, %v3665_v55 }
0x1d82   : > { %v2710_v8 = vpack.c.bf16 %v2709_v7, %v2709_v7 }
0x1d84   : > { %3540 = vmatmul.mubr.msk.bf16.vlgmr.msra.gmra.mxu0 %vm1902_vm4, %v2710_v8 }
0x1d85   : > { %3553 = vmatprep.mubr.msk.bf16.mxu0 %vm3735_vm0, %v3734_v1  ;;  %3550 = vmatpush3.bf16.msra.mxu0 %v3628_v16 }
0x1d86   : > { %3551 = vmatprep.subr.bf16.mxu0 %v3734_v1 }
0x1e44   : > { %v2754_v9 = vpop.f32.mrf.mxu0 }
0x1e45   : > { %v2760_v10 = vpack.c.bf16 %v2754_v9, %v2754_v9 }
0x1e46   : > { %v3541_v11 = vpop.f32.mrf.mxu0 }
0x1e47   : > { %3546 = vmatmul.mubr.msk.bf16.vlgmr.msra.gmra.mxu1 %vm866_vm2, %v2760_v10 }
0x1e48   : > { %v2757_v12 = vpop.f32.mrf.mxu0  ;;  %3565 = vmatprep.mubr.msk.bf16.mxu1 %vm3735_vm0, %v3734_v1  ;;  %3558 = vmatpush3.bf16.msra.mxu1 %v3630_v28 }
0x1e49   : > { %3559 = vmatprep.subr.bf16.mxu1 %v3734_v1 }
0x1e4a   : > { %v3542_v13 = vpop.f32.mrf.mxu0 }
0x1e4c   : > { %3560 = vmatpush3.bf16.msra.mxu1 %v3631_v29 }
0x1e4d   : > { %3561 = vmatprep.subr.bf16.mxu1 %v3734_v1 }
0x1e50   : > { %3562 = vmatpush3.bf16.msra.mxu1 %v3632_v39 }
0x1e51   : > { %3563 = vmatprep.subr.bf16.mxu1 %v3734_v1  ;;  %v3204_v1 = vld [vmem:[%s4414_s16] ss:$0 sm:$0xff] }
0x1e54   : > { %3564 = vmatpush3.bf16.msra.mxu1 %v3633_v40 }
0x1f07   : > { %v2801_v14 = vpop.f32.mrf.mxu1 }
0x1f08   : > { %v2807_v15 = vadd.f32 %v2801_v14, %v2542_v37 }
0x1f09   : > { %v3547_v17 = vpop.f32.mrf.mxu1 }
0x1f0a   : > { %v2808_v18 = vadd.f32 %v2807_v15, %v4132_v5  ;;  %v3629_v5 = vld [vmem:[%s4411_s13] sm:$0xff]  }
0x1f0b   : > { %v2804_v19 = vpop.f32.mrf.mxu1  ;;  %3552 = vmatpush3.bf16.msra.mxu0 %v3629_v5 }
0x1f0c   : > { %v2811_v20 = vsel %vm818_vm1, %v2808_v18, 0.0 }
0x1f0d   : > { %2812 = vadd.xlane.f32.xlu1 %v2811_v20  ;;  %v3548_v21 = vpop.f32.mrf.mxu1 }
0x1f96   : > { %v2813_v22 = vpop.xlane.xlu1 %2812 }
0x1f97   : > { %v2814_v24 = vmul.f32 0.03125, %v2813_v22 }
0x1f99   : > { %v2815_v25 = vsub.f32 %v2808_v18, %v2814_v24 }
0x1f9b   : > { %v2816_v26 = vmul.f32 %v2815_v25, %v2815_v25 }
0x1f9d   : > { %v2817_v27 = vsel %vm818_vm1, %v2816_v26, 0.0 }
0x1f9e   : > { %2818 = vadd.xlane.f32.xlu0 %v2817_v27 }
0x2027   : > { %v2819_v30 = vpop.xlane.xlu0 %2818 }
0x2028   : > { %v2820_v6 = vmul.f32 0.03125, %v2819_v30 }
0x202a   : > { %v2821_v31 = vadd.f32 1e-05, %v2820_v6 }
0x202c   : > { %3668 = vrsqrt.f32 %v2821_v31 }
0x2039   : > { %v3669_v32 = vpop.eup %3668 }
0x203a   : > { %v2823_v34 = vmul.f32 %v3669_v32, %v2815_v25 }
0x203c   : > { %v2830_v36 = vmul.f32 %v3198_v33, %v2823_v34 }
0x203e   : > { %v2837_v37 = vadd.f32 %v3199_v35, %v2830_v36 }
0x2040   : > { %v2838_v38 = vpack.c.bf16 %v2837_v37, %v2837_v37 }
0x2042   : > { %3554 = vmatmul.mubr.msk.bf16.vlgmr.msra.gmra.mxu0 %vm818_vm1, %v2838_v38 }
0x2102   : > { %v2899_v42 = vpop.f32.mrf.mxu0 }
0x2103   : > { %v2900_v43 = vadd.f32 %v3200_v41, %v2899_v42 }
0x2104   : > { %v3555_v44 = vpop.f32.mrf.mxu0 }
0x2105   : > { %v2905_v45 = vmax.f32 %v2900_v43, 0.0 }
0x2106   : > { %v2902_v46 = vpop.f32.mrf.mxu0 }
0x2107   : > { %v2906_v47 = vpack.c.bf16 %v2905_v45, %v2905_v45 }
0x2108   : > { %v3556_v49 = vpop.f32.mrf.mxu0 }
0x2109   : > { %3566 = vmatmul.mubr.msk.bf16.vlgmr.msra.gmra.mxu1 %vm2946_vm6, %v2906_v47 }
0x21c9   : > { %v2984_v61 = vpop.f32.mrf.mxu1 }
0x21ca   : > { %v2985_v50 = vadd.f32 %v3204_v1, %v2984_v61 }
0x21cb   : > { %v3567_v51 = vpop.f32.mrf.mxu1 }
0x21cc   : > { %v2990_v48 = vadd.f32 %v2985_v50, %v2837_v37 }
0x21cd   : > { %v2987_v3 = vpop.f32.mrf.mxu1 }
0x21ce   : > { %v2993_v52 = vsel %vm818_vm1, %v2990_v48, 0.0 }
0x21cf   : > { %2994 = vadd.xlane.f32.xlu0 %v2993_v52  ;;  %v3568_v53 = vpop.f32.mrf.mxu1 }
0x2258   : > { %v2995_v54 = vpop.xlane.xlu0 %2994 }
0x2259   : > { %v2996_v56 = vmul.f32 0.03125, %v2995_v54 }
0x225b   : > { %v2997_v57 = vsub.f32 %v2990_v48, %v2996_v56 }
0x225d   : > { %v2998_v58 = vmul.f32 %v2997_v57, %v2997_v57 }
0x225f   : > { %v2999_v59 = vsel %vm818_vm1, %v2998_v58, 0.0 }
0x2260   : > { %3000 = vadd.xlane.f32.xlu0 %v2999_v59 }
0x22e9   : > { %v3001_v60 = vpop.xlane.xlu0 %3000 }
0x22ea   : > { %v3002_v62 = vmul.f32 0.03125, %v3001_v60 }
0x22ec   : > { %v3003_v55 = vadd.f32 1e-05, %v3002_v62 }
0x22ee   : > { %3670 = vrsqrt.f32 %v3003_v55 }
0x22fb   : > { %v3671_v23 = vpop.eup %3670 }
0x22fc   : > { %v3005_v63 = vmul.f32 %v3671_v23, %v2997_v57 }
0x22fe   : > { %v3012_v2 = vmul.f32 %v3210_v4, %v3005_v63 }
0x2300   : > { %v3019_v7 = vadd.f32 %v3211_v0, %v3012_v2 }
0x2302   : > { %3020 = vst.msk [vmem:[%s738_s3] sm:$0xff] %vm818_vm1, %v3019_v7 }
0x2303   : > { %3685 = shalt.err (!%p3682_p3)
}
0x2304   : > { %s3686_s9 = scalar_lea.hbm %s3033_s11, 128  ;;  %s3690_s27 = scalar_lea.hbm %s4421_s23, 512 }
0x2305   : > { %p3687_p4 = scmp.ne.s32.totalorder %s3033_s11, %s3686_s9  ;;  %p3691_p9 = scmp.lt.s32.totalorder %s3033_s11, %s4421_s23 }
0x2306   : > { %p3692_p10 = scmp.lt.s32.totalorder %s3690_s27, %s3686_s9 }
0x2307   : > { %p3688_p7 = pnand %p3687_p4, %p3897_p5 }
0x2308   : > { %p3693_p11 = por %p3692_p10, %p3691_p9 }
0x2309   : > { %p3689_p8 = pneg %p3688_p7 }
0x230b   : > { %p3694_p12 = pnand %p3693_p11, %p3689_p8 }
0x230d   : > { %3697 = shalt.err (!%p3694_p12)
}
0x230e   : > { %3569 = dma.vmem_to_hbm [thread:$0]  (%p3897_p5), %s3036_s1, 128, %s3033_s11, %s3022_s12  }
0x230f PF: > { %p3575_p13 = scmp.ge.s32.totalorder %s3732_s25, 2  ;;  %s3047_s0 = sand.u32 1, %s3720_s4  }
0x2310   : > { %s3048_s6 = scalar_lea.sflag [#allocation3], %s3047_s0 }
0x2311   : > { %p3572_p0 = pnand %p3575_p13, %p3901_p6 }
0x2313   : > { %p3573_p1 = pneg %p3572_p0 }
0x2315   : > { %3715 = dma.done.wait (%p3573_p1), %s3048_s6, 128  }
0x2316   : > { %3717 = vsyncadd (%p3573_p1), %s3048_s6, 4294967168  ;;  %s4466_s25 = sld [smem:[#allocation6_spill]]  ;;  %s4469_s4 = smov %s3724_s30 }
0x2317   : > { %s4467_s29 = sld [smem:[#allocation5_spill]] }
0x2318   : > { %s4468_s24 = sld [smem:[#allocation7_spill]] }
0x231c   : > { %p33_p2 = scmp.ge.s32.totalorder %s4466_s25, 6  }
0x231d   : > { %s4470_s30 = smov %s4467_s29 }
0x231e   :  { %35 = sbr.rel (!%p33_p2) target bundleno = 17 (0x11), region = 156 }
0x2323   :  { %3053 = vsyncpa [#allocation3], 1 }
0x2324   :  { %3055 = vsyncpa [#allocation3 + $0x1], 1 }

// kernel: tpu_custom_call.1
= control target key start
LH: loop header
LB: loop body
LE: loop exit
PB: predicated region body
PF: predicated region fallthrough
CT: control target
= control target key end

     0   :  { %s4398_s0 = inlined_call_operand.vmem [shape: f32[4,8,32], index: 0, kind: input, shape index: {}]   ;;  %s4399_s1 = inlined_call_operand.vmem [shape: f32[4,12,32], index: 1, kind: input, shape index: {}]   ;;  %s4400_s2 = inlined_call_operand.vmem [shape: f32[8,8], index: 2, kind: input, shape index: {}]   ;;  %s4401_s3 = inlined_call_operand.vmem [shape: f32[4,1,8], index: 3, kind: input, shape index: {}]   ;;  %s4402_s4 = inlined_call_operand.vmem [shape: f32[4,1,12], index: 4, kind: input, shape index: {}]   ;;  %s4403_s5 = inlined_call_operand.vmem [shape: bf16[4,32,24], index: 5, kind: input, shape index: {}]   ;;  %s4404_s6 = inlined_call_operand.vmem [shape: f32[4,1,24], index: 6, kind: input, shape index: {}]   ;;  %s4405_s7 = inlined_call_operand.vmem [shape: bf16[4,8,32], index: 7, kind: input, shape index: {}]   ;;  %s4406_s8 = inlined_call_operand.vmem [shape: f32[1,32], index: 8, kind: input, shape index: {}]   ;;  %s4407_s9 = inlined_call_operand.vmem [shape: bf16[4,32,24], index: 9, kind: input, shape index: {}]   ;;  %s4408_s10 = inlined_call_operand.vmem [shape: f32[4,1,24], index: 10, kind: input, shape index: {}]   ;;  %s4409_s11 = inlined_call_operand.vmem [shape: bf16[4,8,32], index: 11, kind: input, shape index: {}]   ;;  %s4410_s12 = inlined_call_operand.vmem [shape: f32[1,32], index: 12, kind: input, shape index: {}]   ;;  %s4411_s13 = inlined_call_operand.vmem [shape: bf16[32,64], index: 13, kind: input, shape index: {}]   ;;  %s4412_s14 = inlined_call_operand.vmem [shape: f32[1,64], index: 14, kind: input, shape index: {}]   ;;  %s4413_s15 = inlined_call_operand.vmem [shape: bf16[64,32], index: 15, kind: input, shape index: {}]   ;;  %s4414_s16 = inlined_call_operand.vmem [shape: f32[1,32], index: 16, kind: input, shape index: {}]   ;;  %s4415_s17 = inlined_call_operand.vmem [shape: f32[1,32], index: 17, kind: input, shape index: {}]   ;;  %s4416_s18 = inlined_call_operand.vmem [shape: f32[1,32], index: 18, kind: input, shape index: {}]   ;;  %s4417_s19 = inlined_call_operand.vmem [shape: f32[1,32], index: 19, kind: input, shape index: {}]   ;;  %s4418_s20 = inlined_call_operand.vmem [shape: f32[1,32], index: 20, kind: input, shape index: {}]   ;;  %s4419_s21 = inlined_call_operand.vmem [shape: f32[1,32], index: 21, kind: input, shape index: {}]   ;;  %s4420_s22 = inlined_call_operand.vmem [shape: f32[1,32], index: 22, kind: input, shape index: {}]   ;;  %s4421_s23 = inlined_call_operand.hbm [shape: f32[4,8,32], index: 23, kind: output, shape index: {}]  }
   0x1   :  { %4432 = sst [smem:[#allocation9_spill]] %s4398_s0 }
   0x2   :  { %4433 = sst [smem:[#allocation10_spill]] %s4399_s1 }
   0x3   :  { %4434 = sst [smem:[#allocation11_spill]] %s4400_s2 }
   0x4   :  { %4435 = sst [smem:[#allocation12_spill]] %s4401_s3 }
   0x5   :  { %4436 = sst [smem:[#allocation13_spill]] %s4402_s4 }
   0x6   :  { %4437 = sst [smem:[#allocation14_spill]] %s4403_s5 }
   0x7   :  { %4438 = sst [smem:[#allocation15_spill]] %s4404_s6 }
   0x8   :  { %4439 = sst [smem:[#allocation16_spill]] %s4405_s7 }
   0x9   :  { %4440 = sst [smem:[#allocation17_spill]] %s4406_s8 }
   0xa   :  { %4441 = sst [smem:[#allocation18_spill]] %s4407_s9 }
   0xb   :  { %4442 = sst [smem:[#allocation19_spill]] %s4408_s10 }
   0xc   :  { %4443 = sst [smem:[#allocation20_spill]] %s4409_s11 }
   0xd   :  { %4444 = sst [smem:[#allocation21_spill]] %s4410_s12 }
   0xe   :  { %28 = vsyncpa [#allocation3], 0 }
   0xf   :  { %30 = vsyncpa [#allocation3 + $0x1], 0  ;;  %s3859_s4 = smov 0   ;;  %s3861_s30 = smov 0  }
  0x10   :  { %s3863_s24 = smov 0   ;;  %s3865_s25 = smov 0  }
  0x11 LB: > { %4445 = sst [smem:[#allocation5_spill]] %s3728_s24  ;;  %s3880_s5 = sadd.s32 4294967295, %s3732_s25   ;;  %s3732_s25 = sphi %s3865_s25, %s4466_s25   ;;  %s3728_s24 = sphi %s3863_s24, %s4468_s24   ;;  %s3724_s30 = sphi %s3861_s30, %s4470_s30   ;;  %s3720_s4 = sphi %s3859_s4, %s4469_s4  }
  0x12   : > { %s3124_s1 = sadd.s32 4294967294, %s3732_s25   ;;  %s3884_s26 = sadd.s32 1, %s3732_s25  }
  0x13   : > { %4446 = sst [smem:[#allocation6_spill]] %s3884_s26  ;;  %s546_s2 = sadd.s32 1, %s3728_s24 }
  0x14   : > { %s543_s6 = ssub.s32 %s3732_s25, %s3884_s26  ;;  %p556_p0 = scmp.ne.s32.totalorder %s3728_s24, %s3724_s30 }
  0x15   : > { %p544_p1 = scmp.eq.s32.totalorder %s543_s6, 0  ;;  %p557_p2 = scmp.eq.s32.totalorder %s3880_s5, 3 }
  0x16   : > { %p562_p3 = scmp.ne.s32.totalorder %s3724_s30, %s3720_s4  ;;  %p563_p4 = scmp.eq.s32.totalorder %s3124_s1, 3 }
  0x17   : > { %s3895_s27 = scalar_select %p544_p1, %s3728_s24, %s546_s2  }
  0x18   : > { %p3897_p5 = por %p557_p2, %p556_p0  ;;  %p3901_p6 = por %p563_p4, %p562_p3 }
  0x19   : > { %4447 = sst [smem:[#allocation7_spill]] %s3895_s27  ;;  %p3127_p7 = scmp.ge.s32.totalorder %s3732_s25, 1 }
  0x1a   : > { %s4449_s28 = scalar_select %p3901_p6, 1, 0 }
  0x1b   : > { %p665_p8 = scmp.lt.s32.totalorder %s3732_s25, 5 }
  0x1c   : > { %4450 = sst [smem:[#allocation8_spill]] %s4449_s28 }
  0x1d   : > { %p666_p9 = pnand %p3127_p7, %p665_p8 }
  0x1e   : > { %s4451_s0 = sld [smem:[#allocation14_spill]] (!%p666_p9)  ;;  %p739_p10 = scmp.lt.s32.totalorder (!%p666_p9), %s3880_s5, 3 }
  0x1f   : > { %669 = sbr.rel (%p666_p9) target bundleno = 8975 (0x230f), region = 112  ;;  %s4452_s24 = sld [smem:[#allocation9_spill]] (!%p666_p9) }
  0x20   : > { %s4453_s28 = sld [smem:[#allocation15_spill]] (!%p666_p9)  ;;  %s736_s2 = sand.u32 (!%p666_p9), 1, %s3724_s30  }
  0x21   : > { %s4456_s26 = sld [smem:[#allocation16_spill]] (!%p666_p9) }
  0x22   : > { %s4458_s8 = sld [smem:[#allocation17_spill]] (!%p666_p9) }
  0x23   : > { %s4459_s9 = sld [smem:[#allocation18_spill]] (!%p666_p9) }
  0x24   : > { %v3612_v0 = vld [vmem:[%s4451_s0 + $0x8] sm:$0xff]   ;;  %v3734_v1 = vmov 0.0   ;;  %v3613_v2 = vld [vmem:[%s4451_s0] sm:$0xff]   ;;  %vm3735_vm0 = vmmov 0   ;;  %s3922_s6 = scalar_select %p739_p10, %s3880_s5, 3  ;;  %vm818_vm1 = vcmask 261120  }
  0x25   : > { %3309 = vmatprep.subr.bf16.mxu0 %v3734_v1  ;;  %3317 = vmatprep.subr.bf16.mxu1 %v3734_v1  ;;  %vm866_vm2 = vcmask 64512   ;;  %vm930_vm3 = vcmask 1043456   ;;  %v3614_v33 = vld [vmem:[%s4451_s0 + $0x18] sm:$0xff]   ;;  %v3615_v35 = vld [vmem:[%s4451_s0 + $0x10] sm:$0xff]   ;;  %s4460_s10 = sld [smem:[#allocation19_spill]]  ;;  %vm1902_vm4 = vcmask 97280  }
  0x26   : > { %3310 = vmatpush3.bf16.msra.mxu0 %v3612_v0  ;;  %3313 = vmatprep.mubr.msk.bf16.mxu0 %vm3735_vm0, %v3734_v1  ;;  %s3129_s29 = sshll.u32 %s3922_s6, 3  ;;  %v3134_v5 = vld [vmem:[%s4453_s28] ss:$0 sm:$0xff]  ;;  %v3141_v43 = vld [vmem:[%s4453_s28 + $0x1] ss:$0 sm:$0xff]  ;;  %s4462_s27 = sld [smem:[#allocation13_spill]] }
  0x27   : > { %3311 = vmatprep.subr.bf16.mxu0 %v3734_v1  ;;  %3319 = vmatprep.mubr.msk.bf16.mxu1 %vm3735_vm0, %v3734_v1  ;;  %s742_s1 = scalar_lea.vmem %s4452_s24, %s3129_s29  ;;  %s4429_s24 = smov 120   ;;  %v788_v36 = vld [vmem:[%s4456_s26] sm:$0xf]  ;;  %vm1921_vm5 = vcmask 1045504   ;;  %vm2946_vm6 = vcmask 523264  }
  0x28   : > { %v3929_v3 = vld [vmem:[%s742_s1] sm:$0xff]  ;;  %s4454_s29 = sld [smem:[#allocation12_spill]]  ;;  %v979_v37 = vsel %vm930_vm3, %v788_v36, 0  ;;  %s3216_s1 = sshll.u32 %s3922_s6, 4 }
  0x29   : > { %v3933_v4 = vpack.c.bf16 %v3929_v3, %v3929_v3  ;;  %s4463_s11 = sld [smem:[#allocation20_spill]] }
  0x2a   : > { %3312 = vmatpush3.bf16.msra.mxu0 %v3613_v2  ;;  %s4464_s12 = sld [smem:[#allocation21_spill]] }
  0x2b   : > { %3323 = vmatprep.subr.bf16.mxu0 %v3734_v1 }
  0x2d   : > { %3314 = vmatmul.mubr.msk.bf16.vlgmr.msra.gmra.mxu0 %vm818_vm1, %v3933_v4 }
  0x2e   : > { %3325 = vmatprep.mubr.msk.bf16.mxu0 %vm3735_vm0, %v3734_v1  ;;  %s750_s3 = scalar_lea.vmem %s4454_s29, %s3922_s6 }
  0x2f   : > { %v3132_v15 = vld [vmem:[%s750_s3] ss:$0 sm:$0xff]  ;;  %s4457_s3 = smov 120  }
  0xed   : > { %v856_v6 = vpop.f32.mrf.mxu0 }
  0xee   : > { %v857_v7 = vadd.f32 %v3134_v5, %v856_v6 }
  0xef   : > { %v3315_v8 = vpop.f32.mrf.mxu0 }
  0xf0   : > { %v862_v9 = vpack.c.bf16 %v857_v7, %v857_v7 }
  0xf1   : > { %v859_v10 = vpop.f32.mrf.mxu0 }
  0xf2   : > { %864 = vrot.lane.b32.xlu0 %v862_v9, %s4429_s24  ;;  %s4455_s24 = sld [smem:[#allocation11_spill]] }
  0xf3   : > { %v3316_v11 = vpop.f32.mrf.mxu0 }
  0xf4   : > { %v3616_v11 = vld [vmem:[%s4451_s0 + $0x28] sm:$0xff]  }
  0xf8   : > { %v758_v14 = vld [vmem:[%s4455_s24] sm:$0xff]  ;;  %s3737_s24 = smov 112  }
  0xf9   : > { %v3955_v16 = vadd.f32 %v3132_v15, %v758_v14  ;;  %v789_v14 = vld [vmem:[%s4456_s26 + $0x4] sm:$0xf] }
  0xfa   : > { %v1195_v15 = vsel %vm930_vm3, %v789_v14, 0 }
 0x164   : > { %v865_v12 = vpop.permute.xlu0 %864 }
 0x165   : > { %v871_v13 = vsel %vm866_vm2, %v865_v12, 0 }
 0x166   : > { %3318 = vmatpush3.bf16.xpose.msra.mxu1 %v871_v13  ;;  %v3617_v13 = vld [vmem:[%s4451_s0 + $0x20] sm:$0xff]  }
 0x167   : > { %3329 = vmatprep.subr.bf16.mxu1 %v3734_v1 }
 0x16d   : > { %3320 = vmatmul.mubr.msk.bf16.vlgmr.msra.gmra.mxu1 %vm866_vm2, %v862_v9 }
 0x16e   : > { %3331 = vmatprep.mubr.msk.bf16.mxu1 %vm3735_vm0, %v3734_v1  ;;  %3330 = vmatpush3.bf16.msra.mxu1 %v979_v37 }
 0x16f   : > { %3343 = vmatprep.subr.bf16.mxu1 %v3734_v1 }
 0x22d   : > { %v907_v17 = vpop.f32.mrf.mxu1 }
 0x22e   : > { %v908_v18 = vadd.f32 %v907_v17, %v3955_v16 }
 0x22f   : > { %v3321_v19 = vpop.f32.mrf.mxu1 }
 0x230   : > { %v913_v20 = vsel %vm866_vm2, %v908_v18, -inf }
 0x231   : > { %914 = vmax.xlane.f32.xlu0 %v913_v20  ;;  %v910_v21 = vpop.f32.mrf.mxu1 }
 0x233   : > { %v3322_v22 = vpop.f32.mrf.mxu1 }
 0x234   : > { %v3148_v22 = vld [vmem:[%s4453_s28 + $0x2] ss:$0 sm:$0xff] }
 0x2ba   : > { %v915_v23 = vpop.xlane.xlu0 %914 }
 0x2bb   : > { %v916_v24 = vsub.f32 %v908_v18, %v915_v23 }
 0x2bd   : > { %v917_v25 = vmul.f32 1.442695, %v916_v24 }
 0x2bf   : > { %3634 = vpow2.f32 %v917_v25 }
 0x2cc   : > { %v3635_v26 = vpop.eup %3634 }
 0x2cd   : > { %v919_v27 = vsel %vm866_vm2, %v3635_v26, 0.0 }
 0x2ce   : > { %920 = vadd.xlane.f32.xlu1 %v919_v27 }
 0x2df   : > { %925 = vrot.lane.b32.xlu1 %v862_v9, %s3737_s24 }
 0x357   : > { %v921_v28 = vpop.xlane.xlu1 %920 }
 0x358   : > { %3636 = vrcp.f32 %v921_v28 }
 0x35b   : > { %v926_v29 = vpop.permute.xlu1 %925 }
 0x35c   : > { %v932_v30 = vsel %vm930_vm3, %v926_v29, 0 }
 0x35d   : > { %3324 = vmatpush3.bf16.msra.mxu0 %v932_v30 }
 0x35e   : > { %3335 = vmatprep.subr.bf16.mxu0 %v3734_v1 }
 0x365   : > { %v3637_v31 = vpop.eup %3636 }
 0x366   : > { %v923_v32 = vmul.f32 %v3637_v31, %v3635_v26  ;;  %v3133_v31 = vld [vmem:[%s4458_s8] ss:$0 sm:$0xff] }
 0x368   : > { %v924_v34 = vpack.c.bf16 %v923_v32, %v923_v32 }
 0x36a   : > { %3326 = vmatmul.mubr.msk.bf16.vlgmr.msra.gmra.mxu0 %vm866_vm2, %v924_v34 }
 0x36b   : > { %3336 = vmatpush3.bf16.msra.mxu0 %v3614_v33  ;;  %3339 = vmatprep.mubr.msk.bf16.mxu0 %vm3735_vm0, %v3734_v1 }
 0x36c   : > { %3337 = vmatprep.subr.bf16.mxu0 %v3734_v1 }
 0x36f   : > { %3338 = vmatpush3.bf16.msra.mxu0 %v3615_v35 }
 0x370   : > { %3349 = vmatprep.subr.bf16.mxu0 %v3734_v1 }
 0x372   : > { %3340 = vmatmul.mubr.msk.bf16.vlgmr.msra.gmra.mxu0 %vm818_vm1, %v3933_v4 }
 0x373   : > { %3351 = vmatprep.mubr.msk.bf16.mxu0 %vm3735_vm0, %v3734_v1 }
 0x42a   : > { %v968_v38 = vpop.f32.mrf.mxu0 }
 0x42b   : > { %v974_v39 = vpack.c.bf16 %v968_v38, %v968_v38 }
 0x42c   : > { %v3327_v40 = vpop.f32.mrf.mxu0 }
 0x42d   : > { %3332 = vmatmul.mubr.msk.bf16.vlgmr.msra.gmra.mxu1 %vm866_vm2, %v974_v39 }
 0x42e   : > { %v971_v41 = vpop.f32.mrf.mxu0  ;;  %3345 = vmatprep.mubr.msk.bf16.mxu1 %vm3735_vm0, %v3734_v1 }
 0x430   : > { %v3328_v42 = vpop.f32.mrf.mxu0 }
 0x432   : > { %v1074_v44 = vpop.f32.mrf.mxu0 }
 0x433   : > { %v1075_v45 = vadd.f32 %v3141_v43, %v1074_v44 }
 0x434   : > { %v3341_v46 = vpop.f32.mrf.mxu0 }
 0x435   : > { %v1080_v47 = vpack.c.bf16 %v1075_v45, %v1075_v45 }
 0x436   : > { %v1077_v48 = vpop.f32.mrf.mxu0 }
 0x437   : > { %1082 = vrot.lane.b32.xlu1 %v1080_v47, %s4457_s3 }
 0x438   : > { %v3342_v49 = vpop.f32.mrf.mxu0 }
 0x4a9   : > { %v1083_v50 = vpop.permute.xlu1 %1082 }
 0x4aa   : > { %v1088_v51 = vsel %vm866_vm2, %v1083_v50, 0 }
 0x4ab   : > { %3344 = vmatpush3.bf16.xpose.msra.mxu1 %v1088_v51 }
 0x4ac   : > { %3355 = vmatprep.subr.bf16.mxu1 %v3734_v1 }
 0x4b2   : > { %3346 = vmatmul.mubr.msk.bf16.vlgmr.msra.gmra.mxu1 %vm866_vm2, %v1080_v47 }
 0x4b3   : > { %3357 = vmatprep.mubr.msk.bf16.mxu1 %vm3735_vm0, %v3734_v1  ;;  %3356 = vmatpush3.bf16.msra.mxu1 %v1195_v15 }
 0x4b4   : > { %3369 = vmatprep.subr.bf16.mxu1 %v3734_v1 }
 0x4ed   : > { %v3995_v52 = vpop.f32.mrf.mxu1 }
 0x4ee   : > { %v1021_v32 = vadd.f32 %v3133_v31, %v3995_v52 }
 0x4ef   : > { %v3333_v53 = vpop.f32.mrf.mxu1 }
 0x4f1   : > { %v1018_v54 = vpop.f32.mrf.mxu1 }
 0x4f2   : > { %v3618_v54 = vld [vmem:[%s4451_s0 + $0x38] sm:$0xff]  }
 0x4f3   : > { %v3334_v55 = vpop.f32.mrf.mxu1 }
 0x572   : > { %v1124_v56 = vpop.f32.mrf.mxu1 }
 0x573   : > { %v1125_v57 = vadd.f32 %v1124_v56, %v3955_v16  ;;  %v3619_v56 = vld [vmem:[%s4451_s0 + $0x30] sm:$0xff]   ;;  %s4461_s0 = sld [smem:[#allocation10_spill]] }
 0x574   : > { %v3347_v58 = vpop.f32.mrf.mxu1 }
 0x575   : > { %v1130_v59 = vsel %vm866_vm2, %v1125_v57, -inf }
 0x576   : > { %1131 = vmax.xlane.f32.xlu1 %v1130_v59  ;;  %v1127_v60 = vpop.f32.mrf.mxu1 }
 0x578   : > { %v3348_v61 = vpop.f32.mrf.mxu1 }
 0x579   : > { %s747_s8 = scalar_lea.vmem %s4461_s0, %s3216_s1  ;;  %s753_s0 = scalar_lea.vmem %s4462_s27, %s3922_s6 }
 0x57a   : > { %s3128_s27 = sshll.u32 %s736_s2, 3  ;;  %s3738_s6 = smov [#allocation2]  }
 0x57b   : > { %s3676_s29 = sshll.u32 %s3738_s6, 4  ;;  %s3677_s29 = int_to_ptr.vmem [resolvable:$false] %s3676_s29 }
 0x5ff   : > { %v1132_v62 = vpop.xlane.xlu1 %1131 }
 0x600   : > { %v1133_v63 = vsub.f32 %v1125_v57, %v1132_v62  ;;  %v790_v57 = vld [vmem:[%s4456_s26 + $0x8] sm:$0xf] }
 0x601   : > { %v1411_v58 = vsel %vm930_vm3, %v790_v57, 0  ;;  %v756_v57 = vld [vmem:[%s747_s8] sm:$0xff] }
 0x602   : > { %v1134_v0 = vmul.f32 1.442695, %v1133_v63  ;;  %v3155_v63 = vld [vmem:[%s4453_s28 + $0x3] ss:$0 sm:$0xff] }
 0x604   : > { %3638 = vpow2.f32 %v1134_v0 }
 0x611   : > { %v3639_v2 = vpop.eup %3638 }
 0x612   : > { %v1136_v5 = vsel %vm866_vm2, %v3639_v2, 0.0 }
 0x613   : > { %1137 = vadd.xlane.f32.xlu0 %v1136_v5 }
 0x629   : > { %1142 = vrot.lane.b32.xlu0 %v1080_v47, %s3737_s24 }
 0x69c   : > { %v1138_v6 = vpop.xlane.xlu0 %1137 }
 0x69d   : > { %3640 = vrcp.f32 %v1138_v6 }
 0x6a0   : > { %v1143_v7 = vpop.permute.xlu0 %1142 }
 0x6a1   : > { %v1148_v8 = vsel %vm930_vm3, %v1143_v7, 0 }
 0x6a2   : > { %3350 = vmatpush3.bf16.msra.mxu0 %v1148_v8 }
 0x6a3   : > { %3361 = vmatprep.subr.bf16.mxu0 %v3734_v1 }
 0x6aa   : > { %v3641_v9 = vpop.eup %3640 }
 0x6ab   : > { %v1140_v10 = vmul.f32 %v3641_v9, %v3639_v2 }
 0x6ad   : > { %v1141_v12 = vpack.c.bf16 %v1140_v10, %v1140_v10 }
 0x6af   : > { %3352 = vmatmul.mubr.msk.bf16.vlgmr.msra.gmra.mxu0 %vm866_vm2, %v1141_v12 }
 0x6b0   : > { %3362 = vmatpush3.bf16.msra.mxu0 %v3616_v11  ;;  %3365 = vmatprep.mubr.msk.bf16.mxu0 %vm3735_vm0, %v3734_v1 }
 0x6b1   : > { %3363 = vmatprep.subr.bf16.mxu0 %v3734_v1 }
 0x6b4   : > { %3364 = vmatpush3.bf16.msra.mxu0 %v3617_v13 }
 0x6b5   : > { %3375 = vmatprep.subr.bf16.mxu0 %v3734_v1 }
 0x6b7   : > { %3366 = vmatmul.mubr.msk.bf16.vlgmr.msra.gmra.mxu0 %vm818_vm1, %v3933_v4 }
 0x6b8   : > { %3377 = vmatprep.mubr.msk.bf16.mxu0 %vm3735_vm0, %v3734_v1 }
 0x76f   : > { %v1184_v17 = vpop.f32.mrf.mxu0 }
 0x770   : > { %v1190_v18 = vpack.c.bf16 %v1184_v17, %v1184_v17 }
 0x771   : > { %v3353_v19 = vpop.f32.mrf.mxu0 }
 0x772   : > { %3358 = vmatmul.mubr.msk.bf16.vlgmr.msra.gmra.mxu1 %vm866_vm2, %v1190_v18 }
 0x773   : > { %v1187_v20 = vpop.f32.mrf.mxu0  ;;  %3371 = vmatprep.mubr.msk.bf16.mxu1 %vm3735_vm0, %v3734_v1 }
 0x775   : > { %v3354_v21 = vpop.f32.mrf.mxu0 }
 0x777   : > { %v1290_v23 = vpop.f32.mrf.mxu0 }
 0x778   : > { %v1291_v24 = vadd.f32 %v3148_v22, %v1290_v23 }
 0x779   : > { %v3367_v25 = vpop.f32.mrf.mxu0 }
 0x77a   : > { %v1296_v26 = vpack.c.bf16 %v1291_v24, %v1291_v24 }
 0x77b   : > { %v1293_v27 = vpop.f32.mrf.mxu0 }
 0x77c   : > { %1298 = vrot.lane.b32.xlu0 %v1296_v26, %s4457_s3 }
 0x77d   : > { %v3368_v28 = vpop.f32.mrf.mxu0 }
 0x7ee   : > { %v1299_v29 = vpop.permute.xlu0 %1298 }
 0x7ef   : > { %v1304_v30 = vsel %vm866_vm2, %v1299_v29, 0 }
 0x7f0   : > { %3370 = vmatpush3.bf16.xpose.msra.mxu1 %v1304_v30 }
 0x7f1   : > { %3381 = vmatprep.subr.bf16.mxu1 %v3734_v1 }
 0x7f7   : > { %3372 = vmatmul.mubr.msk.bf16.vlgmr.msra.gmra.mxu1 %vm866_vm2, %v1296_v26 }
 0x7f8   : > { %3383 = vmatprep.mubr.msk.bf16.mxu1 %vm3735_vm0, %v3734_v1  ;;  %3382 = vmatpush3.bf16.msra.mxu1 %v1411_v58  ;;  %v757_v58 = vld [vmem:[%s747_s8 + $0x8] sm:$0xf] }
 0x7f9   : > { %3395 = vmatprep.subr.bf16.mxu1 %v3734_v1 }
 0x832   : > { %v1231_v33 = vpop.f32.mrf.mxu1 }
 0x833   : > { %v4039_v34 = vadd.f32 %v1231_v33, %v1021_v32 }
 0x834   : > { %v3359_v35 = vpop.f32.mrf.mxu1 }
 0x836   : > { %v1234_v36 = vpop.f32.mrf.mxu1 }
 0x838   : > { %v3360_v37 = vpop.f32.mrf.mxu1 }
 0x8b7   : > { %v1340_v38 = vpop.f32.mrf.mxu1 }
 0x8b8   : > { %v1341_v39 = vadd.f32 %v1340_v38, %v3955_v16 }
 0x8b9   : > { %v3373_v40 = vpop.f32.mrf.mxu1 }
 0x8ba   : > { %v1346_v41 = vsel %vm866_vm2, %v1341_v39, -inf  ;;  %v3620_v40 = vld [vmem:[%s4459_s9 + $0x8] sm:$0xff]  }
 0x8bb   : > { %1347 = vmax.xlane.f32.xlu1 %v1346_v41  ;;  %v1343_v42 = vpop.f32.mrf.mxu1 }
 0x8bd   : > { %v3374_v43 = vpop.f32.mrf.mxu1 }
 0x8cc   : > { %1358 = vrot.lane.b32.xlu1 %v1296_v26, %s3737_s24 }
 0x944   : > { %v1348_v44 = vpop.xlane.xlu1 %1347 }
 0x945   : > { %v1349_v45 = vsub.f32 %v1341_v39, %v1348_v44 }
 0x947   : > { %v1350_v46 = vmul.f32 1.442695, %v1349_v45 }
 0x948   : > { %v1359_v47 = vpop.permute.xlu1 %1358 }
 0x949   : > { %3642 = vpow2.f32 %v1350_v46  ;;  %v1364_v48 = vsel %vm930_vm3, %v1359_v47, 0 }
 0x94a   : > { %3376 = vmatpush3.bf16.msra.mxu0 %v1364_v48  ;;  %v3621_v48 = vld [vmem:[%s4459_s9] sm:$0xff]  }
 0x94b   : > { %3387 = vmatprep.subr.bf16.mxu0 %v3734_v1 }
 0x956   : > { %v3643_v49 = vpop.eup %3642 }
 0x957   : > { %v1352_v50 = vsel %vm866_vm2, %v3643_v49, 0.0 }
 0x958   : > { %1353 = vadd.xlane.f32.xlu0 %v1352_v50 }
 0x9e1   : > { %v1354_v51 = vpop.xlane.xlu0 %1353 }
 0x9e2   : > { %3644 = vrcp.f32 %v1354_v51 }
 0x9ef   : > { %v3645_v52 = vpop.eup %3644 }
 0x9f0   : > { %v1356_v53 = vmul.f32 %v3645_v52, %v3643_v49 }
 0x9f2   : > { %v1357_v55 = vpack.c.bf16 %v1356_v53, %v1356_v53 }
 0x9f4   : > { %3378 = vmatmul.mubr.msk.bf16.vlgmr.msra.gmra.mxu0 %vm866_vm2, %v1357_v55 }
 0x9f5   : > { %3388 = vmatpush3.bf16.msra.mxu0 %v3618_v54  ;;  %3391 = vmatprep.mubr.msk.bf16.mxu0 %vm3735_vm0, %v3734_v1  ;;  %v3165_v54 = vld [vmem:[%s4460_s10] ss:$0 sm:$0xff] }
 0x9f6   : > { %3389 = vmatprep.subr.bf16.mxu0 %v3734_v1 }
 0x9f9   : > { %3390 = vmatpush3.bf16.msra.mxu0 %v3619_v56 }
 0x9fa   : > { %3401 = vmatprep.subr.bf16.mxu0 %v3734_v1 }
 0x9fc   : > { %3392 = vmatmul.mubr.msk.bf16.vlgmr.msra.gmra.mxu0 %vm818_vm1, %v3933_v4 }
 0x9fd   : > { %3403 = vmatprep.mubr.msk.bf16.mxu0 %vm3735_vm0, %v3734_v1 }
 0xab4   : > { %v1400_v59 = vpop.f32.mrf.mxu0 }
 0xab5   : > { %v1406_v60 = vpack.c.bf16 %v1400_v59, %v1400_v59 }
 0xab6   : > { %v3379_v61 = vpop.f32.mrf.mxu0 }
 0xab7   : > { %3384 = vmatmul.mubr.msk.bf16.vlgmr.msra.gmra.mxu1 %vm866_vm2, %v1406_v60  ;;  %v4119_v61 = vpack.c.bf16 %v757_v58, %v756_v57 }
 0xab8   : > { %v1403_v62 = vpop.f32.mrf.mxu0  ;;  %3397 = vmatprep.mubr.msk.bf16.mxu1 %vm3735_vm0, %v3734_v1 }
 0xaba   : > { %v3380_v4 = vpop.f32.mrf.mxu0 }
 0xabb   : > { %v3162_v4 = vld [vmem:[%s4415_s17] ss:$0 sm:$0xff] }
 0xabc   : > { %v1506_v0 = vpop.f32.mrf.mxu0 }
 0xabd   : > { %v1507_v2 = vadd.f32 %v3155_v63, %v1506_v0  ;;  %v3163_v0 = vld [vmem:[%s4416_s18] ss:$0 sm:$0xff] }
 0xabe   : > { %v3393_v5 = vpop.f32.mrf.mxu0 }
 0xabf   : > { %v1512_v6 = vpack.c.bf16 %v1507_v2, %v1507_v2 }
 0xac0   : > { %v1509_v7 = vpop.f32.mrf.mxu0 }
 0xac1   : > { %1514 = vrot.lane.b32.xlu1 %v1512_v6, %s4457_s3 }
 0xac2   : > { %v3394_v8 = vpop.f32.mrf.mxu0 }
 0xb33   : > { %v1515_v9 = vpop.permute.xlu1 %1514 }
 0xb34   : > { %v1520_v10 = vsel %vm866_vm2, %v1515_v9, 0 }
 0xb35   : > { %3396 = vmatpush3.bf16.xpose.msra.mxu1 %v1520_v10 }
 0xb36   : > { %3407 = vmatprep.subr.bf16.mxu1 %v3734_v1 }
 0xb3c   : > { %3398 = vmatmul.mubr.msk.bf16.vlgmr.msra.gmra.mxu1 %vm866_vm2, %v1512_v6 }
 0xb3d   : > { %3409 = vmatprep.mubr.msk.bf16.mxu1 %vm3735_vm0, %v3734_v1 }
 0xb77   : > { %v1447_v11 = vpop.f32.mrf.mxu1 }
 0xb78   : > { %v1453_v12 = vadd.f32 %v1447_v11, %v4039_v34 }
 0xb79   : > { %v3385_v13 = vpop.f32.mrf.mxu1 }
 0xb7b   : > { %v1450_v14 = vpop.f32.mrf.mxu1 }
 0xb7d   : > { %v3386_v15 = vpop.f32.mrf.mxu1 }
 0xbfc   : > { %v1556_v17 = vpop.f32.mrf.mxu1 }
 0xbfd   : > { %v1557_v18 = vadd.f32 %v1556_v17, %v3955_v16  ;;  %v791_v16 = vld [vmem:[%s4456_s26 + $0xc] sm:$0xf] }
 0xbfe   : > { %v3399_v19 = vpop.f32.mrf.mxu1  ;;  %v1627_v28 = vsel %vm930_vm3, %v791_v16, 0 }
 0xbff   : > { %v1562_v20 = vsel %vm866_vm2, %v1557_v18, -inf  ;;  %3408 = vmatpush3.bf16.msra.mxu1 %v1627_v28 }
 0xc00   : > { %1563 = vmax.xlane.f32.xlu1 %v1562_v20  ;;  %v1559_v21 = vpop.f32.mrf.mxu1  ;;  %3421 = vmatprep.subr.bf16.mxu1 %v3734_v1 }
 0xc02   : > { %v3400_v22 = vpop.f32.mrf.mxu1 }
 0xc11   : > { %1797 = vrot.lane.b32.xlu1 %v3620_v40, %s4457_s3 }
 0xc89   : > { %v1564_v23 = vpop.xlane.xlu1 %1563 }
 0xc8a   : > { %v1565_v24 = vsub.f32 %v1557_v18, %v1564_v23  ;;  %v4151_v23 = vld [vmem:[%s753_s0] ss:$0 sm:$0xff] }
 0xc8c   : > { %v1566_v25 = vmul.f32 1.442695, %v1565_v24 }
 0xc8d   : > { %v1798_v49 = vpop.permute.xlu1 %1797 }
 0xc8e   : > { %3646 = vpow2.f32 %v1566_v25 }
 0xc9b   : > { %v3647_v26 = vpop.eup %3646 }
 0xc9c   : > { %v1568_v27 = vsel %vm866_vm2, %v3647_v26, 0.0 }
 0xc9d   : > { %1569 = vadd.xlane.f32.xlu0 %v1568_v27 }
 0xcb3   : > { %1574 = vrot.lane.b32.xlu0 %v1512_v6, %s3737_s24  ;;  %s3213_s24 = sshll.u32 %s3880_s5, 7  ;;  %s3678_s5 = scalar_lea.vmem %s3677_s29, 256 }
 0xd26   : > { %v1570_v29 = vpop.xlane.xlu0 %1569 }
 0xd27   : > { %3648 = vrcp.f32 %v1570_v29 }
 0xd2a   : > { %v1575_v30 = vpop.permute.xlu0 %1574 }
 0xd2b   : > { %v1580_v31 = vsel %vm930_vm3, %v1575_v30, 0 }
 0xd2c   : > { %3402 = vmatpush3.bf16.msra.mxu0 %v1580_v31 }
 0xd2d   : > { %3413 = vmatprep.subr.bf16.mxu0 %v3734_v1 }
 0xd34   : > { %v3649_v32 = vpop.eup %3648 }
 0xd35   : > { %v1572_v33 = vmul.f32 %v3649_v32, %v3647_v26 }
 0xd37   : > { %v1573_v34 = vpack.c.bf16 %v1572_v33, %v1572_v33 }
 0xd39   : > { %3404 = vmatmul.mubr.msk.bf16.vlgmr.msra.gmra.mxu0 %vm866_vm2, %v1573_v34  ;;  %v3622_v34 = vld [vmem:[%s4459_s9 + $0x18] sm:$0xff]  }
 0xd3a   : > { %3417 = vmatprep.mubr.msk.bf16.mxu0 %vm3735_vm0, %v3734_v1  ;;  %3414 = vmatpush3.bf16.msra.mxu0 %v3620_v40 }
 0xd3b   : > { %3415 = vmatprep.subr.bf16.mxu0 %v3734_v1 }
 0xd3e   : > { %3416 = vmatpush3.bf16.msra.mxu0 %v3621_v48 }
 0xd3f   : > { %3429 = vmatprep.subr.bf16.mxu0 %v3734_v1 }
 0xdf9   : > { %v1616_v35 = vpop.f32.mrf.mxu0 }
 0xdfa   : > { %v1622_v36 = vpack.c.bf16 %v1616_v35, %v1616_v35  ;;  %v3623_v35 = vld [vmem:[%s4459_s9 + $0x10] sm:$0xff]  }
 0xdfb   : > { %v3405_v37 = vpop.f32.mrf.mxu0 }
 0xdfc   : > { %3410 = vmatmul.mubr.msk.bf16.vlgmr.msra.gmra.mxu1 %vm866_vm2, %v1622_v36  ;;  %v1721_v36 = vld [vmem:[%s4463_s11] sm:$0xf] }
 0xdfd   : > { %v1619_v38 = vpop.f32.mrf.mxu0  ;;  %3425 = vmatprep.mubr.msk.bf16.mxu1 %vm3735_vm0, %v3734_v1  ;;  %3422 = vmatpush3.bf16.msra.mxu1 %v1798_v49  ;;  %v1970_v37 = vsel %vm930_vm3, %v1721_v36, 0 }
 0xdfe   : > { %3423 = vmatprep.subr.bf16.mxu1 %v3734_v1 }
 0xdff   : > { %v3406_v39 = vpop.f32.mrf.mxu0 }
 0xebc   : > { %v1663_v41 = vpop.f32.mrf.mxu1 }
 0xebd   : > { %v1669_v42 = vadd.f32 %v1663_v41, %v1453_v12 }
 0xebe   : > { %v3411_v43 = vpop.f32.mrf.mxu1 }
 0xebf   : > { %v1670_v44 = vadd.f32 %v1669_v42, %v3929_v3 }
 0xec0   : > { %v1666_v45 = vpop.f32.mrf.mxu1 }
 0xec1   : > { %v1673_v46 = vsel %vm818_vm1, %v1670_v44, 0.0 }
 0xec2   : > { %1674 = vadd.xlane.f32.xlu0 %v1673_v46  ;;  %v3412_v47 = vpop.f32.mrf.mxu1 }
 0xf4b   : > { %v1675_v50 = vpop.xlane.xlu0 %1674 }
 0xf4c   : > { %v1677_v51 = vmul.f32 0.03125, %v1675_v50 }
 0xf4e   : > { %v1678_v3 = vsub.f32 %v1670_v44, %v1677_v51  ;;  %v3174_v44 = vld [vmem:[%s4460_s10 + $0x1] ss:$0 sm:$0xff] }
 0xf50   : > { %v1679_v52 = vmul.f32 %v1678_v3, %v1678_v3 }
 0xf52   : > { %v1680_v53 = vsel %vm818_vm1, %v1679_v52, 0.0 }
 0xf53   : > { %1681 = vadd.xlane.f32.xlu1 %v1680_v53 }
 0xf64   : > { %1795 = vrot.lane.b32.xlu1 %v3621_v48, %s4457_s3 }
 0xf68   : > { %1801 = vrot.lane.b32.xlu1 %v3165_v54, %s4457_s3 }
 0xfdc   : > { %v1682_v55 = vpop.xlane.xlu1 %1681 }
 0xfdd   : > { %v1683_v56 = vmul.f32 0.03125, %v1682_v55 }
 0xfdf   : > { %v1684_v59 = vadd.f32 1e-05, %v1683_v56 }
 0xfe0   : > { %v1796_v60 = vpop.permute.xlu1 %1795 }
 0xfe1   : > { %3650 = vrsqrt.f32 %v1684_v59  ;;  %3424 = vmatpush3.bf16.msra.mxu1 %v1796_v60 }
 0xfe2   : > { %3435 = vmatprep.subr.bf16.mxu1 %v3734_v1 }
 0xfe4   : > { %3426 = vmatmul.mubr.msk.bf16.vlgmr.msra.gmra.mxu1 %vm818_vm1, %v4119_v61  ;;  %v1802_v8 = vpop.permute.xlu1 %1801 }
 0xfe5   : > { %3437 = vmatprep.mubr.msk.bf16.mxu1 %vm3735_vm0, %v3734_v1 }
 0xfee   : > { %v3651_v62 = vpop.eup %3650 }
 0xfef   : > { %v1686_v63 = vmul.f32 %v3651_v62, %v1678_v3 }
 0xff1   : > { %v1693_v2 = vmul.f32 %v3162_v4, %v1686_v63 }
 0xff3   : > { %v4132_v5 = vadd.f32 %v3163_v0, %v1693_v2 }
 0xff5   : > { %v4136_v6 = vpack.c.bf16 %v4132_v5, %v4132_v5 }
 0xff7   : > { %3418 = vmatmul.mubr.msk.bf16.vlgmr.msra.gmra.mxu0 %vm818_vm1, %v4136_v6 }
 0xff8   : > { %3431 = vmatprep.mubr.msk.bf16.mxu0 %vm3735_vm0, %v3734_v1 }
0x10a4   : > { %v1841_v7 = vpop.f32.mrf.mxu1 }
0x10a5   : > { %v1842_v10 = vadd.f32 %v1841_v7, %v1802_v8 }
0x10a6   : > { %v3427_v9 = vpop.f32.mrf.mxu1 }
0x10a8   : > { %v1844_v11 = vpop.f32.mrf.mxu1 }
0x10a9   : > { %v1845_v12 = vadd.f32 %v1844_v11, %v1802_v8 }
0x10aa   : > { %v3428_v13 = vpop.f32.mrf.mxu1 }
0x10ab   : > { %v1849_v14 = vpack.c.bf16 %v1845_v12, %v1842_v10 }
0x10ad   : > { %v1860_v15 = vsel %vm866_vm2, %v1849_v14, 0 }
0x10ae   : > { %3430 = vmatpush3.bf16.xpose.msra.mxu0 %v1860_v15 }
0x10af   : > { %3441 = vmatprep.subr.bf16.mxu0 %v3734_v1 }
0x10b7   : > { %v1789_v17 = vpop.f32.mrf.mxu0 }
0x10b8   : > { %v1790_v18 = vadd.f32 %v3165_v54, %v1789_v17 }
0x10b9   : > { %v3419_v19 = vpop.f32.mrf.mxu0 }
0x10ba   : > { %v1848_v20 = vpack.c.bf16 %v1790_v18, %v1790_v18 }
0x10bb   : > { %v1792_v21 = vpop.f32.mrf.mxu0 }
0x10bc   : > { %3432 = vmatmul.mubr.msk.bf16.vlgmr.msra.gmra.mxu0 %vm866_vm2, %v1848_v20 }
0x10bd   : > { %v3420_v22 = vpop.f32.mrf.mxu0  ;;  %3443 = vmatprep.mubr.msk.bf16.mxu0 %vm3735_vm0, %v3734_v1  ;;  %3442 = vmatpush3.bf16.msra.mxu0 %v1970_v37 }
0x10be   : > { %3455 = vmatprep.subr.bf16.mxu0 %v3734_v1 }
0x117c   : > { %v1896_v24 = vpop.f32.mrf.mxu0 }
0x117d   : > { %v1897_v25 = vadd.f32 %v4151_v23, %v1896_v24 }
0x117e   : > { %v3433_v26 = vpop.f32.mrf.mxu0 }
0x117f   : > { %v1903_v27 = vsel %vm1902_vm4, %v1897_v25, -inf  ;;  %v3624_v26 = vld [vmem:[%s4459_s9 + $0x28] sm:$0xff]  }
0x1180   : > { %1904 = vmax.xlane.f32.xlu1 %v1903_v27  ;;  %v1899_v16 = vpop.f32.mrf.mxu0  ;;  %v3625_v27 = vld [vmem:[%s4459_s9 + $0x20] sm:$0xff]  }
0x1181   : > { %v1722_v16 = vld [vmem:[%s4463_s11 + $0x4] sm:$0xf] }
0x1182   : > { %v3434_v28 = vpop.f32.mrf.mxu0 }
0x1183   : > { %v2235_v28 = vsel %vm930_vm3, %v1722_v16, 0 }
0x1209   : > { %v1905_v29 = vpop.xlane.xlu1 %1904 }
0x120a   : > { %v1906_v30 = vsub.f32 %v1897_v25, %v1905_v29 }
0x120c   : > { %v1907_v31 = vmul.f32 1.442695, %v1906_v30 }
0x120e   : > { %3652 = vpow2.f32 %v1907_v31 }
0x121b   : > { %v3653_v32 = vpop.eup %3652 }
0x121c   : > { %v1909_v33 = vsel %vm1902_vm4, %v3653_v32, 0.0 }
0x121d   : > { %1910 = vadd.xlane.f32.xlu0 %v1909_v33  ;;  %v3182_v33 = vld [vmem:[%s4460_s10 + $0x2] ss:$0 sm:$0xff] }
0x1233   : > { %1916 = vrot.lane.b32.xlu0 %v1849_v14, %s4457_s3 }
0x1237   : > { %2073 = vrot.lane.b32.xlu0 %v3622_v34, %s4457_s3 }
0x123b   : > { %2071 = vrot.lane.b32.xlu0 %v3623_v35, %s4457_s3 }
0x123f   : > { %2077 = vrot.lane.b32.xlu0 %v3174_v44, %s4457_s3 }
0x12a6   : > { %v1911_v38 = vpop.xlane.xlu0 %1910 }
0x12a7   : > { %3654 = vrcp.f32 %v1911_v38 }
0x12aa   : > { %v1917_v39 = vpop.permute.xlu0 %1916 }
0x12ab   : > { %v1923_v40 = vsel %vm1921_vm5, %v1917_v39, 0 }
0x12ac   : > { %3436 = vmatpush3.bf16.msra.mxu1 %v1923_v40 }
0x12ad   : > { %3447 = vmatprep.subr.bf16.mxu1 %v3734_v1 }
0x12ae   : > { %v2074_v45 = vpop.permute.xlu0 %2073 }
0x12b2   : > { %v2072_v50 = vpop.permute.xlu0 %2071 }
0x12b4   : > { %v3655_v41 = vpop.eup %3654 }
0x12b5   : > { %v1913_v42 = vmul.f32 %v3655_v41, %v3653_v32 }
0x12b6   : > { %v2078_v60 = vpop.permute.xlu0 %2077 }
0x12b7   : > { %v1914_v43 = vpack.c.bf16 %v1913_v42, %v1913_v42 }
0x12b9   : > { %3438 = vmatmul.mubr.msk.bf16.vlgmr.msra.gmra.mxu1 %vm1902_vm4, %v1914_v43 }
0x12ba   : > { %3448 = vmatpush3.bf16.msra.mxu1 %v3622_v34  ;;  %3451 = vmatprep.mubr.msk.bf16.mxu1 %vm3735_vm0, %v3734_v1 }
0x12bb   : > { %3449 = vmatprep.subr.bf16.mxu1 %v3734_v1 }
0x12be   : > { %3450 = vmatpush3.bf16.msra.mxu1 %v3623_v35 }
0x12bf   : > { %3463 = vmatprep.subr.bf16.mxu1 %v3734_v1 }
0x12c1   : > { %3452 = vmatmul.mubr.msk.bf16.vlgmr.msra.gmra.mxu1 %vm818_vm1, %v4136_v6 }
0x12c2   : > { %3465 = vmatprep.mubr.msk.bf16.mxu1 %vm3735_vm0, %v3734_v1 }
0x1379   : > { %v1959_v46 = vpop.f32.mrf.mxu1 }
0x137a   : > { %v1965_v47 = vpack.c.bf16 %v1959_v46, %v1959_v46 }
0x137b   : > { %v3439_v48 = vpop.f32.mrf.mxu1 }
0x137c   : > { %3444 = vmatmul.mubr.msk.bf16.vlgmr.msra.gmra.mxu0 %vm866_vm2, %v1965_v47 }
0x137d   : > { %v1962_v49 = vpop.f32.mrf.mxu1  ;;  %3456 = vmatpush3.bf16.msra.mxu0 %v2074_v45  ;;  %3459 = vmatprep.mubr.msk.bf16.mxu0 %vm3735_vm0, %v3734_v1  ;;  %v3164_v45 = vld [vmem:[%s4464_s12] ss:$0 sm:$0xff]  ;;  %s3022_s12 = scalar_lea.sflag [#allocation3], %s736_s2 }
0x137e   : > { %3457 = vmatprep.subr.bf16.mxu0 %v3734_v1 }
0x137f   : > { %v3440_v51 = vpop.f32.mrf.mxu1 }
0x1381   : > { %v2065_v3 = vpop.f32.mrf.mxu1  ;;  %3458 = vmatpush3.bf16.msra.mxu0 %v2072_v50 }
0x1382   : > { %3469 = vmatprep.subr.bf16.mxu0 %v3734_v1  ;;  %v2066_v9 = vadd.f32 %v3174_v44, %v2065_v3 }
0x1383   : > { %v3453_v52 = vpop.f32.mrf.mxu1 }
0x1384   : > { %3460 = vmatmul.mubr.msk.bf16.vlgmr.msra.gmra.mxu0 %vm818_vm1, %v4119_v61  ;;  %v2121_v10 = vpack.c.bf16 %v2066_v9, %v2066_v9 }
0x1385   : > { %v2068_v53 = vpop.f32.mrf.mxu1  ;;  %3471 = vmatprep.mubr.msk.bf16.mxu0 %vm3735_vm0, %v3734_v1 }
0x1387   : > { %v3454_v54 = vpop.f32.mrf.mxu1 }
0x143c   : > { %v4194_v55 = vpop.f32.mrf.mxu0 }
0x143d   : > { %v2012_v46 = vadd.f32 %v3164_v45, %v4194_v55 }
0x143e   : > { %v3445_v56 = vpop.f32.mrf.mxu0 }
0x1440   : > { %v2009_v57 = vpop.f32.mrf.mxu0 }
0x1442   : > { %v3446_v58 = vpop.f32.mrf.mxu0 }
0x1444   : > { %v2114_v59 = vpop.f32.mrf.mxu0 }
0x1445   : > { %v2115_v63 = vadd.f32 %v2114_v59, %v2078_v60 }
0x1446   : > { %v3461_v62 = vpop.f32.mrf.mxu0 }
0x1448   : > { %v2117_v4 = vpop.f32.mrf.mxu0 }
0x1449   : > { %v2118_v0 = vadd.f32 %v2117_v4, %v2078_v60 }
0x144a   : > { %v3462_v2 = vpop.f32.mrf.mxu0 }
0x144b   : > { %v2122_v7 = vpack.c.bf16 %v2118_v0, %v2115_v63 }
0x144d   : > { %v2127_v8 = vsel %vm866_vm2, %v2122_v7, 0 }
0x144e   : > { %3464 = vmatpush3.bf16.xpose.msra.mxu1 %v2127_v8 }
0x144f   : > { %3475 = vmatprep.subr.bf16.mxu1 %v3734_v1 }
0x1455   : > { %3466 = vmatmul.mubr.msk.bf16.vlgmr.msra.gmra.mxu1 %vm866_vm2, %v2121_v10 }
0x1456   : > { %3477 = vmatprep.mubr.msk.bf16.mxu1 %vm3735_vm0, %v3734_v1  ;;  %3476 = vmatpush3.bf16.msra.mxu1 %v2235_v28 }
0x1457   : > { %3489 = vmatprep.subr.bf16.mxu1 %v3734_v1 }
0x1515   : > { %v2163_v11 = vpop.f32.mrf.mxu1 }
0x1516   : > { %v2164_v12 = vadd.f32 %v4151_v23, %v2163_v11 }
0x1517   : > { %v3467_v13 = vpop.f32.mrf.mxu1 }
0x1518   : > { %v2169_v14 = vsel %vm1902_vm4, %v2164_v12, -inf }
0x1519   : > { %2170 = vmax.xlane.f32.xlu1 %v2169_v14  ;;  %v2166_v15 = vpop.f32.mrf.mxu1  ;;  %v3626_v14 = vld [vmem:[%s4459_s9 + $0x38] sm:$0xff]  }
0x151a   : > { %v3627_v15 = vld [vmem:[%s4459_s9 + $0x30] sm:$0xff]  }
0x151b   : > { %v3468_v17 = vpop.f32.mrf.mxu1 }
0x151c   : > { %v1723_v17 = vld [vmem:[%s4463_s11 + $0x8] sm:$0xf] }
0x152a   : > { %2182 = vrot.lane.b32.xlu1 %v2122_v7, %s4457_s3 }
0x152e   : > { %2338 = vrot.lane.b32.xlu1 %v3624_v26, %s4457_s3 }
0x1532   : > { %2336 = vrot.lane.b32.xlu1 %v3625_v27, %s4457_s3 }
0x1536   : > { %2342 = vrot.lane.b32.xlu1 %v3182_v33, %s4457_s3 }
0x15a2   : > { %v2171_v18 = vpop.xlane.xlu1 %2170 }
0x15a3   : > { %v2172_v19 = vsub.f32 %v2164_v12, %v2171_v18  ;;  %v2500_v18 = vsel %vm930_vm3, %v1723_v17, 0 }
0x15a5   : > { %v2173_v20 = vmul.f32 1.442695, %v2172_v19 }
0x15a6   : > { %v2183_v21 = vpop.permute.xlu1 %2182 }
0x15a7   : > { %3656 = vpow2.f32 %v2173_v20  ;;  %v2188_v22 = vsel %vm1921_vm5, %v2183_v21, 0 }
0x15a8   : > { %3470 = vmatpush3.bf16.msra.mxu0 %v2188_v22 }
0x15a9   : > { %3481 = vmatprep.subr.bf16.mxu0 %v3734_v1 }
0x15aa   : > { %v2339_v34 = vpop.permute.xlu1 %2338 }
0x15ae   : > { %v2337_v39 = vpop.permute.xlu1 %2336 }
0x15b2   : > { %v2343_v52 = vpop.permute.xlu1 %2342 }
0x15b4   : > { %v3657_v24 = vpop.eup %3656 }
0x15b5   : > { %v2175_v25 = vsel %vm1902_vm4, %v3657_v24, 0.0 }
0x15b6   : > { %2176 = vadd.xlane.f32.xlu0 %v2175_v25 }
0x163f   : > { %v2177_v29 = vpop.xlane.xlu0 %2176 }
0x1640   : > { %3658 = vrcp.f32 %v2177_v29 }
0x164d   : > { %v3659_v30 = vpop.eup %3658 }
0x164e   : > { %v2179_v31 = vmul.f32 %v3659_v30, %v3657_v24 }
0x1650   : > { %v2180_v32 = vpack.c.bf16 %v2179_v31, %v2179_v31 }
0x1652   : > { %3472 = vmatmul.mubr.msk.bf16.vlgmr.msra.gmra.mxu0 %vm1902_vm4, %v2180_v32 }
0x1653   : > { %3482 = vmatpush3.bf16.msra.mxu0 %v3624_v26  ;;  %3485 = vmatprep.mubr.msk.bf16.mxu0 %vm3735_vm0, %v3734_v1  ;;  %v3190_v26 = vld [vmem:[%s4460_s10 + $0x3] ss:$0 sm:$0xff] }
0x1654   : > { %3483 = vmatprep.subr.bf16.mxu0 %v3734_v1 }
0x1657   : > { %3484 = vmatpush3.bf16.msra.mxu0 %v3625_v27 }
0x1658   : > { %3497 = vmatprep.subr.bf16.mxu0 %v3734_v1 }
0x165a   : > { %3486 = vmatmul.mubr.msk.bf16.vlgmr.msra.gmra.mxu0 %vm818_vm1, %v4136_v6 }
0x165b   : > { %3499 = vmatprep.mubr.msk.bf16.mxu0 %vm3735_vm0, %v3734_v1 }
0x1712   : > { %v2224_v35 = vpop.f32.mrf.mxu0 }
0x1713   : > { %v2230_v36 = vpack.c.bf16 %v2224_v35, %v2224_v35 }
0x1714   : > { %v3473_v37 = vpop.f32.mrf.mxu0 }
0x1715   : > { %3478 = vmatmul.mubr.msk.bf16.vlgmr.msra.gmra.mxu1 %vm866_vm2, %v2230_v36 }
0x1716   : > { %v2227_v38 = vpop.f32.mrf.mxu0  ;;  %3490 = vmatpush3.bf16.msra.mxu1 %v2339_v34  ;;  %3493 = vmatprep.mubr.msk.bf16.mxu1 %vm3735_vm0, %v3734_v1 }
0x1717   : > { %3491 = vmatprep.subr.bf16.mxu1 %v3734_v1 }
0x1718   : > { %v3474_v40 = vpop.f32.mrf.mxu0 }
0x171a   : > { %v2330_v41 = vpop.f32.mrf.mxu0  ;;  %3492 = vmatpush3.bf16.msra.mxu1 %v2337_v39 }
0x171b   : > { %3503 = vmatprep.subr.bf16.mxu1 %v3734_v1  ;;  %v2331_v62 = vadd.f32 %v3182_v33, %v2330_v41 }
0x171c   : > { %v3487_v42 = vpop.f32.mrf.mxu0 }
0x171d   : > { %3494 = vmatmul.mubr.msk.bf16.vlgmr.msra.gmra.mxu1 %vm818_vm1, %v4119_v61  ;;  %v2386_v55 = vpack.c.bf16 %v2331_v62, %v2331_v62 }
0x171e   : > { %v2333_v43 = vpop.f32.mrf.mxu0  ;;  %3505 = vmatprep.mubr.msk.bf16.mxu1 %vm3735_vm0, %v3734_v1 }
0x1720   : > { %v3488_v44 = vpop.f32.mrf.mxu0 }
0x17d5   : > { %v2271_v47 = vpop.f32.mrf.mxu1 }
0x17d6   : > { %v4246_v48 = vadd.f32 %v2271_v47, %v2012_v46 }
0x17d7   : > { %v3479_v49 = vpop.f32.mrf.mxu1 }
0x17d9   : > { %v2274_v50 = vpop.f32.mrf.mxu1 }
0x17db   : > { %v3480_v51 = vpop.f32.mrf.mxu1 }
0x17dd   : > { %v2379_v3 = vpop.f32.mrf.mxu1 }
0x17de   : > { %v2380_v56 = vadd.f32 %v2379_v3, %v2343_v52 }
0x17df   : > { %v3495_v53 = vpop.f32.mrf.mxu1 }
0x17e1   : > { %v2382_v54 = vpop.f32.mrf.mxu1 }
0x17e2   : > { %v2383_v57 = vadd.f32 %v2382_v54, %v2343_v52 }
0x17e3   : > { %v3496_v58 = vpop.f32.mrf.mxu1 }
0x17e4   : > { %v2387_v59 = vpack.c.bf16 %v2383_v57, %v2380_v56 }
0x17e6   : > { %v2392_v60 = vsel %vm866_vm2, %v2387_v59, 0 }
0x17e7   : > { %3498 = vmatpush3.bf16.xpose.msra.mxu0 %v2392_v60 }
0x17e8   : > { %3509 = vmatprep.subr.bf16.mxu0 %v3734_v1 }
0x17ee   : > { %3500 = vmatmul.mubr.msk.bf16.vlgmr.msra.gmra.mxu0 %vm866_vm2, %v2386_v55 }
0x17ef   : > { %3511 = vmatprep.mubr.msk.bf16.mxu0 %vm3735_vm0, %v3734_v1  ;;  %3510 = vmatpush3.bf16.msra.mxu0 %v2500_v18 }
0x17f0   : > { %3523 = vmatprep.subr.bf16.mxu0 %v3734_v1 }
0x18ae   : > { %v2428_v4 = vpop.f32.mrf.mxu0 }
0x18af   : > { %v2429_v63 = vadd.f32 %v4151_v23, %v2428_v4  ;;  %v1724_v4 = vld [vmem:[%s4463_s11 + $0xc] sm:$0xf]  ;;  %s3033_s11 = scalar_lea.hbm %s4421_s23, %s3213_s24 }
0x18b0   : > { %v3501_v0 = vpop.f32.mrf.mxu0 }
0x18b1   : > { %v2434_v2 = vsel %vm1902_vm4, %v2429_v63, -inf }
0x18b2   : > { %2435 = vmax.xlane.f32.xlu1 %v2434_v2  ;;  %v2431_v7 = vpop.f32.mrf.mxu0 }
0x18b4   : > { %v3502_v8 = vpop.f32.mrf.mxu0 }
0x193b   : > { %v2436_v9 = vpop.xlane.xlu1 %2435 }
0x193c   : > { %v2437_v10 = vsub.f32 %v2429_v63, %v2436_v9  ;;  %v2765_v63 = vsel %vm930_vm3, %v1724_v4, 0  ;;  %v3210_v4 = vld [vmem:[%s4419_s21] ss:$0 sm:$0xff] }
0x193e   : > { %v2438_v11 = vmul.f32 1.442695, %v2437_v10 }
0x1940   : > { %3660 = vpow2.f32 %v2438_v11 }
0x194d   : > { %v3661_v12 = vpop.eup %3660 }
0x194e   : > { %v2440_v13 = vsel %vm1902_vm4, %v3661_v12, 0.0 }
0x194f   : > { %2441 = vadd.xlane.f32.xlu0 %v2440_v13 }
0x1965   : > { %2447 = vrot.lane.b32.xlu0 %v2387_v59, %s4457_s3 }
0x1969   : > { %2603 = vrot.lane.b32.xlu0 %v3626_v14, %s4457_s3 }
0x196d   : > { %2601 = vrot.lane.b32.xlu0 %v3627_v15, %s4457_s3 }
0x1971   : > { %2607 = vrot.lane.b32.xlu0 %v3190_v26, %s4457_s3 }
0x19d8   : > { %v2442_v19 = vpop.xlane.xlu0 %2441 }
0x19d9   : > { %3662 = vrcp.f32 %v2442_v19 }
0x19dc   : > { %v2448_v20 = vpop.permute.xlu0 %2447 }
0x19dd   : > { %v2453_v21 = vsel %vm1921_vm5, %v2448_v20, 0 }
0x19de   : > { %3504 = vmatpush3.bf16.msra.mxu1 %v2453_v21 }
0x19df   : > { %3515 = vmatprep.subr.bf16.mxu1 %v3734_v1 }
0x19e0   : > { %v2604_v27 = vpop.permute.xlu0 %2603 }
0x19e6   : > { %v3663_v22 = vpop.eup %3662 }
0x19e7   : > { %v2444_v24 = vmul.f32 %v3663_v22, %v3661_v12 }
0x19e9   : > { %v2445_v25 = vpack.c.bf16 %v2444_v24, %v2444_v24 }
0x19eb   : > { %3506 = vmatmul.mubr.msk.bf16.vlgmr.msra.gmra.mxu1 %vm1902_vm4, %v2445_v25 }
0x19ec   : > { %3516 = vmatpush3.bf16.msra.mxu1 %v3626_v14  ;;  %3519 = vmatprep.mubr.msk.bf16.mxu1 %vm3735_vm0, %v3734_v1 }
0x19ed   : > { %3517 = vmatprep.subr.bf16.mxu1 %v3734_v1 }
0x19f0   : > { %3518 = vmatpush3.bf16.msra.mxu1 %v3627_v15 }
0x19f1   : > { %3531 = vmatprep.subr.bf16.mxu1 %v3734_v1 }
0x19f3   : > { %3520 = vmatmul.mubr.msk.bf16.vlgmr.msra.gmra.mxu1 %vm818_vm1, %v4136_v6  ;;  %v2602_v6 = vpop.permute.xlu0 %2601 }
0x19f4   : > { %3533 = vmatprep.mubr.msk.bf16.mxu1 %vm3735_vm0, %v3734_v1 }
0x19f7   : > { %v2608_v42 = vpop.permute.xlu0 %2607 }
0x1aab   : > { %v2489_v16 = vpop.f32.mrf.mxu1 }
0x1aac   : > { %v2495_v28 = vpack.c.bf16 %v2489_v16, %v2489_v16  ;;  %v3628_v16 = vld [vmem:[%s4411_s13 + $0x8] sm:$0xff]  }
0x1aad   : > { %v3507_v29 = vpop.f32.mrf.mxu1 }
0x1aae   : > { %3512 = vmatmul.mubr.msk.bf16.vlgmr.msra.gmra.mxu0 %vm866_vm2, %v2495_v28  ;;  %v3630_v28 = vld [vmem:[%s4413_s15 + $0x18] sm:$0xff]   ;;  %v3631_v29 = vld [vmem:[%s4413_s15 + $0x10] sm:$0xff]  }
0x1aaf   : > { %v2492_v30 = vpop.f32.mrf.mxu1  ;;  %3524 = vmatpush3.bf16.msra.mxu0 %v2604_v27  ;;  %3527 = vmatprep.mubr.msk.bf16.mxu0 %vm3735_vm0, %v3734_v1 }
0x1ab0   : > { %3525 = vmatprep.subr.bf16.mxu0 %v3734_v1 }
0x1ab1   : > { %v3508_v31 = vpop.f32.mrf.mxu1 }
0x1ab3   : > { %v2595_v32 = vpop.f32.mrf.mxu1  ;;  %3526 = vmatpush3.bf16.msra.mxu0 %v2602_v6 }
0x1ab4   : > { %3537 = vmatprep.subr.bf16.mxu0 %v3734_v1  ;;  %v2596_v50 = vadd.f32 %v3190_v26, %v2595_v32 }
0x1ab5   : > { %v3521_v33 = vpop.f32.mrf.mxu1 }
0x1ab6   : > { %3528 = vmatmul.mubr.msk.bf16.vlgmr.msra.gmra.mxu0 %vm818_vm1, %v4119_v61  ;;  %v2651_v51 = vpack.c.bf16 %v2596_v50, %v2596_v50  ;;  %v3198_v33 = vld [vmem:[%s4417_s19] ss:$0 sm:$0xff] }
0x1ab7   : > { %v2598_v34 = vpop.f32.mrf.mxu1  ;;  %3539 = vmatprep.mubr.msk.bf16.mxu0 %vm3735_vm0, %v3734_v1 }
0x1ab9   : > { %v3522_v35 = vpop.f32.mrf.mxu1 }
0x1aba   : > { %v3199_v35 = vld [vmem:[%s4418_s20] ss:$0 sm:$0xff] }
0x1b6e   : > { %v2536_v36 = vpop.f32.mrf.mxu0 }
0x1b6f   : > { %v2542_v37 = vadd.f32 %v2536_v36, %v4246_v48 }
0x1b70   : > { %v3513_v38 = vpop.f32.mrf.mxu0 }
0x1b72   : > { %v2539_v39 = vpop.f32.mrf.mxu0 }
0x1b73   : > { %v3632_v39 = vld [vmem:[%s4413_s15 + $0x8] sm:$0xff]  }
0x1b74   : > { %v3514_v40 = vpop.f32.mrf.mxu0 }
0x1b75   : > { %v3633_v40 = vld [vmem:[%s4413_s15] sm:$0xff]  }
0x1b76   : > { %v2644_v41 = vpop.f32.mrf.mxu0 }
0x1b77   : > { %v2645_v45 = vadd.f32 %v2644_v41, %v2608_v42  ;;  %v3200_v41 = vld [vmem:[%s4412_s14] ss:$0 sm:$0xff] }
0x1b78   : > { %v3529_v43 = vpop.f32.mrf.mxu0 }
0x1b7a   : > { %v2647_v44 = vpop.f32.mrf.mxu0 }
0x1b7b   : > { %v2648_v46 = vadd.f32 %v2647_v44, %v2608_v42 }
0x1b7c   : > { %v3530_v47 = vpop.f32.mrf.mxu0 }
0x1b7d   : > { %v2652_v49 = vpack.c.bf16 %v2648_v46, %v2645_v45 }
0x1b7f   : > { %v2657_v61 = vsel %vm866_vm2, %v2652_v49, 0 }
0x1b80   : > { %3532 = vmatpush3.bf16.xpose.msra.mxu1 %v2657_v61 }
0x1b81   : > { %3543 = vmatprep.subr.bf16.mxu1 %v3734_v1 }
0x1b87   : > { %3534 = vmatmul.mubr.msk.bf16.vlgmr.msra.gmra.mxu1 %vm866_vm2, %v2651_v51 }
0x1b88   : > { %3545 = vmatprep.mubr.msk.bf16.mxu1 %vm3735_vm0, %v3734_v1  ;;  %3544 = vmatpush3.bf16.msra.mxu1 %v2765_v63 }
0x1b89   : > { %3557 = vmatprep.subr.bf16.mxu1 %v3734_v1 }
0x1c47   : > { %v2693_v48 = vpop.f32.mrf.mxu1 }
0x1c48   : > { %v2694_v3 = vadd.f32 %v4151_v23, %v2693_v48 }
0x1c49   : > { %v3535_v52 = vpop.f32.mrf.mxu1 }
0x1c4a   : > { %v2699_v53 = vsel %vm1902_vm4, %v2694_v3, -inf }
0x1c4b   : > { %2700 = vmax.xlane.f32.xlu1 %v2699_v53  ;;  %v2696_v54 = vpop.f32.mrf.mxu1 }
0x1c4d   : > { %v3536_v56 = vpop.f32.mrf.mxu1 }
0x1c5c   : > { %2712 = vrot.lane.b32.xlu1 %v2652_v49, %s4457_s3  ;;  %s738_s3 = scalar_lea.vmem [#allocation2], %s3128_s27 }
0x1c5d   : > { %s3035_s1 = sshll.u32 %s738_s3, 4  ;;  %s3036_s1 = int_to_ptr.vmem [resolvable:$true] %s3035_s1 }
0x1c5e   : > { %s3672_s0 = scalar_lea.vmem %s3036_s1, 128  ;;  %p3679_p0 = scmp.lt.s32.totalorder %s3036_s1, %s3677_s29 }
0x1c5f   : > { %p3673_p11 = scmp.ne.s32.totalorder %s3036_s1, %s3672_s0  ;;  %p3680_p1 = scmp.lt.s32.totalorder %s3678_s5, %s3672_s0 }
0x1c61   : > { %p3674_p12 = pnand %p3673_p11, %p3897_p5  ;;  %p3681_p2 = por %p3680_p1, %p3679_p0 }
0x1c63   : > { %p3675_p13 = pneg %p3674_p12 }
0x1c65   : > { %p3682_p3 = pnand %p3681_p2, %p3675_p13 }
0x1cd4   : > { %v2701_v57 = vpop.xlane.xlu1 %2700 }
0x1cd5   : > { %v2702_v58 = vsub.f32 %v2694_v3, %v2701_v57 }
0x1cd7   : > { %v2703_v59 = vmul.f32 1.442695, %v2702_v58 }
0x1cd8   : > { %v2713_v60 = vpop.permute.xlu1 %2712 }
0x1cd9   : > { %3664 = vpow2.f32 %v2703_v59  ;;  %v2718_v62 = vsel %vm1921_vm5, %v2713_v60, 0 }
0x1cda   : > { %3538 = vmatpush3.bf16.msra.mxu0 %v2718_v62 }
0x1cdb   : > { %3549 = vmatprep.subr.bf16.mxu0 %v3734_v1 }
0x1ce6   : > { %v3665_v55 = vpop.eup %3664 }
0x1ce7   : > { %v2705_v23 = vsel %vm1902_vm4, %v3665_v55, 0.0 }
0x1ce8   : > { %2706 = vadd.xlane.f32.xlu0 %v2705_v23 }
0x1d71   : > { %v2707_v0 = vpop.xlane.xlu0 %2706 }
0x1d72   : > { %3666 = vrcp.f32 %v2707_v0  ;;  %v3211_v0 = vld [vmem:[%s4420_s22] ss:$0 sm:$0xff] }
0x1d7f   : > { %v3667_v2 = vpop.eup %3666 }
0x1d80   : > { %v2709_v7 = vmul.f32 %v3667_v2, %v3665_v55 }
0x1d82   : > { %v2710_v8 = vpack.c.bf16 %v2709_v7, %v2709_v7 }
0x1d84   : > { %3540 = vmatmul.mubr.msk.bf16.vlgmr.msra.gmra.mxu0 %vm1902_vm4, %v2710_v8 }
0x1d85   : > { %3553 = vmatprep.mubr.msk.bf16.mxu0 %vm3735_vm0, %v3734_v1  ;;  %3550 = vmatpush3.bf16.msra.mxu0 %v3628_v16 }
0x1d86   : > { %3551 = vmatprep.subr.bf16.mxu0 %v3734_v1 }
0x1e44   : > { %v2754_v9 = vpop.f32.mrf.mxu0 }
0x1e45   : > { %v2760_v10 = vpack.c.bf16 %v2754_v9, %v2754_v9 }
0x1e46   : > { %v3541_v11 = vpop.f32.mrf.mxu0 }
0x1e47   : > { %3546 = vmatmul.mubr.msk.bf16.vlgmr.msra.gmra.mxu1 %vm866_vm2, %v2760_v10 }
0x1e48   : > { %v2757_v12 = vpop.f32.mrf.mxu0  ;;  %3565 = vmatprep.mubr.msk.bf16.mxu1 %vm3735_vm0, %v3734_v1  ;;  %3558 = vmatpush3.bf16.msra.mxu1 %v3630_v28 }
0x1e49   : > { %3559 = vmatprep.subr.bf16.mxu1 %v3734_v1 }
0x1e4a   : > { %v3542_v13 = vpop.f32.mrf.mxu0 }
0x1e4c   : > { %3560 = vmatpush3.bf16.msra.mxu1 %v3631_v29 }
0x1e4d   : > { %3561 = vmatprep.subr.bf16.mxu1 %v3734_v1 }
0x1e50   : > { %3562 = vmatpush3.bf16.msra.mxu1 %v3632_v39 }
0x1e51   : > { %3563 = vmatprep.subr.bf16.mxu1 %v3734_v1  ;;  %v3204_v1 = vld [vmem:[%s4414_s16] ss:$0 sm:$0xff] }
0x1e54   : > { %3564 = vmatpush3.bf16.msra.mxu1 %v3633_v40 }
0x1f07   : > { %v2801_v14 = vpop.f32.mrf.mxu1 }
0x1f08   : > { %v2807_v15 = vadd.f32 %v2801_v14, %v2542_v37 }
0x1f09   : > { %v3547_v17 = vpop.f32.mrf.mxu1 }
0x1f0a   : > { %v2808_v18 = vadd.f32 %v2807_v15, %v4132_v5  ;;  %v3629_v5 = vld [vmem:[%s4411_s13] sm:$0xff]  }
0x1f0b   : > { %v2804_v19 = vpop.f32.mrf.mxu1  ;;  %3552 = vmatpush3.bf16.msra.mxu0 %v3629_v5 }
0x1f0c   : > { %v2811_v20 = vsel %vm818_vm1, %v2808_v18, 0.0 }
0x1f0d   : > { %2812 = vadd.xlane.f32.xlu1 %v2811_v20  ;;  %v3548_v21 = vpop.f32.mrf.mxu1 }
0x1f96   : > { %v2813_v22 = vpop.xlane.xlu1 %2812 }
0x1f97   : > { %v2814_v24 = vmul.f32 0.03125, %v2813_v22 }
0x1f99   : > { %v2815_v25 = vsub.f32 %v2808_v18, %v2814_v24 }
0x1f9b   : > { %v2816_v26 = vmul.f32 %v2815_v25, %v2815_v25 }
0x1f9d   : > { %v2817_v27 = vsel %vm818_vm1, %v2816_v26, 0.0 }
0x1f9e   : > { %2818 = vadd.xlane.f32.xlu0 %v2817_v27 }
0x2027   : > { %v2819_v30 = vpop.xlane.xlu0 %2818 }
0x2028   : > { %v2820_v6 = vmul.f32 0.03125, %v2819_v30 }
0x202a   : > { %v2821_v31 = vadd.f32 1e-05, %v2820_v6 }
0x202c   : > { %3668 = vrsqrt.f32 %v2821_v31 }
0x2039   : > { %v3669_v32 = vpop.eup %3668 }
0x203a   : > { %v2823_v34 = vmul.f32 %v3669_v32, %v2815_v25 }
0x203c   : > { %v2830_v36 = vmul.f32 %v3198_v33, %v2823_v34 }
0x203e   : > { %v2837_v37 = vadd.f32 %v3199_v35, %v2830_v36 }
0x2040   : > { %v2838_v38 = vpack.c.bf16 %v2837_v37, %v2837_v37 }
0x2042   : > { %3554 = vmatmul.mubr.msk.bf16.vlgmr.msra.gmra.mxu0 %vm818_vm1, %v2838_v38 }
0x2102   : > { %v2899_v42 = vpop.f32.mrf.mxu0 }
0x2103   : > { %v2900_v43 = vadd.f32 %v3200_v41, %v2899_v42 }
0x2104   : > { %v3555_v44 = vpop.f32.mrf.mxu0 }
0x2105   : > { %v2905_v45 = vmax.f32 %v2900_v43, 0.0 }
0x2106   : > { %v2902_v46 = vpop.f32.mrf.mxu0 }
0x2107   : > { %v2906_v47 = vpack.c.bf16 %v2905_v45, %v2905_v45 }
0x2108   : > { %v3556_v49 = vpop.f32.mrf.mxu0 }
0x2109   : > { %3566 = vmatmul.mubr.msk.bf16.vlgmr.msra.gmra.mxu1 %vm2946_vm6, %v2906_v47 }
0x21c9   : > { %v2984_v61 = vpop.f32.mrf.mxu1 }
0x21ca   : > { %v2985_v50 = vadd.f32 %v3204_v1, %v2984_v61 }
0x21cb   : > { %v3567_v51 = vpop.f32.mrf.mxu1 }
0x21cc   : > { %v2990_v48 = vadd.f32 %v2985_v50, %v2837_v37 }
0x21cd   : > { %v2987_v3 = vpop.f32.mrf.mxu1 }
0x21ce   : > { %v2993_v52 = vsel %vm818_vm1, %v2990_v48, 0.0 }
0x21cf   : > { %2994 = vadd.xlane.f32.xlu0 %v2993_v52  ;;  %v3568_v53 = vpop.f32.mrf.mxu1 }
0x2258   : > { %v2995_v54 = vpop.xlane.xlu0 %2994 }
0x2259   : > { %v2996_v56 = vmul.f32 0.03125, %v2995_v54 }
0x225b   : > { %v2997_v57 = vsub.f32 %v2990_v48, %v2996_v56 }
0x225d   : > { %v2998_v58 = vmul.f32 %v2997_v57, %v2997_v57 }
0x225f   : > { %v2999_v59 = vsel %vm818_vm1, %v2998_v58, 0.0 }
0x2260   : > { %3000 = vadd.xlane.f32.xlu0 %v2999_v59 }
0x22e9   : > { %v3001_v60 = vpop.xlane.xlu0 %3000 }
0x22ea   : > { %v3002_v62 = vmul.f32 0.03125, %v3001_v60 }
0x22ec   : > { %v3003_v55 = vadd.f32 1e-05, %v3002_v62 }
0x22ee   : > { %3670 = vrsqrt.f32 %v3003_v55 }
0x22fb   : > { %v3671_v23 = vpop.eup %3670 }
0x22fc   : > { %v3005_v63 = vmul.f32 %v3671_v23, %v2997_v57 }
0x22fe   : > { %v3012_v2 = vmul.f32 %v3210_v4, %v3005_v63 }
0x2300   : > { %v3019_v7 = vadd.f32 %v3211_v0, %v3012_v2 }
0x2302   : > { %3020 = vst.msk [vmem:[%s738_s3] sm:$0xff] %vm818_vm1, %v3019_v7 }
0x2303   : > { %3685 = shalt.err (!%p3682_p3)
}
0x2304   : > { %s3686_s9 = scalar_lea.hbm %s3033_s11, 128  ;;  %s3690_s27 = scalar_lea.hbm %s4421_s23, 512 }
0x2305   : > { %p3687_p4 = scmp.ne.s32.totalorder %s3033_s11, %s3686_s9  ;;  %p3691_p9 = scmp.lt.s32.totalorder %s3033_s11, %s4421_s23 }
0x2306   : > { %p3692_p10 = scmp.lt.s32.totalorder %s3690_s27, %s3686_s9 }
0x2307   : > { %p3688_p7 = pnand %p3687_p4, %p3897_p5 }
0x2308   : > { %p3693_p11 = por %p3692_p10, %p3691_p9 }
0x2309   : > { %p3689_p8 = pneg %p3688_p7 }
0x230b   : > { %p3694_p12 = pnand %p3693_p11, %p3689_p8 }
0x230d   : > { %3697 = shalt.err (!%p3694_p12)
}
0x230e   : > { %3569 = dma.vmem_to_hbm [thread:$0]  (%p3897_p5), %s3036_s1, 128, %s3033_s11, %s3022_s12  }
0x230f PF: > { %p3575_p13 = scmp.ge.s32.totalorder %s3732_s25, 2  ;;  %s3047_s0 = sand.u32 1, %s3720_s4  }
0x2310   : > { %s3048_s6 = scalar_lea.sflag [#allocation3], %s3047_s0 }
0x2311   : > { %p3572_p0 = pnand %p3575_p13, %p3901_p6 }
0x2313   : > { %p3573_p1 = pneg %p3572_p0 }
0x2315   : > { %3715 = dma.done.wait (%p3573_p1), %s3048_s6, 128  }
0x2316   : > { %3717 = vsyncadd (%p3573_p1), %s3048_s6, 4294967168  ;;  %s4466_s25 = sld [smem:[#allocation6_spill]]  ;;  %s4469_s4 = smov %s3724_s30 }
0x2317   : > { %s4467_s29 = sld [smem:[#allocation5_spill]] }
0x2318   : > { %s4468_s24 = sld [smem:[#allocation7_spill]] }
0x231c   : > { %p33_p2 = scmp.ge.s32.totalorder %s4466_s25, 6  }
0x231d   : > { %s4470_s30 = smov %s4467_s29 }
0x231e   :  { %35 = sbr.rel (!%p33_p2) target bundleno = 17 (0x11), region = 156 }
0x2323   :  { %3053 = vsyncpa [#allocation3], 1 }
0x2324   :  { %3055 = vsyncpa [#allocation3 + $0x1], 1 }

</bundles_post_ra>
